<compile_context>
chip_gen: v7x
topology: tpu7x:2x2x1
jax: 0.10.0
libtpu: 0.0.40
codegen_flags: <defaults>
</compile_context>

<pallas_src>
import itertools
from functools import partial

import jax
import jax.numpy as jnp
from jax.experimental import pallas as pl
from jax.experimental.pallas import tpu as pltpu


def _round_up(x, m):
    return ((x + m - 1) // m) * m


def _prod(xs):
    p = 1
    for x in xs:
        p *= int(x)
    return p


# ----------------------------------------------------------------------------
# Pallas kernel: one query tile of separable N-d multilinear interpolation.
# ----------------------------------------------------------------------------
def _interp_kernel(inp_ref, coords_ref, out_ref, *, spatial, d, c_pad, use_bf16):
    """
    inp_ref    : (M, K)   table; K = spatial[-2]*spatial[-1] (d>=2) or spatial[-1]
                          rows ordered (spatial[d-3], ..., spatial[0], C_pad)
    coords_ref : (d, TN)  query coordinates in grid space
    out_ref    : (C_pad, TN)
    """
    TN = coords_ref.shape[-1]

    # Per-axis floor / fractional part, each (1, TN) f32 / int32.
    floors, fracs = [], []
    for k in range(d):
        xk = coords_ref[k:k + 1, :].astype(jnp.float32)
        fk = jnp.floor(xk)
        floors.append(fk.astype(jnp.int32))
        fracs.append(xk - fk)

    # ---- joint weighted one-hot for the MXU-contracted (fused) axis ----------
    # At most 4 corners contribute per query column; if clamping collapses
    # corners onto the same row the weights add, matching 'nearest' mode.
    if d >= 2:
        A, B = spatial[-2], spatial[-1]
        K = A * B
        rows = jax.lax.broadcasted_iota(jnp.int32, (K, TN), 0)
        ia0 = jnp.clip(floors[d - 2], 0, A - 1)
        ia1 = jnp.clip(floors[d - 2] + 1, 0, A - 1)
        ib0 = jnp.clip(floors[d - 1], 0, B - 1)
        ib1 = jnp.clip(floors[d - 1] + 1, 0, B - 1)
        wa1 = fracs[d - 2]
        wa0 = 1.0 - wa1
        wb1 = fracs[d - 1]
        wb0 = 1.0 - wb1
        g = (jnp.where(rows == ia0 * B + ib0, wa0 * wb0, 0.0)
             + jnp.where(rows == ia0 * B + ib1, wa0 * wb1, 0.0)
             + jnp.where(rows == ia1 * B + ib0, wa1 * wb0, 0.0)
             + jnp.where(rows == ia1 * B + ib1, wa1 * wb1, 0.0))
    else:
        size = spatial[0]
        rows = jax.lax.broadcasted_iota(jnp.int32, (size, TN), 0)
        i0 = jnp.clip(floors[0], 0, size - 1)
        i1 = jnp.clip(floors[0] + 1, 0, size - 1)
        w1 = fracs[0]
        w0 = 1.0 - w1
        g = jnp.where(rows == i0, w0, 0.0) + jnp.where(rows == i1, w1, 0.0)

    # ---- MXU contraction over the fused last spatial axes --------------------
    lhs = inp_ref[...]
    if use_bf16:
        lhs = lhs.astype(jnp.bfloat16)
        g = g.astype(jnp.bfloat16)
    else:
        lhs = lhs.astype(jnp.float32)
    t = jnp.dot(lhs, g, preferred_element_type=jnp.float32)   # (M, TN) f32

    # ---- VPU folds over the remaining axes (outermost row group first) -------
    def axis_onehot3d(k):
        # Weighted one-hot (spatial[k], 1, TN): broadcast-ready for the fold.
        size = spatial[k]
        r = jax.lax.broadcasted_iota(jnp.int32, (size, 1, TN), 0)
        i0 = jnp.clip(floors[k], 0, size - 1).reshape(1, 1, TN)
        i1 = jnp.clip(floors[k] + 1, 0, size - 1).reshape(1, 1, TN)
        w1 = fracs[k].reshape(1, 1, TN)
        w0 = 1.0 - w1
        return jnp.where(r == i0, w0, 0.0) + jnp.where(r == i1, w1, 0.0)

    nrows = t.shape[0]
    for k in range(d - 3, -1, -1):
        size = spatial[k]
        nrows = nrows // size
        t = jnp.sum(t.reshape(size, nrows, TN) * axis_onehot3d(k), axis=0)

    assert nrows == c_pad == out_ref.shape[0]
    out_ref[...] = t.astype(out_ref.dtype)


# ----------------------------------------------------------------------------
# Wrapper (host-side layout plumbing: permute/flatten/pad, normalization)
# ----------------------------------------------------------------------------
class Interpolate:
    """N-d interpolation (order=1, mode='nearest') matching the PyTorch module."""

    QUERY_TILE = 512   # queries per grid step (multiple of 128); sweepable per chip

    def __init__(self, input, d, order=1, mode="nearest", mxu_bf16=False):
        assert order == 1
        assert mode in (None, "nearest")
        # TODO(synk): mode=None (raw, unclamped out-of-bounds indexing) is not
        # implemented; only the 'nearest' clamping mode is supported.
        assert mode == "nearest"
        self.input = jnp.asarray(input)
        self.d = d
        self.mode = mode
        self.spatial = tuple(int(s) for s in self.input.shape[-d:])
        self.lead = tuple(int(s) for s in self.input.shape[:-d])
        # f32 shape constants so bf16 tables don't round the unnormalize scale.
        self._shape_f = jnp.asarray(self.spatial, dtype=jnp.float32)

        C = _prod(self.lead)
        self._C = C
        # Pad channels to a multiple of 8 (f32 sublane granularity): keeps every
        # row grouping in the kernel sublane-aligned.
        self._C_pad = max(8, _round_up(C, 8))

        x = self.input.reshape((C,) + self.spatial)
        if self._C_pad != C:
            x = jnp.pad(x, ((0, self._C_pad - C),) + ((0, 0),) * d)

        if d >= 2:
            # Permute to (spatial[d-3],...,spatial[0], C_pad, spatial[-2], spatial[-1])
            # so each kernel fold reduces the OUTERMOST row group and the last two
            # spatial axes fuse into the lane-dense, MXU-contracted K.
            perm = tuple(range(d - 2, 0, -1)) + (0, d - 1, d)
            x = jnp.transpose(x, perm)
            self._K = self.spatial[-2] * self.spatial[-1]
            self._M = self._C_pad * _prod(self.spatial[:-2])
        else:
            self._K = self.spatial[-1]
            self._M = self._C_pad
        self._inp2d = x.reshape(self._M, self._K)
        self._use_bf16 = bool(self.input.dtype == jnp.bfloat16) or bool(mxu_bf16)
        # TODO(synk): for very large spatial volumes (e.g. 64^3+ with many lead
        # channels) the dense contraction should be replaced by a blocked /
        # scalar-prefetch gather path (only DMA + contract the table blocks the
        # current query tile actually touches).

    def _unnormalize(self, coords):
        """map [-1, 1] -> grid coords"""
        return (coords + 1) / 2 * (self._shape_f - 1)

    # VMEM working-set estimate for one query tile (bytes).
    def _tile_vmem_bytes(self, tn):
        itemsize = self.input.dtype.itemsize
        return int(2 * 8 * tn * 4                              # coords window (x2 buf)
                   + 2 * self._C_pad * tn * itemsize           # output window (x2 buf)
                   + _round_up(self._K, 8) * tn * 4            # joint one-hot
                   + 3 * self._M * tn * 4                      # matmul result + fold temps
                   + 2 * max(self.spatial) * tn * 4)           # per-axis one-hots

    def __call__(self, coords, normalized=False):
        coords = jnp.asarray(coords)
        assert coords.shape[-1] == self.d
        if normalized:
            coords = self._unnormalize(coords)

        S = coords.shape[:-1]
        d = self.d
        c = coords.reshape(-1, d).T.astype(jnp.float32)          # (d, N)
        N = c.shape[1]

        M, K, C_pad = self._M, self._K, self._C_pad
        itemsize = self.input.dtype.itemsize

        # Chip-aware VMEM budget (~75% of physical per-core VMEM: ~48 MiB on
        # v7x, ~96 MiB on v5e/v6e) leaves headroom for compiler scratch/spill.
        try:
            vmem_cap = int(pltpu.get_tpu_info().vmem_capacity_bytes)
        except Exception:
            vmem_cap = 128 * 2 ** 20
        budget = (vmem_cap * 3) // 4

        K_lanes = max(_round_up(K, 128), 128)
        table_bytes = M * K_lanes * itemsize      # single-buffered constant window

        # Lane-dense query tile: multiple of 128, <= QUERY_TILE, adapted to N,
        # shrunk if the per-tile working set would exceed the VMEM budget.
        TN = int(min(self.QUERY_TILE, _round_up(max(N, 1), 128)))
        while TN > 128 and table_bytes + self._tile_vmem_bytes(TN) > budget:
            TN = max(128, ((TN // 2) // 128) * 128)
        # v7x megacore: guarantee >=2 steps on the 'parallel' query axis so both
        # TensorCores get work (negligible overhead on single-core chips).
        if N > 128 and _round_up(N, TN) // TN < 2:
            TN = _round_up((N + 1) // 2, 128)

        Npad = _round_up(N, TN)
        if Npad != N:
            c = jnp.pad(c, ((0, 0), (0, Npad - N)))
        grid = (Npad // TN,)

        # Advisory cost estimate for XLA scheduling of the custom call.
        cost = pl.CostEstimate(
            flops=int(2 * M * K * Npad                        # MXU contraction
                      + 3 * M * Npad * max(d - 2, 0)          # VPU folds
                      + 6 * (K + sum(self.spatial)) * Npad),  # one-hot builds
            transcendentals=0,
            bytes_accessed=int(M * K * itemsize + d * Npad * 4
                               + C_pad * Npad * itemsize),
        )

        vmem_limit = int(min(max(2 * (table_bytes + self._tile_vmem_bytes(TN)),
                                 16 * 2 ** 20),
                             budget))

        kernel = partial(_interp_kernel, spatial=self.spatial, d=d,
                         c_pad=C_pad, use_bf16=self._use_bf16)

        def run(table_spec):
            return pl.pallas_call(
                kernel,
                out_shape=jax.ShapeDtypeStruct((C_pad, Npad), self.input.dtype),
                grid_spec=pltpu.PrefetchScalarGridSpec(
                    num_scalar_prefetch=0,
                    grid=grid,
                    in_specs=[
                        table_spec,                               # full table, constant
                        pl.BlockSpec((d, TN), lambda n: (0, n)),  # query tile
                    ],
                    out_specs=pl.BlockSpec((C_pad, TN), lambda n: (0, n)),
                ),
                compiler_params=pltpu.CompilerParams(
                    dimension_semantics=("parallel",),
                    vmem_limit_bytes=vmem_limit,
                ),
                cost_estimate=cost,
            )(self._inp2d, c)

        try:
            # Constant-index window never changes -> single buffer (halves the
            # largest VMEM resident; critical on v7x's 64 MiB per-core VMEM).
            out = run(pl.BlockSpec((M, K), lambda n: (0, 0),
                                   pipeline_mode=pl.Buffered(1)))
        except Exception:
            # Fallback for jax versions without pipeline_mode/Buffered(1) support.
            out = run(pl.BlockSpec((M, K), lambda n: (0, 0)))

        out = out[:self._C, :N]
        return out.reshape(self.lead + S)


# ----------------------------------------------------------------------------
# Pure-JAX reference (mirrors nd_linear_interp semantics)
# ----------------------------------------------------------------------------
def ref_nd_interp(inp, coords, d, mode="nearest"):
    lead = inp.shape[:-d]
    spatial = inp.shape[-d:]
    S = coords.shape[:-1]
    c = coords.reshape(-1, d).astype(jnp.float32)
    f = jnp.floor(c)
    idx = f.astype(jnp.int32)
    fr = c - f
    inp_flat = inp.reshape((-1,) + tuple(spatial))
    out = jnp.zeros((inp_flat.shape[0], c.shape[0]), jnp.float32)
    for corner in itertools.product((0, 1), repeat=d):
        w = jnp.ones((c.shape[0],), jnp.float32)
        gather_idx = []
        for k in range(d):
            w = w * jnp.abs(fr[:, k] + (corner[k] - 1.0))
            gather_idx.append(jnp.clip(idx[:, k] + corner[k], 0, spatial[k] - 1))
        out = out + w[None, :] * inp_flat[(slice(None),) + tuple(gather_idx)]
    return out.reshape(lead + S).astype(inp.dtype)


# ----------------------------------------------------------------------------
# Main
# ----------------------------------------------------------------------------
if __name__ == "__main__":
    key = jax.random.PRNGKey(0)
    k1, k2, k3, k4 = jax.random.split(key, 4)

    # --- test 1: bilinear, (C, H, W) = (8, 16, 16), 300 query points ----------
    # (300 queries -> TN=256, 2 grid steps: exercises the streamed query axis
    #  and the >=2-step megacore guarantee.)
    C, H, W = 8, 16, 16
    NQ, d = 300, 2
    inp = jax.random.normal(k1, (C, H, W), dtype=jnp.float32)
    coords = jax.random.uniform(k2, (NQ, d), dtype=jnp.float32,
                                minval=-1.0, maxval=float(H))   # includes OOB
    interp = Interpolate(inp, d=d, order=1, mode="nearest")
    out = jax.block_until_ready(interp(coords))
    ref = ref_nd_interp(inp, coords, d=d)
    assert out.shape == ref.shape, (out.shape, ref.shape)
    assert jnp.allclose(out, ref, atol=1e-4, rtol=1e-4), float(
        jnp.max(jnp.abs(out - ref)))

    # normalized coords path ([-1, 1] -> grid coords)
    ncoords = jax.random.uniform(k3, (NQ, d), dtype=jnp.float32,
                                 minval=-1.0, maxval=1.0)
    out_n = jax.block_until_ready(interp(ncoords, normalized=True))
    ref_n = ref_nd_interp(
        inp, (ncoords + 1) / 2 * (jnp.asarray([H, W], jnp.float32) - 1), d=d)
    assert jnp.allclose(out_n, ref_n, atol=1e-4, rtol=1e-4)

    # --- test 2: trilinear, leading dims (2, 3) -> channel padding + fold path -
    lead, spatial3 = (2, 3), (4, 5, 6)
    inp3 = jax.random.normal(k4, lead + spatial3, dtype=jnp.float32)
    coords3 = jax.random.uniform(jax.random.PRNGKey(1), (57, 3),
                                 dtype=jnp.float32, minval=-0.5, maxval=6.5)
    interp3 = Interpolate(inp3, d=3, order=1, mode="nearest")
    out3 = jax.block_until_ready(interp3(coords3))
    ref3 = ref_nd_interp(inp3, coords3, d=3)
    assert out3.shape == ref3.shape, (out3.shape, ref3.shape)
    assert jnp.allclose(out3, ref3, atol=1e-4, rtol=1e-4), float(
        jnp.max(jnp.abs(out3 - ref3)))

    print("KERNEL_OK")
</pallas_src>

<mosaic_0001>
module attributes {stable_mosaic.version = 11 : i64} {
  func.func @_interp_kernel(%arg0: i32, %arg1: memref<8x256xf32, #tpu.memory_space<vmem>>, %arg2: memref<2x256xf32, #tpu.memory_space<vmem>>, %arg3: memref<8x256xf32, #tpu.memory_space<vmem>>) attributes {dimension_semantics = [#tpu.dimension_semantics<parallel>], iteration_bounds = array<i64: 2>, scalar_prefetch = 0 : i64, scratch_operands = 0 : i64, tpu.core_type = #tpu.core_type<tc>, window_params = [{pipeline_mode = #tpu.pipeline_mode<synchronous>, transform_indices = @transform_0, window_bounds = array<i64: 8, 256>}, {transform_indices = @transform_1, window_bounds = array<i64: 2, 256>}, {transform_indices = @transform_2, window_bounds = array<i64: 8, 256>}]} {
    %c0 = arith.constant 0 : index
    %c0_0 = arith.constant 0 : index
    %0 = vector.load %arg2[%c0, %c0_0] : memref<2x256xf32, #tpu.memory_space<vmem>>, vector<1x256xf32>
    %1 = math.floor %0 : vector<1x256xf32>
    %2 = arith.fptosi %1 : vector<1x256xf32> to vector<1x256xi32>
    %3 = arith.subf %0, %1 : vector<1x256xf32>
    %c1 = arith.constant 1 : index
    %c0_1 = arith.constant 0 : index
    %4 = vector.load %arg2[%c1, %c0_1] : memref<2x256xf32, #tpu.memory_space<vmem>>, vector<1x256xf32>
    %5 = math.floor %4 : vector<1x256xf32>
    %6 = arith.fptosi %5 : vector<1x256xf32> to vector<1x256xi32>
    %7 = arith.subf %4, %5 : vector<1x256xf32>
    %8 = tpu.iota {dimensions = array<i32: 0>} : vector<256x256xi32>
    %c0_i32 = arith.constant 0 : i32
    %c15_i32 = arith.constant 15 : i32
    %9 = vector.broadcast %c0_i32 : i32 to vector<1x256xi32>
    %10 = arith.maxsi %9, %2 : vector<1x256xi32>
    %11 = vector.broadcast %c15_i32 : i32 to vector<1x256xi32>
    %12 = arith.minsi %11, %10 : vector<1x256xi32>
    %c1_i32 = arith.constant 1 : i32
    %13 = vector.broadcast %c1_i32 : i32 to vector<1x256xi32>
    %14 = arith.addi %2, %13 : vector<1x256xi32>
    %c0_i32_2 = arith.constant 0 : i32
    %c15_i32_3 = arith.constant 15 : i32
    %15 = vector.broadcast %c0_i32_2 : i32 to vector<1x256xi32>
    %16 = arith.maxsi %15, %14 : vector<1x256xi32>
    %17 = vector.broadcast %c15_i32_3 : i32 to vector<1x256xi32>
    %18 = arith.minsi %17, %16 : vector<1x256xi32>
    %c0_i32_4 = arith.constant 0 : i32
    %c15_i32_5 = arith.constant 15 : i32
    %19 = vector.broadcast %c0_i32_4 : i32 to vector<1x256xi32>
    %20 = arith.maxsi %19, %6 : vector<1x256xi32>
    %21 = vector.broadcast %c15_i32_5 : i32 to vector<1x256xi32>
    %22 = arith.minsi %21, %20 : vector<1x256xi32>
    %c1_i32_6 = arith.constant 1 : i32
    %23 = vector.broadcast %c1_i32_6 : i32 to vector<1x256xi32>
    %24 = arith.addi %6, %23 : vector<1x256xi32>
    %c0_i32_7 = arith.constant 0 : i32
    %c15_i32_8 = arith.constant 15 : i32
    %25 = vector.broadcast %c0_i32_7 : i32 to vector<1x256xi32>
    %26 = arith.maxsi %25, %24 : vector<1x256xi32>
    %27 = vector.broadcast %c15_i32_8 : i32 to vector<1x256xi32>
    %28 = arith.minsi %27, %26 : vector<1x256xi32>
    %cst = arith.constant 1.000000e+00 : f32
    %29 = vector.broadcast %cst : f32 to vector<1x256xf32>
    %30 = arith.subf %29, %3 : vector<1x256xf32>
    %cst_9 = arith.constant 1.000000e+00 : f32
    %31 = vector.broadcast %cst_9 : f32 to vector<1x256xf32>
    %32 = arith.subf %31, %7 : vector<1x256xf32>
    %c16_i32 = arith.constant 16 : i32
    %33 = vector.broadcast %c16_i32 : i32 to vector<1x256xi32>
    %34 = arith.muli %12, %33 : vector<1x256xi32>
    %35 = arith.addi %34, %22 : vector<1x256xi32>
    %36 = vector.broadcast %35 : vector<1x256xi32> to vector<256x256xi32>
    %37 = arith.cmpi eq, %8, %36 : vector<256x256xi32>
    %38 = arith.mulf %30, %32 : vector<1x256xf32>
    %cst_10 = arith.constant 0.000000e+00 : f32
    %39 = vector.shape_cast %38 : vector<1x256xf32> to vector<1x256xf32>
    %40 = vector.broadcast %39 : vector<1x256xf32> to vector<256x256xf32>
    %41 = vector.broadcast %cst_10 : f32 to vector<256x256xf32>
    %42 = arith.select %37, %40, %41 : vector<256x256xi1>, vector<256x256xf32>
    %c16_i32_11 = arith.constant 16 : i32
    %43 = vector.broadcast %c16_i32_11 : i32 to vector<1x256xi32>
    %44 = arith.muli %12, %43 : vector<1x256xi32>
    %45 = arith.addi %44, %28 : vector<1x256xi32>
    %46 = vector.broadcast %45 : vector<1x256xi32> to vector<256x256xi32>
    %47 = arith.cmpi eq, %8, %46 : vector<256x256xi32>
    %48 = arith.mulf %30, %7 : vector<1x256xf32>
    %cst_12 = arith.constant 0.000000e+00 : f32
    %49 = vector.shape_cast %48 : vector<1x256xf32> to vector<1x256xf32>
    %50 = vector.broadcast %49 : vector<1x256xf32> to vector<256x256xf32>
    %51 = vector.broadcast %cst_12 : f32 to vector<256x256xf32>
    %52 = arith.select %47, %50, %51 : vector<256x256xi1>, vector<256x256xf32>
    %53 = arith.addf %42, %52 : vector<256x256xf32>
    %c16_i32_13 = arith.constant 16 : i32
    %54 = vector.broadcast %c16_i32_13 : i32 to vector<1x256xi32>
    %55 = arith.muli %18, %54 : vector<1x256xi32>
    %56 = arith.addi %55, %22 : vector<1x256xi32>
    %57 = vector.broadcast %56 : vector<1x256xi32> to vector<256x256xi32>
    %58 = arith.cmpi eq, %8, %57 : vector<256x256xi32>
    %59 = arith.mulf %3, %32 : vector<1x256xf32>
    %cst_14 = arith.constant 0.000000e+00 : f32
    %60 = vector.shape_cast %59 : vector<1x256xf32> to vector<1x256xf32>
    %61 = vector.broadcast %60 : vector<1x256xf32> to vector<256x256xf32>
    %62 = vector.broadcast %cst_14 : f32 to vector<256x256xf32>
    %63 = arith.select %58, %61, %62 : vector<256x256xi1>, vector<256x256xf32>
    %64 = arith.addf %53, %63 : vector<256x256xf32>
    %c16_i32_15 = arith.constant 16 : i32
    %65 = vector.broadcast %c16_i32_15 : i32 to vector<1x256xi32>
    %66 = arith.muli %18, %65 : vector<1x256xi32>
    %67 = arith.addi %66, %28 : vector<1x256xi32>
    %68 = vector.broadcast %67 : vector<1x256xi32> to vector<256x256xi32>
    %69 = arith.cmpi eq, %8, %68 : vector<256x256xi32>
    %70 = arith.mulf %3, %7 : vector<1x256xf32>
    %cst_16 = arith.constant 0.000000e+00 : f32
    %71 = vector.shape_cast %70 : vector<1x256xf32> to vector<1x256xf32>
    %72 = vector.broadcast %71 : vector<1x256xf32> to vector<256x256xf32>
    %73 = vector.broadcast %cst_16 : f32 to vector<256x256xf32>
    %74 = arith.select %69, %72, %73 : vector<256x256xi1>, vector<256x256xf32>
    %75 = arith.addf %64, %74 : vector<256x256xf32>
    %c0_17 = arith.constant 0 : index
    %c0_18 = arith.constant 0 : index
    %76 = vector.load %arg1[%c0_17, %c0_18] : memref<8x256xf32, #tpu.memory_space<vmem>>, vector<8x256xf32>
    %cst_19 = arith.constant dense<0.000000e+00> : vector<8x256xf32>
    %77 = tpu.matmul %76, %75, %cst_19 {dimension_numbers = #tpu.dot_dimension_numbers<[1], [0], [0], [1], [0, 0, 1, 1], [], []>} : vector<8x256xf32>, vector<256x256xf32>, vector<8x256xf32> -> vector<8x256xf32>
    %c0_20 = arith.constant 0 : index
    %c0_21 = arith.constant 0 : index
    %78 = vector.load %arg3[%c0_20, %c0_21] : memref<8x256xf32, #tpu.memory_space<vmem>>, vector<8x256xf32>
    tpu.vector_store %arg3[%c0_20, %c0_21], %77 {strides = array<i32>} : memref<8x256xf32, #tpu.memory_space<vmem>>, vector<8x256xf32>,
    return
  }
  func.func @transform_0(%arg0: i32) -> (i32, i32) {
    %c0_i32 = arith.constant 0 : i32
    %c0_i32_0 = arith.constant 0 : i32
    %c0_i32_1 = arith.constant 0 : i32
    return %c0_i32, %c0_i32_0 : i32, i32
  }
  func.func @transform_1(%arg0: i32) -> (i32, i32) {
    %c0_i32 = arith.constant 0 : i32
    %c0_i32_0 = arith.constant 0 : i32
    return %c0_i32, %arg0 : i32, i32
  }
  func.func @transform_2(%arg0: i32) -> (i32, i32) {
    %c0_i32 = arith.constant 0 : i32
    %c0_i32_0 = arith.constant 0 : i32
    return %c0_i32, %arg0 : i32, i32
  }
}

module attributes {stable_mosaic.version = 11 : i64} {
  func.func @_interp_kernel(%arg0: i32, %arg1: memref<8x256xf32, #tpu.memory_space<vmem>>, %arg2: memref<2x256xf32, #tpu.memory_space<vmem>>, %arg3: memref<8x256xf32, #tpu.memory_space<vmem>>) attributes {dimension_semantics = [#tpu.dimension_semantics<parallel>], iteration_bounds = array<i64: 2>, scalar_prefetch = 0 : i64, scratch_operands = 0 : i64, tpu.core_type = #tpu.core_type<tc>, window_params = [{pipeline_mode = #tpu.pipeline_mode<synchronous>, transform_indices = @transform_0, window_bounds = array<i64: 8, 256>}, {transform_indices = @transform_1, window_bounds = array<i64: 2, 256>}, {transform_indices = @transform_2, window_bounds = array<i64: 8, 256>}]} {
    %c0 = arith.constant 0 : index
    %c0_0 = arith.constant 0 : index
    %0 = vector.load %arg2[%c0, %c0_0] : memref<2x256xf32, #tpu.memory_space<vmem>>, vector<1x256xf32>
    %1 = math.floor %0 : vector<1x256xf32>
    %2 = arith.fptosi %1 : vector<1x256xf32> to vector<1x256xi32>
    %3 = arith.subf %0, %1 : vector<1x256xf32>
    %c1 = arith.constant 1 : index
    %c0_1 = arith.constant 0 : index
    %4 = vector.load %arg2[%c1, %c0_1] : memref<2x256xf32, #tpu.memory_space<vmem>>, vector<1x256xf32>
    %5 = math.floor %4 : vector<1x256xf32>
    %6 = arith.fptosi %5 : vector<1x256xf32> to vector<1x256xi32>
    %7 = arith.subf %4, %5 : vector<1x256xf32>
    %8 = tpu.iota {dimensions = array<i32: 0>} : vector<256x256xi32>
    %c0_i32 = arith.constant 0 : i32
    %c15_i32 = arith.constant 15 : i32
    %9 = vector.broadcast %c0_i32 : i32 to vector<1x256xi32>
    %10 = arith.maxsi %9, %2 : vector<1x256xi32>
    %11 = vector.broadcast %c15_i32 : i32 to vector<1x256xi32>
    %12 = arith.minsi %11, %10 : vector<1x256xi32>
    %c1_i32 = arith.constant 1 : i32
    %13 = vector.broadcast %c1_i32 : i32 to vector<1x256xi32>
    %14 = arith.addi %2, %13 : vector<1x256xi32>
    %c0_i32_2 = arith.constant 0 : i32
    %c15_i32_3 = arith.constant 15 : i32
    %15 = vector.broadcast %c0_i32_2 : i32 to vector<1x256xi32>
    %16 = arith.maxsi %15, %14 : vector<1x256xi32>
    %17 = vector.broadcast %c15_i32_3 : i32 to vector<1x256xi32>
    %18 = arith.minsi %17, %16 : vector<1x256xi32>
    %c0_i32_4 = arith.constant 0 : i32
    %c15_i32_5 = arith.constant 15 : i32
    %19 = vector.broadcast %c0_i32_4 : i32 to vector<1x256xi32>
    %20 = arith.maxsi %19, %6 : vector<1x256xi32>
    %21 = vector.broadcast %c15_i32_5 : i32 to vector<1x256xi32>
    %22 = arith.minsi %21, %20 : vector<1x256xi32>
    %c1_i32_6 = arith.constant 1 : i32
    %23 = vector.broadcast %c1_i32_6 : i32 to vector<1x256xi32>
    %24 = arith.addi %6, %23 : vector<1x256xi32>
    %c0_i32_7 = arith.constant 0 : i32
    %c15_i32_8 = arith.constant 15 : i32
    %25 = vector.broadcast %c0_i32_7 : i32 to vector<1x256xi32>
    %26 = arith.maxsi %25, %24 : vector<1x256xi32>
    %27 = vector.broadcast %c15_i32_8 : i32 to vector<1x256xi32>
    %28 = arith.minsi %27, %26 : vector<1x256xi32>
    %cst = arith.constant 1.000000e+00 : f32
    %29 = vector.broadcast %cst : f32 to vector<1x256xf32>
    %30 = arith.subf %29, %3 : vector<1x256xf32>
    %cst_9 = arith.constant 1.000000e+00 : f32
    %31 = vector.broadcast %cst_9 : f32 to vector<1x256xf32>
    %32 = arith.subf %31, %7 : vector<1x256xf32>
    %c16_i32 = arith.constant 16 : i32
    %33 = vector.broadcast %c16_i32 : i32 to vector<1x256xi32>
    %34 = arith.muli %12, %33 : vector<1x256xi32>
    %35 = arith.addi %34, %22 : vector<1x256xi32>
    %36 = vector.broadcast %35 : vector<1x256xi32> to vector<256x256xi32>
    %37 = arith.cmpi eq, %8, %36 : vector<256x256xi32>
    %38 = arith.mulf %30, %32 : vector<1x256xf32>
    %cst_10 = arith.constant 0.000000e+00 : f32
    %39 = vector.shape_cast %38 : vector<1x256xf32> to vector<1x256xf32>
    %40 = vector.broadcast %39 : vector<1x256xf32> to vector<256x256xf32>
    %41 = vector.broadcast %cst_10 : f32 to vector<256x256xf32>
    %42 = arith.select %37, %40, %41 : vector<256x256xi1>, vector<256x256xf32>
    %c16_i32_11 = arith.constant 16 : i32
    %43 = vector.broadcast %c16_i32_11 : i32 to vector<1x256xi32>
    %44 = arith.muli %12, %43 : vector<1x256xi32>
    %45 = arith.addi %44, %28 : vector<1x256xi32>
    %46 = vector.broadcast %45 : vector<1x256xi32> to vector<256x256xi32>
    %47 = arith.cmpi eq, %8, %46 : vector<256x256xi32>
    %48 = arith.mulf %30, %7 : vector<1x256xf32>
    %cst_12 = arith.constant 0.000000e+00 : f32
    %49 = vector.shape_cast %48 : vector<1x256xf32> to vector<1x256xf32>
    %50 = vector.broadcast %49 : vector<1x256xf32> to vector<256x256xf32>
    %51 = vector.broadcast %cst_12 : f32 to vector<256x256xf32>
    %52 = arith.select %47, %50, %51 : vector<256x256xi1>, vector<256x256xf32>
    %53 = arith.addf %42, %52 : vector<256x256xf32>
    %c16_i32_13 = arith.constant 16 : i32
    %54 = vector.broadcast %c16_i32_13 : i32 to vector<1x256xi32>
    %55 = arith.muli %18, %54 : vector<1x256xi32>
    %56 = arith.addi %55, %22 : vector<1x256xi32>
    %57 = vector.broadcast %56 : vector<1x256xi32> to vector<256x256xi32>
    %58 = arith.cmpi eq, %8, %57 : vector<256x256xi32>
    %59 = arith.mulf %3, %32 : vector<1x256xf32>
    %cst_14 = arith.constant 0.000000e+00 : f32
    %60 = vector.shape_cast %59 : vector<1x256xf32> to vector<1x256xf32>
    %61 = vector.broadcast %60 : vector<1x256xf32> to vector<256x256xf32>
    %62 = vector.broadcast %cst_14 : f32 to vector<256x256xf32>
    %63 = arith.select %58, %61, %62 : vector<256x256xi1>, vector<256x256xf32>
    %64 = arith.addf %53, %63 : vector<256x256xf32>
    %c16_i32_15 = arith.constant 16 : i32
    %65 = vector.broadcast %c16_i32_15 : i32 to vector<1x256xi32>
    %66 = arith.muli %18, %65 : vector<1x256xi32>
    %67 = arith.addi %66, %28 : vector<1x256xi32>
    %68 = vector.broadcast %67 : vector<1x256xi32> to vector<256x256xi32>
    %69 = arith.cmpi eq, %8, %68 : vector<256x256xi32>
    %70 = arith.mulf %3, %7 : vector<1x256xf32>
    %cst_16 = arith.constant 0.000000e+00 : f32
    %71 = vector.shape_cast %70 : vector<1x256xf32> to vector<1x256xf32>
    %72 = vector.broadcast %71 : vector<1x256xf32> to vector<256x256xf32>
    %73 = vector.broadcast %cst_16 : f32 to vector<256x256xf32>
    %74 = arith.select %69, %72, %73 : vector<256x256xi1>, vector<256x256xf32>
    %75 = arith.addf %64, %74 : vector<256x256xf32>
    %c0_17 = arith.constant 0 : index
    %c0_18 = arith.constant 0 : index
    %76 = vector.load %arg1[%c0_17, %c0_18] : memref<8x256xf32, #tpu.memory_space<vmem>>, vector<8x256xf32>
    %cst_19 = arith.constant dense<0.000000e+00> : vector<8x256xf32>
    %77 = tpu.matmul %76, %75, %cst_19 {dimension_numbers = #tpu.dot_dimension_numbers<[1], [0], [0], [1], [0, 0, 1, 1], [], []>} : vector<8x256xf32>, vector<256x256xf32>, vector<8x256xf32> -> vector<8x256xf32>
    %c0_20 = arith.constant 0 : index
    %c0_21 = arith.constant 0 : index
    %78 = vector.load %arg3[%c0_20, %c0_21] : memref<8x256xf32, #tpu.memory_space<vmem>>, vector<8x256xf32>
    tpu.vector_store %arg3[%c0_20, %c0_21], %77 {strides = array<i32>} : memref<8x256xf32, #tpu.memory_space<vmem>>, vector<8x256xf32>,
    return
  }
  func.func @transform_0(%arg0: i32) -> (i32, i32) {
    %c0_i32 = arith.constant 0 : i32
    %c0_i32_0 = arith.constant 0 : i32
    %c0_i32_1 = arith.constant 0 : i32
    return %c0_i32, %c0_i32_0 : i32, i32
  }
  func.func @transform_1(%arg0: i32) -> (i32, i32) {
    %c0_i32 = arith.constant 0 : i32
    %c0_i32_0 = arith.constant 0 : i32
    return %c0_i32, %arg0 : i32, i32
  }
  func.func @transform_2(%arg0: i32) -> (i32, i32) {
    %c0_i32 = arith.constant 0 : i32
    %c0_i32_0 = arith.constant 0 : i32
    return %c0_i32, %arg0 : i32, i32
  }
}

</mosaic_0001>

<bundles_post_ra>
// kernel: tpu_custom_call.1
= control target key start
LH: loop header
LB: loop body
LE: loop exit
PB: predicated region body
PF: predicated region fallthrough
CT: control target
= control target key end

     0   :  { %7 = vsyncpa [#allocation3], 0  ;;  %s2520_s0 = inlined_call_operand.hbm [shape: f32[8,256], index: 0, kind: input, shape index: {}]   ;;  %s2521_s1 = inlined_call_operand.hbm [shape: f32[2,512], index: 1, kind: input, shape index: {}]   ;;  %s2522_s2 = inlined_call_operand.hbm [shape: f32[8,512], index: 2, kind: output, shape index: {}]  }
   0x1   :  { %8 = vsyncpa [#allocation6], 0 }
   0x2   :  { %10 = vsyncpa [#allocation6 + $0x1], 0 }
   0x3   :  { %11 = vsyncpa [#allocation4], 0 }
   0x4   :  { %13 = vsyncpa [#allocation4 + $0x1], 0  ;;  %s1491_s9 = smov 0   ;;  %s1493_s10 = smov 0  }
   0x5   :  { %s1495_s11 = smov 0   ;;  %s1497_s12 = smov 0  }
   0x6 LB: > { %s1512_s13 = sadd.s32 4294967295, %s1471_s12   ;;  %s1199_s14 = sadd.s32 4294967294, %s1471_s12   ;;  %s1471_s12 = sphi %s1497_s12, %s2546_s12   ;;  %s1467_s11 = sphi %s1495_s11, %s2545_s11   ;;  %s1463_s10 = sphi %s1493_s10, %s2544_s10   ;;  %s1459_s9 = sphi %s1491_s9, %s2543_s9  }
   0x7   : > { %p60_p0 = scmp.ne.s32.totalorder %s1463_s10, %s1459_s9  ;;  %p2523_p1 = scmp.eq.s32.totalorder %s1512_s13, 0 }
   0x8   : > { %p90_p3 = scmp.eq.s32.totalorder %s1199_s14, 1  ;;  %p1200_p5 = scmp.ge.s32.totalorder %s1471_s12, 1 }
   0x9   : > { %p1521_p4 = por %p2523_p1, %p60_p0  ;;  %p97_p7 = scmp.lt.s32.totalorder %s1471_s12, 3 }
   0xa   : > { %p1526_p6 = por %p90_p3, %p60_p0  ;;  %s1473_s18 = smov [#allocation2]  }
   0xb   : > { %s2526_s15 = scalar_select %p1521_p4, 1, 0 }
   0xc   : > { %s2527_s16 = scalar_select %p1526_p6, 1, 0 }
   0xd   : > { %p1531_p8 = pnand %p1200_p5, %p97_p7  ;;  %s110_s19 = sshll.u32 %s1473_s18, 4  ;;  %s111_s19 = int_to_ptr.vmem [resolvable:$true] %s110_s19 }
   0xe   : > { %s1539_s20 = sadd.s32 1, %s1471_s12   ;;  %s47_s24 = sadd.s32 1, %s1467_s11 }
   0xf   : > { %s2528_s17 = scalar_select %p1531_p8, 1, 0 }
  0x10   : > { %p1294_p10 = pneg %p1531_p8  ;;  %s44_s22 = ssub.s32 %s1471_s12, %s1539_s20 }
  0x11   : > { %p1549_p12 = scmp.eq.s32.totalorder %s44_s22, 0  ;;  %s1343_s27 = scalar_lea.hbm %s2520_s0, 256 }
  0x12   : > { %p1543_p11 = pnand %p1294_p10, %p2523_p1  ;;  %p1344_p0 = scmp.ne.s32.totalorder %s2520_s0, %s1343_s27 }
  0x13   : > { %s2530_s23 = scalar_select %p1549_p12, 1, 0 }
  0x14   : > { %p1345_p3 = pneg %p1543_p11  ;;  %p1350_p10 = scmp.lt.u32.totalorder %s1343_s27, %s2520_s0 }
  0x16   : > { %p1346_p5 = pnand %p1345_p3, %p1344_p0 }
  0x18   : > { %p1347_p7 = pneg %p1346_p5 }
  0x1a   : > { %p1352_p9 = pnand %p1350_p10, %p1347_p7 }
  0x1c   : > { %1355 = shalt.err (!%p1352_p9)
}
  0x1d   : > { %s1356_s4 = scalar_lea.vmem %s111_s19, 256  ;;  %p1364_p6 = scmp.lt.s32.totalorder %s111_s19, %s111_s19 }
  0x1e   : > { %p1357_p1 = scmp.ne.s32.totalorder %s111_s19, %s1356_s4  ;;  %p1365_p4 = scmp.lt.s32.totalorder %s1356_s4, %s1356_s4 }
  0x20   : > { %p1359_p2 = pnand %p1357_p1, %p1345_p3  ;;  %p1366_p8 = por %p1365_p4, %p1364_p6 }
  0x22   : > { %p1360_p13 = pneg %p1359_p2 }
  0x24   : > { %p1367_p12 = pnand %p1366_p8, %p1360_p13 }
  0x26   : > { %1370 = shalt.err (!%p1367_p12)
}
  0x27   : > { %1297 = dma.hbm_to_vmem [thread:$0]  (!%p1543_p11), %s2520_s0, 256, %s111_s19, [#allocation3]  }
  0x28   : > { %p2531_p1 = scmp.ne.s32.totalorder %s2530_s23, 0  ;;  %p55_p2 = scmp.eq.s32.totalorder %s1471_s12, 0 }
  0x29   : > { %p2532_p4 = scmp.ne.s32.totalorder %s1467_s11, %s1463_s10  ;;  %p2533_p6 = scmp.eq.s32.totalorder %s1512_s13, 1 }
  0x2a   : > { %s1575_s7 = scalar_select %p2531_p1, %s1467_s11, %s47_s24  }
  0x2b   : > { %p1583_p8 = por %p2533_p6, %p2532_p4  ;;  %p1307_p9 = scmp.lt.s32.totalorder %s1471_s12, 2 }
  0x2c   : > { %s121_s14 = sand.u32 1, %s1467_s11   ;;  %p2535_p12 = pmov %p2532_p4 }
  0x2d   : > { %s1203_s18 = sshll.u32 %s121_s14, 2  ;;  %s1216_s21 = sshll.u32 %s1471_s12, 6 }
  0x2e   : > { %p56_p13 = por %p55_p2, %p2535_p12  ;;  %s1596_s19 = scalar_lea.hbm %s2521_s1, %s1216_s21 }
  0x2f   : > { %s125_s23 = scalar_lea.vmem [#allocation5], %s1203_s18  ;;  %s122_s27 = scalar_lea.sflag [#allocation6], %s121_s14 }
  0x30   : > { %s133_s24 = sshll.u32 %s125_s23, 4  ;;  %p1598_p11 = pnand %p1307_p9, %p56_p13  ;;  %s1602_s24 = int_to_ptr.vmem [resolvable:$true] %s133_s24 }
  0x31   : > { %s1371_s28 = scalar_lea.hbm %s1596_s19, 64  ;;  %s1376_s3 = scalar_lea.hbm %s2521_s1, 128 }
  0x32   : > { %p1372_p0 = scmp.ne.s32.totalorder %s1596_s19, %s1371_s28  ;;  %p1373_p3 = pneg %p1598_p11 }
  0x33   : > { %p1377_p10 = scmp.lt.u32.totalorder %s1596_s19, %s2521_s1  ;;  %p1378_p1 = scmp.lt.u32.totalorder %s1376_s3, %s1371_s28 }
  0x34   : > { %p1374_p5 = pnand %p1373_p3, %p1372_p0  ;;  %p1380_p4 = scmp.lt.u32.totalorder %s1371_s28, %s1596_s19 }
  0x35   : > { %p1379_p2 = por %p1378_p1, %p1377_p10 }
  0x36   : > { %p1375_p7 = pneg %p1374_p5 }
  0x37   : > { %p1381_p6 = por %p1380_p4, %p1379_p2 }
  0x39   : > { %p1382_p9 = pnand %p1381_p6, %p1375_p7 }
  0x3b   : > { %1385 = shalt.err (!%p1382_p9)
}
  0x3c   : > { %s1386_s6 = scalar_lea.vmem %s1602_s24, 64  ;;  %s1474_s14 = smov [#allocation5]  }
  0x3d   : > { %p1387_p12 = scmp.ne.s32.totalorder %s1602_s24, %s1386_s6  ;;  %s1391_s18 = sshll.u32 %s1474_s14, 4  ;;  %s1392_s18 = int_to_ptr.vmem [resolvable:$false] %s1391_s18 }
  0x3e   : > { %s1393_s21 = scalar_lea.vmem %s1392_s18, 128  ;;  %p1394_p5 = scmp.lt.s32.totalorder %s1602_s24, %s1392_s18 }
  0x3f   : > { %p1389_p13 = pnand %p1387_p12, %p1373_p3  ;;  %p1395_p10 = scmp.lt.s32.totalorder %s1393_s21, %s1386_s6 }
  0x41   : > { %p1390_p0 = pneg %p1389_p13  ;;  %p1396_p1 = por %p1395_p10, %p1394_p5 }
  0x43   : > { %p1397_p2 = pnand %p1396_p1, %p1390_p0 }
  0x45   : > { %1400 = shalt.err (!%p1397_p2)
}
  0x46   : > { %1301 = dma.hbm_to_vmem [thread:$0]  (!%p1598_p11), %s1596_s19, 64, %s1602_s24, %s122_s27  }
  0x47   : > { %p2537_p7 = scmp.ne.s32.totalorder %s2528_s17, 0 }
  0x48   : > { %p2538_p3 = scmp.eq.s32.totalorder (!%p2537_p7), %s1512_s13, 0 }
  0x49   : > { %142 = sbr.rel (%p2537_p7) target bundleno = 528 (0x210), region = 28 }
  0x50   : > { %1446 = dma.done.wait (%p2538_p3), [#allocation3], 256   ;;  %p2539_p4 = pmov %p2538_p3 }
  0x51   : > { %s1636_s22 = sand.u32 1, %s1463_s10   ;;  %p2540_p6 = scmp.ne.s32.totalorder %s2526_s15, 0 }
  0x52   : > { %1448 = vsyncadd (%p2539_p4), [#allocation3], 4294967040  ;;  %s1208_s25 = sshll.u32 %s1636_s22, 2  ;;  %s149_s23 = scalar_lea.sflag [#allocation6], %s1636_s22 }
  0x53   : > { %s152_s26 = scalar_lea.vmem [#allocation5], %s1208_s25 }
  0x54   : > { %1450 = dma.done.wait (%p2540_p6), %s149_s23, 64  }
  0x55   : > { %1452 = vsyncadd (%p2540_p6), %s149_s23, 4294967232  ;;  %v184_v0 = vlaneseq  ;;  %v175_v12 = vld [vmem:[%s152_s26] ss:$2 sm:$0x3]  ;;  %s1209_s15 = sshll.u32 %s1636_s22, 4  ;;  %s1217_s24 = sshll.u32 %s1512_s13, 8 }
  0x56   : > { %v1210_v13 = vld [vmem:[%s152_s26 + $0x1] ss:$2 sm:$0x3]  ;;  %v176_v14 = vfloor.f32 %v175_v12  ;;  %s172_s17 = scalar_lea.vmem [#allocation7], %s1209_s15  ;;  %s2478_s29 = scalar_lea.hbm %s2522_s2, %s1217_s24 }
  0x57   : > { %v1644_v1 = vshrl.u32 %v184_v0, 7  ;;  %v181_v15 = vfloor.f32 %v1210_v13  ;;  %s1117_s19 = sshll.u32 %s172_s17, 4  ;;  %s1103_s30 = scalar_lea.sflag [#allocation4], %s1636_s22  ;;  %s2473_s19 = int_to_ptr.vmem [resolvable:$true] %s1117_s19 }
  0x58   : > { %v1282_v22 = vtrunc.f32 %v176_v14  ;;  %v178_v23 = vsub.f32 %v175_v12, %v176_v14  ;;  %s1401_s3 = scalar_lea.vmem %s2473_s19, 256  ;;  %s1475_s13 = smov [#allocation7]  }
  0x59   : > { %v1647_v2 = vsub.s32 0, %v1644_v1  ;;  %v1650_v3 = vsub.s32 1, %v1644_v1  ;;  %v1653_v4 = vadd.s32 8, %v1644_v1  ;;  %v1656_v5 = vadd.s32 16, %v1644_v1  ;;  %p1402_p11 = scmp.ne.s32.totalorder %s2473_s19, %s1401_s3  ;;  %s1405_s4 = sshll.u32 %s1475_s13, 4  ;;  %s1406_s4 = int_to_ptr.vmem [resolvable:$false] %s1405_s4 }
  0x5a   : > { %v1659_v6 = vadd.s32 24, %v1644_v1  ;;  %v1662_v7 = vadd.s32 32, %v1644_v1  ;;  %v1665_v8 = vadd.s32 40, %v1644_v1  ;;  %v1668_v9 = vadd.s32 48, %v1644_v1  ;;  %s1407_s5 = scalar_lea.vmem %s1406_s4, 512  ;;  %p1408_p13 = scmp.lt.s32.totalorder %s2473_s19, %s1406_s4 }
  0x5b   : > { %v1671_v10 = vadd.s32 56, %v1644_v1  ;;  %v1674_v11 = vadd.s32 64, %v1644_v1  ;;  %v1677_v16 = vadd.s32 72, %v1644_v1  ;;  %v1680_v17 = vadd.s32 80, %v1644_v1  ;;  %p1403_p9 = pnand %p1402_p11, %p1583_p8  ;;  %p1409_p0 = scmp.lt.s32.totalorder %s1407_s5, %s1401_s3 }
  0x5c   : > { %v1683_v18 = vadd.s32 88, %v1644_v1  ;;  %v1686_v19 = vadd.s32 96, %v1644_v1  ;;  %v1689_v20 = vadd.s32 104, %v1644_v1  ;;  %v1692_v21 = vadd.s32 112, %v1644_v1 }
  0x5d   : > { %v1284_v24 = vtrunc.f32 %v181_v15  ;;  %v183_v25 = vsub.f32 %v1210_v13, %v181_v15  ;;  %v1695_v26 = vadd.s32 120, %v1644_v1  ;;  %v1698_v27 = vadd.s32 128, %v1644_v1  ;;  %p1404_p12 = pneg %p1403_p9  ;;  %p1410_p5 = por %p1409_p0, %p1408_p13 }
  0x5e   : > { %v1701_v28 = vadd.s32 136, %v1644_v1  ;;  %v1704_v29 = vadd.s32 144, %v1644_v1  ;;  %v1283_v30 = vcvt.f32.s32 %v1282_v22  ;;  %v235_v32 = vsub.f32 1.0, %v178_v23 }
  0x5f   : > { %v1285_v31 = vcvt.f32.s32 %v1284_v24  ;;  %v236_v33 = vsub.f32 1.0, %v183_v25  ;;  %v887_v34 = vmul.f32 %v183_v25, %v178_v23  ;;  %v1707_v35 = vadd.s32 152, %v1644_v1  ;;  %p1411_p10 = pnand %p1410_p5, %p1404_p12 }
  0x60   : > { %v1710_v36 = vadd.s32 160, %v1644_v1  ;;  %v1713_v37 = vadd.s32 168, %v1644_v1  ;;  %vm217_vm0 = vcmp.gt.s32.totalorder %v1283_v30, 0  ;;  %v221_v38 = vadd.s32 1, %v1283_v30 }
  0x61   : > { %vm226_vm1 = vcmp.gt.s32.totalorder %v1285_v31, 0  ;;  %v230_v39 = vadd.s32 1, %v1285_v31  ;;  %v218_v40 = vsel %vm217_vm0, %v1283_v30, 0  ;;  %v311_v42 = vmul.f32 %v236_v33, %v235_v32 }
  0x62   : > { %v227_v41 = vsel %vm226_vm1, %v1285_v31, 0  ;;  %v460_v43 = vmul.f32 %v235_v32, %v183_v25  ;;  %vm219_vm2 = vcmp.lt.s32.totalorder %v218_v40, 15  ;;  %vm222_vm3 = vcmp.gt.s32.totalorder %v221_v38, 0 }
  0x63   : > { %vm228_vm4 = vcmp.lt.s32.totalorder %v227_v41, 15  ;;  %vm231_vm5 = vcmp.gt.s32.totalorder %v230_v39, 0  ;;  %v220_v44 = vsel %vm219_vm2, %v218_v40, 15  ;;  %v223_v45 = vsel %vm222_vm3, %v221_v38, 0 }
  0x64   : > { %v229_v46 = vsel %vm228_vm4, %v227_v41, 15  ;;  %v232_v47 = vsel %vm231_vm5, %v230_v39, 0  ;;  %vm224_vm6 = vcmp.lt.s32.totalorder %v223_v45, 15  ;;  %v237_v48 = vmul.u32 16, %v220_v44 }
  0x65   : > { %vm233_vm7 = vcmp.lt.s32.totalorder %v232_v47, 15  ;;  %v1716_v49 = vrot.slane %v311_v42, %v1647_v2  ;;  %v225_v50 = vsel %vm224_vm6, %v223_v45, 15  ;;  %v1719_v52 = vrot.slane %v311_v42, %v1650_v3 }
  0x66   : > { %v234_v51 = vsel %vm233_vm7, %v232_v47, 15  ;;  %v1722_v53 = vrot.slane %v460_v43, %v1647_v2  ;;  %v238_v54 = vadd.s32 %v237_v48, %v229_v46  ;;  %v1725_v56 = vrot.slane %v460_v43, %v1650_v3 }
  0x67   : > { %v387_v55 = vadd.s32 %v237_v48, %v234_v51  ;;  %v600_v57 = vmul.u32 16, %v225_v50  ;;  %v674_v58 = vmul.f32 %v236_v33, %v178_v23  ;;  %v1728_v59 = vrot.slane %v887_v34, %v1647_v2 }
  0x68   : > { %v1731_v60 = vrot.slane %v887_v34, %v1650_v3  ;;  %v1734_v61 = vadd.s32 176, %v1644_v1  ;;  %v1737_v62 = vrot.slane %v238_v54, %v1647_v2  ;;  %v1740_v63 = vrot.slane %v238_v54, %v1650_v3 }
  0x69   : > { %v1743_v0 = vrot.slane %v387_v55, %v1647_v2  ;;  %v1746_v12 = vrot.slane %v387_v55, %v1650_v3  ;;  %v601_v13 = vadd.s32 %v600_v57, %v229_v46  ;;  %v1749_v14 = vrot.slane %v674_v58, %v1647_v2 }
  0x6a   : > { %v1752_v15 = vrot.slane %v674_v58, %v1650_v3  ;;  %v814_v22 = vadd.s32 %v600_v57, %v234_v51  ;;  %vm248_vm8 = vcmp.eq.s32.totalorder %v1644_v1, %v1740_v63  ;;  %vm250_vm9 = vcmp.eq.s32.totalorder %v1653_v4, %v1740_v63 }
  0x6b   : > { %vm397_vm10 = vcmp.eq.s32.totalorder %v1644_v1, %v1746_v12  ;;  %vm399_vm11 = vcmp.eq.s32.totalorder %v1653_v4, %v1746_v12  ;;  %v1763_v23 = vrot.slane %v601_v13, %v1647_v2  ;;  %v1766_v24 = vrot.slane %v601_v13, %v1650_v3 }
  0x6c   : > { %v1769_v25 = vrot.slane %v814_v22, %v1647_v2  ;;  %v1772_v30 = vrot.slane %v814_v22, %v1650_v3  ;;  %v324_v31 = vsel %vm248_vm8, %v1719_v52, 0.0  ;;  %v326_v32 = vsel %vm250_vm9, %v1719_v52, 0.0 }
  0x6d   : > { %v473_v33 = vsel %vm397_vm10, %v1725_v56, 0.0  ;;  %v475_v34 = vsel %vm399_vm11, %v1725_v56, 0.0  ;;  %vm611_vm12 = vcmp.eq.s32.totalorder %v1644_v1, %v1766_v24  ;;  %vm613_vm13 = vcmp.eq.s32.totalorder %v1653_v4, %v1766_v24 }
  0x6e   : > { %v537_v38 = vadd.f32 %v473_v33, %v324_v31  ;;  %v539_v39 = vadd.f32 %v475_v34, %v326_v32  ;;  %v687_v2 = vsel %vm611_vm12, %v1752_v15, 0.0  ;;  %v689_v3 = vsel %vm613_vm13, %v1752_v15, 0.0 }
  0x6f   : > { %vm824_vm14 = vcmp.eq.s32.totalorder %v1644_v1, %v1772_v30  ;;  %vm826_vm15 = vcmp.eq.s32.totalorder %v1653_v4, %v1772_v30  ;;  %vm247_vm0 = vcmp.eq.s32.totalorder %v1644_v1, %v1737_v62  ;;  %vm249_vm1 = vcmp.eq.s32.totalorder %v1653_v4, %v1737_v62 }
  0x70   : > { %v751_v40 = vadd.f32 %v687_v2, %v537_v38  ;;  %v753_v41 = vadd.f32 %v689_v3, %v539_v39  ;;  %v900_v42 = vsel %vm824_vm14, %v1731_v60, 0.0  ;;  %v902_v43 = vsel %vm826_vm15, %v1731_v60, 0.0 }
  0x71   : > { %vm396_vm2 = vcmp.eq.s32.totalorder %v1644_v1, %v1743_v0  ;;  %vm398_vm3 = vcmp.eq.s32.totalorder %v1653_v4, %v1743_v0  ;;  %v323_v46 = vsel %vm247_vm0, %v1716_v49, 0.0  ;;  %v325_v47 = vsel %vm249_vm1, %v1716_v49, 0.0 }
  0x72   : > { %v964_v44 = vadd.f32 %v900_v42, %v751_v40  ;;  %v966_v45 = vadd.f32 %v902_v43, %v753_v41  ;;  %v472_v48 = vsel %vm396_vm2, %v1722_v53, 0.0  ;;  %v474_v50 = vsel %vm398_vm3, %v1722_v53, 0.0 }
  0x73   : > { %vm610_vm4 = vcmp.eq.s32.totalorder %v1644_v1, %v1763_v23  ;;  %vm612_vm5 = vcmp.eq.s32.totalorder %v1653_v4, %v1763_v23  ;;  %v536_v54 = vadd.f32 %v472_v48, %v323_v46  ;;  %v538_v55 = vadd.f32 %v474_v50, %v325_v47 }
  0x74   : > { %v1218_v51 = vpack.c.bf16 %v966_v45, %v964_v44  ;;  %v686_v57 = vsel %vm610_vm4, %v1749_v14, 0.0  ;;  %v688_v58 = vsel %vm612_vm5, %v1749_v14, 0.0  ;;  %vm823_vm6 = vcmp.eq.s32.totalorder %v1644_v1, %v1769_v25 }
  0x75   : > { %vm825_vm7 = vcmp.eq.s32.totalorder %v1653_v4, %v1769_v25  ;;  %vm252_vm8 = vcmp.eq.s32.totalorder %v1656_v5, %v1740_v63  ;;  %v750_v13 = vadd.f32 %v686_v57, %v536_v54  ;;  %v752_v22 = vadd.f32 %v688_v58, %v538_v55 }
  0x76   : > { %1219 = vmatprep.subr.bf16.mxu0 %v1218_v51  ;;  %v899_v31 = vsel %vm823_vm6, %v1728_v59, 0.0  ;;  %v901_v32 = vsel %vm825_vm7, %v1728_v59, 0.0  ;;  %vm254_vm9 = vcmp.eq.s32.totalorder %v1659_v6, %v1740_v63  ;;  %v328_v33 = vsel %vm252_vm8, %v1719_v52, 0.0 }
  0x77   : > { %vm401_vm10 = vcmp.eq.s32.totalorder %v1656_v5, %v1746_v12  ;;  %vm403_vm11 = vcmp.eq.s32.totalorder %v1659_v6, %v1746_v12  ;;  %v963_v4 = vadd.f32 %v899_v31, %v750_v13  ;;  %v965_v34 = vadd.f32 %v901_v32, %v752_v22 }
  0x78   : > { %v330_v38 = vsel %vm254_vm9, %v1719_v52, 0.0  ;;  %v477_v39 = vsel %vm401_vm10, %v1725_v56, 0.0  ;;  %v479_v2 = vsel %vm403_vm11, %v1725_v56, 0.0  ;;  %vm615_vm12 = vcmp.eq.s32.totalorder %v1656_v5, %v1766_v24 }
  0x79   : > { %v541_v3 = vadd.f32 %v477_v39, %v328_v33  ;;  %vm617_vm13 = vcmp.eq.s32.totalorder %v1659_v6, %v1766_v24  ;;  %v1220_v40 = vpack.c.bf16 %v965_v34, %v963_v4  ;;  %v543_v41 = vadd.f32 %v479_v2, %v330_v38 }
  0x7a   : > { %v691_v42 = vsel %vm615_vm12, %v1752_v15, 0.0  ;;  %v693_v43 = vsel %vm617_vm13, %v1752_v15, 0.0  ;;  %vm828_vm14 = vcmp.eq.s32.totalorder %v1656_v5, %v1772_v30  ;;  %vm830_vm15 = vcmp.eq.s32.totalorder %v1659_v6, %v1772_v30 }
  0x7b   : > { %v755_v44 = vadd.f32 %v691_v42, %v541_v3  ;;  %vm251_vm0 = vcmp.eq.s32.totalorder %v1656_v5, %v1737_v62  ;;  %1221 = vmatpush1.bf16.msra.mxu0 %v1220_v40  ;;  %v757_v45 = vadd.f32 %v693_v43, %v543_v41  ;;  %v904_v46 = vsel %vm828_vm14, %v1731_v60, 0.0 }
  0x7c   : > { %v906_v47 = vsel %vm830_vm15, %v1731_v60, 0.0  ;;  %vm253_vm1 = vcmp.eq.s32.totalorder %v1659_v6, %v1737_v62  ;;  %v327_v50 = vsel %vm251_vm0, %v1716_v49, 0.0  ;;  %vm400_vm2 = vcmp.eq.s32.totalorder %v1656_v5, %v1743_v0 }
  0x7d   : > { %v968_v48 = vadd.f32 %v904_v46, %v755_v44  ;;  %v329_v51 = vsel %vm253_vm1, %v1716_v49, 0.0  ;;  %v970_v54 = vadd.f32 %v906_v47, %v757_v45  ;;  %vm402_vm3 = vcmp.eq.s32.totalorder %v1659_v6, %v1743_v0 }
  0x7e   : > { %v476_v55 = vsel %vm400_vm2, %v1722_v53, 0.0  ;;  %vm614_vm4 = vcmp.eq.s32.totalorder %v1656_v5, %v1763_v23  ;;  %v478_v57 = vsel %vm402_vm3, %v1722_v53, 0.0  ;;  %vm616_vm5 = vcmp.eq.s32.totalorder %v1659_v6, %v1763_v23 }
  0x7f   : > { %v540_v58 = vadd.f32 %v476_v55, %v327_v50  ;;  %v690_v13 = vsel %vm614_vm4, %v1749_v14, 0.0  ;;  %v1222_v22 = vpack.c.bf16 %v970_v54, %v968_v48  ;;  %v542_v31 = vadd.f32 %v478_v57, %v329_v51 }
  0x80   : > { %v692_v32 = vsel %vm616_vm5, %v1749_v14, 0.0  ;;  %vm827_vm6 = vcmp.eq.s32.totalorder %v1656_v5, %v1769_v25  ;;  %vm829_vm7 = vcmp.eq.s32.totalorder %v1659_v6, %v1769_v25  ;;  %vm256_vm8 = vcmp.eq.s32.totalorder %v1662_v7, %v1740_v63 }
  0x81   : > { %v754_v33 = vadd.f32 %v690_v13, %v540_v58  ;;  %v903_v4 = vsel %vm827_vm6, %v1728_v59, 0.0  ;;  %1223 = vmatprep.subr.bf16.mxu0 %v1222_v22  ;;  %v756_v34 = vadd.f32 %v692_v32, %v542_v31  ;;  %v905_v38 = vsel %vm829_vm7, %v1728_v59, 0.0 }
  0x82   : > { %vm258_vm9 = vcmp.eq.s32.totalorder %v1665_v8, %v1740_v63  ;;  %v332_v39 = vsel %vm256_vm8, %v1719_v52, 0.0  ;;  %vm405_vm10 = vcmp.eq.s32.totalorder %v1662_v7, %v1746_v12  ;;  %vm407_vm11 = vcmp.eq.s32.totalorder %v1665_v8, %v1746_v12 }
  0x83   : > { %v967_v2 = vadd.f32 %v903_v4, %v754_v33  ;;  %v334_v5 = vsel %vm258_vm9, %v1719_v52, 0.0  ;;  %v969_v6 = vadd.f32 %v905_v38, %v756_v34  ;;  %v481_v3 = vsel %vm405_vm10, %v1725_v56, 0.0 }
  0x84   : > { %v483_v40 = vsel %vm407_vm11, %v1725_v56, 0.0  ;;  %vm619_vm12 = vcmp.eq.s32.totalorder %v1662_v7, %v1766_v24  ;;  %v545_v41 = vadd.f32 %v481_v3, %v332_v39  ;;  %vm621_vm13 = vcmp.eq.s32.totalorder %v1665_v8, %v1766_v24 }
  0x85   : > { %v547_v42 = vadd.f32 %v483_v40, %v334_v5  ;;  %v695_v43 = vsel %vm619_vm12, %v1752_v15, 0.0  ;;  %v1224_v44 = vpack.c.bf16 %v969_v6, %v967_v2  ;;  %v697_v45 = vsel %vm621_vm13, %v1752_v15, 0.0 }
  0x86   : > { %vm832_vm14 = vcmp.eq.s32.totalorder %v1662_v7, %v1772_v30  ;;  %vm834_vm15 = vcmp.eq.s32.totalorder %v1665_v8, %v1772_v30  ;;  %v759_v46 = vadd.f32 %v695_v43, %v545_v41  ;;  %vm255_vm0 = vcmp.eq.s32.totalorder %v1662_v7, %v1737_v62 }
  0x87   : > { %v761_v47 = vadd.f32 %v697_v45, %v547_v42  ;;  %v908_v48 = vsel %vm832_vm14, %v1731_v60, 0.0  ;;  %v910_v50 = vsel %vm834_vm15, %v1731_v60, 0.0  ;;  %1225 = vmatpush1.bf16.msra.mxu0 %v1224_v44  ;;  %vm257_vm1 = vcmp.eq.s32.totalorder %v1665_v8, %v1737_v62 }
  0x88   : > { %vm404_vm2 = vcmp.eq.s32.totalorder %v1662_v7, %v1743_v0  ;;  %vm406_vm3 = vcmp.eq.s32.totalorder %v1665_v8, %v1743_v0  ;;  %v972_v51 = vadd.f32 %v908_v48, %v759_v46  ;;  %v331_v55 = vsel %vm255_vm0, %v1716_v49, 0.0 }
  0x89   : > { %v974_v54 = vadd.f32 %v910_v50, %v761_v47  ;;  %v333_v57 = vsel %vm257_vm1, %v1716_v49, 0.0  ;;  %v480_v58 = vsel %vm404_vm2, %v1722_v53, 0.0  ;;  %v482_v13 = vsel %vm406_vm3, %v1722_v53, 0.0 }
  0x8a   : > { %vm618_vm4 = vcmp.eq.s32.totalorder %v1662_v7, %v1763_v23  ;;  %vm620_vm5 = vcmp.eq.s32.totalorder %v1665_v8, %v1763_v23  ;;  %v544_v31 = vadd.f32 %v480_v58, %v331_v55  ;;  %v546_v32 = vadd.f32 %v482_v13, %v333_v57 }
  0x8b   : > { %v1226_v22 = vpack.c.bf16 %v974_v54, %v972_v51  ;;  %v694_v33 = vsel %vm618_vm4, %v1749_v14, 0.0  ;;  %v696_v4 = vsel %vm620_vm5, %v1749_v14, 0.0  ;;  %vm831_vm6 = vcmp.eq.s32.totalorder %v1662_v7, %v1769_v25 }
  0x8c   : > { %vm833_vm7 = vcmp.eq.s32.totalorder %v1665_v8, %v1769_v25  ;;  %vm260_vm8 = vcmp.eq.s32.totalorder %v1668_v9, %v1740_v63  ;;  %v758_v34 = vadd.f32 %v694_v33, %v544_v31  ;;  %v760_v38 = vadd.f32 %v696_v4, %v546_v32 }
  0x8d   : > { %1227 = vmatprep.subr.bf16.mxu0 %v1226_v22  ;;  %v907_v39 = vsel %vm831_vm6, %v1728_v59, 0.0  ;;  %v909_v2 = vsel %vm833_vm7, %v1728_v59, 0.0  ;;  %vm262_vm9 = vcmp.eq.s32.totalorder %v1671_v10, %v1740_v63  ;;  %v336_v5 = vsel %vm260_vm8, %v1719_v52, 0.0 }
  0x8e   : > { %vm409_vm10 = vcmp.eq.s32.totalorder %v1668_v9, %v1746_v12  ;;  %vm411_vm11 = vcmp.eq.s32.totalorder %v1671_v10, %v1746_v12  ;;  %v971_v7 = vadd.f32 %v907_v39, %v758_v34  ;;  %v973_v8 = vadd.f32 %v909_v2, %v760_v38 }
  0x8f   : > { %v338_v6 = vsel %vm262_vm9, %v1719_v52, 0.0  ;;  %v485_v3 = vsel %vm409_vm10, %v1725_v56, 0.0  ;;  %v487_v40 = vsel %vm411_vm11, %v1725_v56, 0.0  ;;  %vm623_vm12 = vcmp.eq.s32.totalorder %v1668_v9, %v1766_v24 }
  0x90   : > { %v549_v41 = vadd.f32 %v485_v3, %v336_v5  ;;  %vm625_vm13 = vcmp.eq.s32.totalorder %v1671_v10, %v1766_v24  ;;  %v1228_v42 = vpack.c.bf16 %v973_v8, %v971_v7  ;;  %v551_v43 = vadd.f32 %v487_v40, %v338_v6 }
  0x91   : > { %v699_v44 = vsel %vm623_vm12, %v1752_v15, 0.0  ;;  %v701_v45 = vsel %vm625_vm13, %v1752_v15, 0.0  ;;  %vm836_vm14 = vcmp.eq.s32.totalorder %v1668_v9, %v1772_v30  ;;  %vm838_vm15 = vcmp.eq.s32.totalorder %v1671_v10, %v1772_v30 }
  0x92   : > { %v763_v46 = vadd.f32 %v699_v44, %v549_v41  ;;  %vm259_vm0 = vcmp.eq.s32.totalorder %v1668_v9, %v1737_v62  ;;  %1229 = vmatpush1.bf16.msra.mxu0 %v1228_v42  ;;  %v765_v47 = vadd.f32 %v701_v45, %v551_v43  ;;  %v912_v48 = vsel %vm836_vm14, %v1731_v60, 0.0 }
  0x93   : > { %v914_v50 = vsel %vm838_vm15, %v1731_v60, 0.0  ;;  %vm261_vm1 = vcmp.eq.s32.totalorder %v1671_v10, %v1737_v62  ;;  %v335_v54 = vsel %vm259_vm0, %v1716_v49, 0.0  ;;  %vm408_vm2 = vcmp.eq.s32.totalorder %v1668_v9, %v1743_v0 }
  0x94   : > { %v976_v51 = vadd.f32 %v912_v48, %v763_v46  ;;  %v337_v55 = vsel %vm261_vm1, %v1716_v49, 0.0  ;;  %v978_v57 = vadd.f32 %v914_v50, %v765_v47  ;;  %vm410_vm3 = vcmp.eq.s32.totalorder %v1671_v10, %v1743_v0 }
  0x95   : > { %v484_v58 = vsel %vm408_vm2, %v1722_v53, 0.0  ;;  %vm622_vm4 = vcmp.eq.s32.totalorder %v1668_v9, %v1763_v23  ;;  %v486_v13 = vsel %vm410_vm3, %v1722_v53, 0.0  ;;  %vm624_vm5 = vcmp.eq.s32.totalorder %v1671_v10, %v1763_v23 }
  0x96   : > { %v548_v22 = vadd.f32 %v484_v58, %v335_v54  ;;  %v698_v31 = vsel %vm622_vm4, %v1749_v14, 0.0  ;;  %v1230_v32 = vpack.c.bf16 %v978_v57, %v976_v51  ;;  %v550_v33 = vadd.f32 %v486_v13, %v337_v55 }
  0x97   : > { %v700_v4 = vsel %vm624_vm5, %v1749_v14, 0.0  ;;  %vm835_vm6 = vcmp.eq.s32.totalorder %v1668_v9, %v1769_v25  ;;  %vm837_vm7 = vcmp.eq.s32.totalorder %v1671_v10, %v1769_v25  ;;  %vm264_vm8 = vcmp.eq.s32.totalorder %v1674_v11, %v1740_v63 }
  0x98   : > { %v762_v34 = vadd.f32 %v698_v31, %v548_v22  ;;  %v911_v38 = vsel %vm835_vm6, %v1728_v59, 0.0  ;;  %1231 = vmatprep.subr.bf16.mxu0 %v1230_v32  ;;  %v764_v39 = vadd.f32 %v700_v4, %v550_v33  ;;  %v913_v2 = vsel %vm837_vm7, %v1728_v59, 0.0 }
  0x99   : > { %vm266_vm9 = vcmp.eq.s32.totalorder %v1677_v16, %v1740_v63  ;;  %v340_v5 = vsel %vm264_vm8, %v1719_v52, 0.0  ;;  %vm413_vm10 = vcmp.eq.s32.totalorder %v1674_v11, %v1746_v12  ;;  %vm415_vm11 = vcmp.eq.s32.totalorder %v1677_v16, %v1746_v12 }
  0x9a   : > { %v975_v7 = vadd.f32 %v911_v38, %v762_v34  ;;  %v342_v9 = vsel %vm266_vm9, %v1719_v52, 0.0  ;;  %v977_v10 = vadd.f32 %v913_v2, %v764_v39  ;;  %v489_v8 = vsel %vm413_vm10, %v1725_v56, 0.0 }
  0x9b   : > { %v491_v6 = vsel %vm415_vm11, %v1725_v56, 0.0  ;;  %vm627_vm12 = vcmp.eq.s32.totalorder %v1674_v11, %v1766_v24  ;;  %v553_v3 = vadd.f32 %v489_v8, %v340_v5  ;;  %vm629_vm13 = vcmp.eq.s32.totalorder %v1677_v16, %v1766_v24 }
  0x9c   : > { %v555_v40 = vadd.f32 %v491_v6, %v342_v9  ;;  %v703_v41 = vsel %vm627_vm12, %v1752_v15, 0.0  ;;  %v1232_v42 = vpack.c.bf16 %v977_v10, %v975_v7  ;;  %v705_v43 = vsel %vm629_vm13, %v1752_v15, 0.0 }
  0x9d   : > { %vm840_vm14 = vcmp.eq.s32.totalorder %v1674_v11, %v1772_v30  ;;  %vm842_vm15 = vcmp.eq.s32.totalorder %v1677_v16, %v1772_v30  ;;  %v767_v44 = vadd.f32 %v703_v41, %v553_v3  ;;  %vm263_vm0 = vcmp.eq.s32.totalorder %v1674_v11, %v1737_v62 }
  0x9e   : > { %v769_v45 = vadd.f32 %v705_v43, %v555_v40  ;;  %v916_v46 = vsel %vm840_vm14, %v1731_v60, 0.0  ;;  %v918_v47 = vsel %vm842_vm15, %v1731_v60, 0.0  ;;  %1233 = vmatpush1.bf16.msra.mxu0 %v1232_v42  ;;  %vm265_vm1 = vcmp.eq.s32.totalorder %v1677_v16, %v1737_v62 }
  0x9f   : > { %vm412_vm2 = vcmp.eq.s32.totalorder %v1674_v11, %v1743_v0  ;;  %vm414_vm3 = vcmp.eq.s32.totalorder %v1677_v16, %v1743_v0  ;;  %v980_v48 = vadd.f32 %v916_v46, %v767_v44  ;;  %v339_v51 = vsel %vm263_vm0, %v1716_v49, 0.0 }
  0xa0   : > { %v982_v50 = vadd.f32 %v918_v47, %v769_v45  ;;  %v341_v54 = vsel %vm265_vm1, %v1716_v49, 0.0  ;;  %v488_v55 = vsel %vm412_vm2, %v1722_v53, 0.0  ;;  %v490_v57 = vsel %vm414_vm3, %v1722_v53, 0.0  ;;  %v1028_v47 = vld [vmem:[#allocation2 + $0x8] sm:$0xff] }
  0xa1   : > { %vm626_vm4 = vcmp.eq.s32.totalorder %v1674_v11, %v1763_v23  ;;  %vm628_vm5 = vcmp.eq.s32.totalorder %v1677_v16, %v1763_v23  ;;  %v552_v13 = vadd.f32 %v488_v55, %v339_v51  ;;  %v554_v22 = vadd.f32 %v490_v57, %v341_v54  ;;  %1093 = vmatprep.mubr.f32.mxu0 %v1028_v47 }
  0xa2   : > { %v1234_v58 = vpack.c.bf16 %v982_v50, %v980_v48  ;;  %v702_v31 = vsel %vm626_vm4, %v1749_v14, 0.0  ;;  %v704_v32 = vsel %vm628_vm5, %v1749_v14, 0.0  ;;  %vm839_vm6 = vcmp.eq.s32.totalorder %v1674_v11, %v1769_v25 }
  0xa3   : > { %vm841_vm7 = vcmp.eq.s32.totalorder %v1677_v16, %v1769_v25  ;;  %vm268_vm8 = vcmp.eq.s32.totalorder %v1680_v17, %v1740_v63  ;;  %v766_v33 = vadd.f32 %v702_v31, %v552_v13  ;;  %v768_v4 = vadd.f32 %v704_v32, %v554_v22 }
  0xa4   : > { %1235 = vmatprep.subr.bf16.mxu0 %v1234_v58  ;;  %v915_v34 = vsel %vm839_vm6, %v1728_v59, 0.0  ;;  %v917_v38 = vsel %vm841_vm7, %v1728_v59, 0.0  ;;  %vm270_vm9 = vcmp.eq.s32.totalorder %v1683_v18, %v1740_v63  ;;  %v344_v39 = vsel %vm268_vm8, %v1719_v52, 0.0 }
  0xa5   : > { %vm417_vm10 = vcmp.eq.s32.totalorder %v1680_v17, %v1746_v12  ;;  %vm419_vm11 = vcmp.eq.s32.totalorder %v1683_v18, %v1746_v12  ;;  %v979_v11 = vadd.f32 %v915_v34, %v766_v33  ;;  %v981_v16 = vadd.f32 %v917_v38, %v768_v4 }
  0xa6   : > { %v346_v2 = vsel %vm270_vm9, %v1719_v52, 0.0  ;;  %v493_v5 = vsel %vm417_vm10, %v1725_v56, 0.0  ;;  %v495_v7 = vsel %vm419_vm11, %v1725_v56, 0.0  ;;  %vm631_vm12 = vcmp.eq.s32.totalorder %v1680_v17, %v1766_v24 }
  0xa7   : > { %v557_v9 = vadd.f32 %v493_v5, %v344_v39  ;;  %vm633_vm13 = vcmp.eq.s32.totalorder %v1683_v18, %v1766_v24  ;;  %v1236_v10 = vpack.c.bf16 %v981_v16, %v979_v11  ;;  %v559_v8 = vadd.f32 %v495_v7, %v346_v2 }
  0xa8   : > { %v707_v6 = vsel %vm631_vm12, %v1752_v15, 0.0  ;;  %v709_v3 = vsel %vm633_vm13, %v1752_v15, 0.0  ;;  %vm844_vm14 = vcmp.eq.s32.totalorder %v1680_v17, %v1772_v30  ;;  %vm846_vm15 = vcmp.eq.s32.totalorder %v1683_v18, %v1772_v30 }
  0xa9   : > { %v771_v40 = vadd.f32 %v707_v6, %v557_v9  ;;  %vm267_vm0 = vcmp.eq.s32.totalorder %v1680_v17, %v1737_v62  ;;  %1237 = vmatpush1.bf16.msra.mxu0 %v1236_v10  ;;  %v773_v41 = vadd.f32 %v709_v3, %v559_v8  ;;  %v920_v42 = vsel %vm844_vm14, %v1731_v60, 0.0 }
  0xaa   : > { %v922_v43 = vsel %vm846_vm15, %v1731_v60, 0.0  ;;  %vm269_vm1 = vcmp.eq.s32.totalorder %v1683_v18, %v1737_v62  ;;  %v343_v45 = vsel %vm267_vm0, %v1716_v49, 0.0  ;;  %vm416_vm2 = vcmp.eq.s32.totalorder %v1680_v17, %v1743_v0 }
  0xab   : > { %v984_v44 = vadd.f32 %v920_v42, %v771_v40  ;;  %v345_v46 = vsel %vm269_vm1, %v1716_v49, 0.0  ;;  %v986_v48 = vadd.f32 %v922_v43, %v773_v41  ;;  %vm418_vm3 = vcmp.eq.s32.totalorder %v1683_v18, %v1743_v0 }
  0xac   : > { %v492_v50 = vsel %vm416_vm2, %v1722_v53, 0.0  ;;  %vm630_vm4 = vcmp.eq.s32.totalorder %v1680_v17, %v1763_v23  ;;  %v494_v51 = vsel %vm418_vm3, %v1722_v53, 0.0  ;;  %vm632_vm5 = vcmp.eq.s32.totalorder %v1683_v18, %v1763_v23 }
  0xad   : > { %v556_v54 = vadd.f32 %v492_v50, %v343_v45  ;;  %v706_v55 = vsel %vm630_vm4, %v1749_v14, 0.0  ;;  %v1238_v57 = vpack.c.bf16 %v986_v48, %v984_v44  ;;  %v558_v58 = vadd.f32 %v494_v51, %v345_v46 }
  0xae   : > { %v708_v13 = vsel %vm632_vm5, %v1749_v14, 0.0  ;;  %vm843_vm6 = vcmp.eq.s32.totalorder %v1680_v17, %v1769_v25  ;;  %vm845_vm7 = vcmp.eq.s32.totalorder %v1683_v18, %v1769_v25  ;;  %vm272_vm8 = vcmp.eq.s32.totalorder %v1686_v19, %v1740_v63 }
  0xaf   : > { %v770_v22 = vadd.f32 %v706_v55, %v556_v54  ;;  %v919_v31 = vsel %vm843_vm6, %v1728_v59, 0.0  ;;  %1239 = vmatprep.subr.bf16.mxu0 %v1238_v57  ;;  %v772_v32 = vadd.f32 %v708_v13, %v558_v58  ;;  %v921_v33 = vsel %vm845_vm7, %v1728_v59, 0.0 }
  0xb0   : > { %vm274_vm9 = vcmp.eq.s32.totalorder %v1689_v20, %v1740_v63  ;;  %v348_v4 = vsel %vm272_vm8, %v1719_v52, 0.0  ;;  %vm421_vm10 = vcmp.eq.s32.totalorder %v1686_v19, %v1746_v12  ;;  %vm423_vm11 = vcmp.eq.s32.totalorder %v1689_v20, %v1746_v12 }
  0xb1   : > { %v983_v34 = vadd.f32 %v919_v31, %v770_v22  ;;  %v350_v17 = vsel %vm274_vm9, %v1719_v52, 0.0  ;;  %v985_v18 = vadd.f32 %v921_v33, %v772_v32  ;;  %v497_v38 = vsel %vm421_vm10, %v1725_v56, 0.0 }
  0xb2   : > { %v499_v39 = vsel %vm423_vm11, %v1725_v56, 0.0  ;;  %vm635_vm12 = vcmp.eq.s32.totalorder %v1686_v19, %v1766_v24  ;;  %v561_v11 = vadd.f32 %v497_v38, %v348_v4  ;;  %vm637_vm13 = vcmp.eq.s32.totalorder %v1689_v20, %v1766_v24 }
  0xb3   : > { %v563_v16 = vadd.f32 %v499_v39, %v350_v17  ;;  %v711_v2 = vsel %vm635_vm12, %v1752_v15, 0.0  ;;  %v1240_v5 = vpack.c.bf16 %v985_v18, %v983_v34  ;;  %v713_v7 = vsel %vm637_vm13, %v1752_v15, 0.0 }
  0xb4   : > { %vm848_vm14 = vcmp.eq.s32.totalorder %v1686_v19, %v1772_v30  ;;  %vm850_vm15 = vcmp.eq.s32.totalorder %v1689_v20, %v1772_v30  ;;  %v775_v9 = vadd.f32 %v711_v2, %v561_v11  ;;  %vm271_vm0 = vcmp.eq.s32.totalorder %v1686_v19, %v1737_v62 }
  0xb5   : > { %v777_v10 = vadd.f32 %v713_v7, %v563_v16  ;;  %v924_v8 = vsel %vm848_vm14, %v1731_v60, 0.0  ;;  %v926_v6 = vsel %vm850_vm15, %v1731_v60, 0.0  ;;  %1241 = vmatpush1.bf16.msra.mxu0 %v1240_v5  ;;  %vm273_vm1 = vcmp.eq.s32.totalorder %v1689_v20, %v1737_v62 }
  0xb6   : > { %vm420_vm2 = vcmp.eq.s32.totalorder %v1686_v19, %v1743_v0  ;;  %vm422_vm3 = vcmp.eq.s32.totalorder %v1689_v20, %v1743_v0  ;;  %v988_v3 = vadd.f32 %v924_v8, %v775_v9  ;;  %v347_v41 = vsel %vm271_vm0, %v1716_v49, 0.0 }
  0xb7   : > { %v990_v40 = vadd.f32 %v926_v6, %v777_v10  ;;  %v349_v42 = vsel %vm273_vm1, %v1716_v49, 0.0  ;;  %v496_v43 = vsel %vm420_vm2, %v1722_v53, 0.0  ;;  %v498_v44 = vsel %vm422_vm3, %v1722_v53, 0.0 }
  0xb8   : > { %vm634_vm4 = vcmp.eq.s32.totalorder %v1686_v19, %v1763_v23  ;;  %vm636_vm5 = vcmp.eq.s32.totalorder %v1689_v20, %v1763_v23  ;;  %v560_v46 = vadd.f32 %v496_v43, %v347_v41  ;;  %v562_v47 = vadd.f32 %v498_v44, %v349_v42 }
  0xb9   : > { %v1242_v45 = vpack.c.bf16 %v990_v40, %v988_v3  ;;  %v710_v48 = vsel %vm634_vm4, %v1749_v14, 0.0  ;;  %v712_v50 = vsel %vm636_vm5, %v1749_v14, 0.0  ;;  %vm847_vm6 = vcmp.eq.s32.totalorder %v1686_v19, %v1769_v25 }
  0xba   : > { %vm849_vm7 = vcmp.eq.s32.totalorder %v1689_v20, %v1769_v25  ;;  %vm276_vm8 = vcmp.eq.s32.totalorder %v1692_v21, %v1740_v63  ;;  %v774_v51 = vadd.f32 %v710_v48, %v560_v46  ;;  %v776_v54 = vadd.f32 %v712_v50, %v562_v47 }
  0xbb   : > { %1243 = vmatprep.subr.bf16.mxu0 %v1242_v45  ;;  %v923_v55 = vsel %vm847_vm6, %v1728_v59, 0.0  ;;  %v925_v57 = vsel %vm849_vm7, %v1728_v59, 0.0  ;;  %vm278_vm9 = vcmp.eq.s32.totalorder %v1695_v26, %v1740_v63  ;;  %v352_v58 = vsel %vm276_vm8, %v1719_v52, 0.0 }
  0xbc   : > { %vm425_vm10 = vcmp.eq.s32.totalorder %v1692_v21, %v1746_v12  ;;  %vm427_vm11 = vcmp.eq.s32.totalorder %v1695_v26, %v1746_v12  ;;  %v987_v19 = vadd.f32 %v923_v55, %v774_v51  ;;  %v989_v20 = vadd.f32 %v925_v57, %v776_v54 }
  0xbd   : > { %v354_v13 = vsel %vm278_vm9, %v1719_v52, 0.0  ;;  %v501_v22 = vsel %vm425_vm10, %v1725_v56, 0.0  ;;  %v503_v31 = vsel %vm427_vm11, %v1725_v56, 0.0  ;;  %vm639_vm12 = vcmp.eq.s32.totalorder %v1692_v21, %v1766_v24 }
  0xbe   : > { %v565_v32 = vadd.f32 %v501_v22, %v352_v58  ;;  %vm641_vm13 = vcmp.eq.s32.totalorder %v1695_v26, %v1766_v24  ;;  %v1244_v33 = vpack.c.bf16 %v989_v20, %v987_v19  ;;  %v567_v4 = vadd.f32 %v503_v31, %v354_v13 }
  0xbf   : > { %v715_v34 = vsel %vm639_vm12, %v1752_v15, 0.0  ;;  %v717_v17 = vsel %vm641_vm13, %v1752_v15, 0.0  ;;  %vm852_vm14 = vcmp.eq.s32.totalorder %v1692_v21, %v1772_v30  ;;  %vm854_vm15 = vcmp.eq.s32.totalorder %v1695_v26, %v1772_v30 }
  0xc0   : > { %v779_v18 = vadd.f32 %v715_v34, %v565_v32  ;;  %vm275_vm0 = vcmp.eq.s32.totalorder %v1692_v21, %v1737_v62  ;;  %1245 = vmatpush1.bf16.msra.mxu0 %v1244_v33  ;;  %v781_v38 = vadd.f32 %v717_v17, %v567_v4  ;;  %v928_v39 = vsel %vm852_vm14, %v1731_v60, 0.0 }
  0xc1   : > { %v930_v11 = vsel %vm854_vm15, %v1731_v60, 0.0  ;;  %vm277_vm1 = vcmp.eq.s32.totalorder %v1695_v26, %v1737_v62  ;;  %v351_v2 = vsel %vm275_vm0, %v1716_v49, 0.0  ;;  %vm424_vm2 = vcmp.eq.s32.totalorder %v1692_v21, %v1743_v0 }
  0xc2   : > { %v992_v16 = vadd.f32 %v928_v39, %v779_v18  ;;  %v353_v5 = vsel %vm277_vm1, %v1716_v49, 0.0  ;;  %v994_v7 = vadd.f32 %v930_v11, %v781_v38  ;;  %vm426_vm3 = vcmp.eq.s32.totalorder %v1695_v26, %v1743_v0 }
  0xc3   : > { %v500_v9 = vsel %vm424_vm2, %v1722_v53, 0.0  ;;  %vm638_vm4 = vcmp.eq.s32.totalorder %v1692_v21, %v1763_v23  ;;  %v502_v10 = vsel %vm426_vm3, %v1722_v53, 0.0  ;;  %vm640_vm5 = vcmp.eq.s32.totalorder %v1695_v26, %v1763_v23 }
  0xc4   : > { %v564_v8 = vadd.f32 %v500_v9, %v351_v2  ;;  %v714_v6 = vsel %vm638_vm4, %v1749_v14, 0.0  ;;  %v1246_v3 = vpack.c.bf16 %v994_v7, %v992_v16  ;;  %v566_v40 = vadd.f32 %v502_v10, %v353_v5 }
  0xc5   : > { %v716_v41 = vsel %vm640_vm5, %v1749_v14, 0.0  ;;  %vm851_vm6 = vcmp.eq.s32.totalorder %v1692_v21, %v1769_v25  ;;  %vm853_vm7 = vcmp.eq.s32.totalorder %v1695_v26, %v1769_v25  ;;  %vm280_vm8 = vcmp.eq.s32.totalorder %v1698_v27, %v1740_v63 }
  0xc6   : > { %v778_v42 = vadd.f32 %v714_v6, %v564_v8  ;;  %v927_v43 = vsel %vm851_vm6, %v1728_v59, 0.0  ;;  %1247 = vmatprep.subr.bf16.mxu0 %v1246_v3  ;;  %v780_v44 = vadd.f32 %v716_v41, %v566_v40  ;;  %v929_v45 = vsel %vm853_vm7, %v1728_v59, 0.0 }
  0xc7   : > { %vm282_vm9 = vcmp.eq.s32.totalorder %v1701_v28, %v1740_v63  ;;  %v356_v46 = vsel %vm280_vm8, %v1719_v52, 0.0  ;;  %vm429_vm10 = vcmp.eq.s32.totalorder %v1698_v27, %v1746_v12  ;;  %vm431_vm11 = vcmp.eq.s32.totalorder %v1701_v28, %v1746_v12 }
  0xc8   : > { %v991_v47 = vadd.f32 %v927_v43, %v778_v42  ;;  %v358_v21 = vsel %vm282_vm9, %v1719_v52, 0.0  ;;  %v993_v26 = vadd.f32 %v929_v45, %v780_v44  ;;  %v505_v48 = vsel %vm429_vm10, %v1725_v56, 0.0 }
  0xc9   : > { %v507_v50 = vsel %vm431_vm11, %v1725_v56, 0.0  ;;  %vm643_vm12 = vcmp.eq.s32.totalorder %v1698_v27, %v1766_v24  ;;  %v569_v51 = vadd.f32 %v505_v48, %v356_v46  ;;  %vm645_vm13 = vcmp.eq.s32.totalorder %v1701_v28, %v1766_v24 }
  0xca   : > { %v571_v54 = vadd.f32 %v507_v50, %v358_v21  ;;  %v719_v55 = vsel %vm643_vm12, %v1752_v15, 0.0  ;;  %v1248_v57 = vpack.c.bf16 %v993_v26, %v991_v47  ;;  %v721_v58 = vsel %vm645_vm13, %v1752_v15, 0.0 }
  0xcb   : > { %vm856_vm14 = vcmp.eq.s32.totalorder %v1698_v27, %v1772_v30  ;;  %vm858_vm15 = vcmp.eq.s32.totalorder %v1701_v28, %v1772_v30  ;;  %v783_v19 = vadd.f32 %v719_v55, %v569_v51  ;;  %vm279_vm0 = vcmp.eq.s32.totalorder %v1698_v27, %v1737_v62 }
  0xcc   : > { %v785_v20 = vadd.f32 %v721_v58, %v571_v54  ;;  %v932_v13 = vsel %vm856_vm14, %v1731_v60, 0.0  ;;  %v934_v22 = vsel %vm858_vm15, %v1731_v60, 0.0  ;;  %1249 = vmatpush1.bf16.msra.mxu0 %v1248_v57  ;;  %vm281_vm1 = vcmp.eq.s32.totalorder %v1701_v28, %v1737_v62 }
  0xcd   : > { %vm428_vm2 = vcmp.eq.s32.totalorder %v1698_v27, %v1743_v0  ;;  %vm430_vm3 = vcmp.eq.s32.totalorder %v1701_v28, %v1743_v0  ;;  %v996_v31 = vadd.f32 %v932_v13, %v783_v19  ;;  %v355_v33 = vsel %vm279_vm0, %v1716_v49, 0.0 }
  0xce   : > { %v998_v32 = vadd.f32 %v934_v22, %v785_v20  ;;  %v357_v4 = vsel %vm281_vm1, %v1716_v49, 0.0  ;;  %v504_v34 = vsel %vm428_vm2, %v1722_v53, 0.0  ;;  %v506_v17 = vsel %vm430_vm3, %v1722_v53, 0.0 }
  0xcf   : > { %vm642_vm4 = vcmp.eq.s32.totalorder %v1698_v27, %v1763_v23  ;;  %vm644_vm5 = vcmp.eq.s32.totalorder %v1701_v28, %v1763_v23  ;;  %v568_v38 = vadd.f32 %v504_v34, %v355_v33  ;;  %v570_v39 = vadd.f32 %v506_v17, %v357_v4 }
  0xd0   : > { %v1250_v18 = vpack.c.bf16 %v998_v32, %v996_v31  ;;  %v718_v11 = vsel %vm642_vm4, %v1749_v14, 0.0  ;;  %v720_v16 = vsel %vm644_vm5, %v1749_v14, 0.0  ;;  %vm855_vm6 = vcmp.eq.s32.totalorder %v1698_v27, %v1769_v25 }
  0xd1   : > { %vm857_vm7 = vcmp.eq.s32.totalorder %v1701_v28, %v1769_v25  ;;  %vm284_vm8 = vcmp.eq.s32.totalorder %v1704_v29, %v1740_v63  ;;  %v782_v2 = vadd.f32 %v718_v11, %v568_v38  ;;  %v784_v5 = vadd.f32 %v720_v16, %v570_v39 }
  0xd2   : > { %1251 = vmatprep.subr.bf16.mxu0 %v1250_v18  ;;  %v931_v7 = vsel %vm855_vm6, %v1728_v59, 0.0  ;;  %v933_v9 = vsel %vm857_vm7, %v1728_v59, 0.0  ;;  %vm286_vm9 = vcmp.eq.s32.totalorder %v1707_v35, %v1740_v63  ;;  %v360_v10 = vsel %vm284_vm8, %v1719_v52, 0.0 }
  0xd3   : > { %vm433_vm10 = vcmp.eq.s32.totalorder %v1704_v29, %v1746_v12  ;;  %vm435_vm11 = vcmp.eq.s32.totalorder %v1707_v35, %v1746_v12  ;;  %v995_v27 = vadd.f32 %v931_v7, %v782_v2  ;;  %v997_v28 = vadd.f32 %v933_v9, %v784_v5 }
  0xd4   : > { %v362_v8 = vsel %vm286_vm9, %v1719_v52, 0.0  ;;  %v509_v6 = vsel %vm433_vm10, %v1725_v56, 0.0  ;;  %v511_v3 = vsel %vm435_vm11, %v1725_v56, 0.0  ;;  %vm647_vm12 = vcmp.eq.s32.totalorder %v1704_v29, %v1766_v24 }
  0xd5   : > { %v573_v40 = vadd.f32 %v509_v6, %v360_v10  ;;  %vm649_vm13 = vcmp.eq.s32.totalorder %v1707_v35, %v1766_v24  ;;  %v1252_v41 = vpack.c.bf16 %v997_v28, %v995_v27  ;;  %v575_v42 = vadd.f32 %v511_v3, %v362_v8 }
  0xd6   : > { %v723_v43 = vsel %vm647_vm12, %v1752_v15, 0.0  ;;  %v725_v44 = vsel %vm649_vm13, %v1752_v15, 0.0  ;;  %vm860_vm14 = vcmp.eq.s32.totalorder %v1704_v29, %v1772_v30  ;;  %vm862_vm15 = vcmp.eq.s32.totalorder %v1707_v35, %v1772_v30 }
  0xd7   : > { %v787_v45 = vadd.f32 %v723_v43, %v573_v40  ;;  %vm283_vm0 = vcmp.eq.s32.totalorder %v1704_v29, %v1737_v62  ;;  %1253 = vmatpush1.bf16.msra.mxu0 %v1252_v41  ;;  %v789_v46 = vadd.f32 %v725_v44, %v575_v42  ;;  %v936_v47 = vsel %vm860_vm14, %v1731_v60, 0.0 }
  0xd8   : > { %v938_v21 = vsel %vm862_vm15, %v1731_v60, 0.0  ;;  %vm285_vm1 = vcmp.eq.s32.totalorder %v1707_v35, %v1737_v62  ;;  %v359_v48 = vsel %vm283_vm0, %v1716_v49, 0.0  ;;  %vm432_vm2 = vcmp.eq.s32.totalorder %v1704_v29, %v1743_v0 }
  0xd9   : > { %v1000_v26 = vadd.f32 %v936_v47, %v787_v45  ;;  %v361_v50 = vsel %vm285_vm1, %v1716_v49, 0.0  ;;  %v1002_v51 = vadd.f32 %v938_v21, %v789_v46  ;;  %vm434_vm3 = vcmp.eq.s32.totalorder %v1707_v35, %v1743_v0 }
  0xda   : > { %v508_v54 = vsel %vm432_vm2, %v1722_v53, 0.0  ;;  %vm646_vm4 = vcmp.eq.s32.totalorder %v1704_v29, %v1763_v23  ;;  %v510_v55 = vsel %vm434_vm3, %v1722_v53, 0.0  ;;  %vm648_vm5 = vcmp.eq.s32.totalorder %v1707_v35, %v1763_v23 }
  0xdb   : > { %v572_v57 = vadd.f32 %v508_v54, %v359_v48  ;;  %v722_v58 = vsel %vm646_vm4, %v1749_v14, 0.0  ;;  %v1254_v19 = vpack.c.bf16 %v1002_v51, %v1000_v26  ;;  %v574_v20 = vadd.f32 %v510_v55, %v361_v50 }
  0xdc   : > { %v724_v13 = vsel %vm648_vm5, %v1749_v14, 0.0  ;;  %vm859_vm6 = vcmp.eq.s32.totalorder %v1704_v29, %v1769_v25  ;;  %vm861_vm7 = vcmp.eq.s32.totalorder %v1707_v35, %v1769_v25  ;;  %vm288_vm8 = vcmp.eq.s32.totalorder %v1710_v36, %v1740_v63 }
  0xdd   : > { %v786_v22 = vadd.f32 %v722_v58, %v572_v57  ;;  %v935_v31 = vsel %vm859_vm6, %v1728_v59, 0.0  ;;  %1255 = vmatprep.subr.bf16.mxu0 %v1254_v19  ;;  %v788_v32 = vadd.f32 %v724_v13, %v574_v20  ;;  %v937_v33 = vsel %vm861_vm7, %v1728_v59, 0.0 }
  0xde   : > { %vm290_vm9 = vcmp.eq.s32.totalorder %v1713_v37, %v1740_v63  ;;  %v364_v4 = vsel %vm288_vm8, %v1719_v52, 0.0  ;;  %vm437_vm10 = vcmp.eq.s32.totalorder %v1710_v36, %v1746_v12  ;;  %vm439_vm11 = vcmp.eq.s32.totalorder %v1713_v37, %v1746_v12 }
  0xdf   : > { %v999_v34 = vadd.f32 %v935_v31, %v786_v22  ;;  %v366_v29 = vsel %vm290_vm9, %v1719_v52, 0.0  ;;  %v1001_v35 = vadd.f32 %v937_v33, %v788_v32  ;;  %v513_v17 = vsel %vm437_vm10, %v1725_v56, 0.0 }
  0xe0   : > { %v515_v18 = vsel %vm439_vm11, %v1725_v56, 0.0  ;;  %vm651_vm12 = vcmp.eq.s32.totalorder %v1710_v36, %v1766_v24  ;;  %v577_v38 = vadd.f32 %v513_v17, %v364_v4  ;;  %vm653_vm13 = vcmp.eq.s32.totalorder %v1713_v37, %v1766_v24 }
  0xe1   : > { %v579_v39 = vadd.f32 %v515_v18, %v366_v29  ;;  %v727_v11 = vsel %vm651_vm12, %v1752_v15, 0.0  ;;  %v1256_v16 = vpack.c.bf16 %v1001_v35, %v999_v34  ;;  %v729_v2 = vsel %vm653_vm13, %v1752_v15, 0.0 }
  0xe2   : > { %vm864_vm14 = vcmp.eq.s32.totalorder %v1710_v36, %v1772_v30  ;;  %vm866_vm15 = vcmp.eq.s32.totalorder %v1713_v37, %v1772_v30  ;;  %v791_v5 = vadd.f32 %v727_v11, %v577_v38  ;;  %vm287_vm0 = vcmp.eq.s32.totalorder %v1710_v36, %v1737_v62 }
  0xe3   : > { %v793_v7 = vadd.f32 %v729_v2, %v579_v39  ;;  %v940_v9 = vsel %vm864_vm14, %v1731_v60, 0.0  ;;  %v942_v10 = vsel %vm866_vm15, %v1731_v60, 0.0  ;;  %1257 = vmatpush1.bf16.msra.mxu0 %v1256_v16  ;;  %vm289_vm1 = vcmp.eq.s32.totalorder %v1713_v37, %v1737_v62 }
  0xe4   : > { %vm436_vm2 = vcmp.eq.s32.totalorder %v1710_v36, %v1743_v0  ;;  %vm438_vm3 = vcmp.eq.s32.totalorder %v1713_v37, %v1743_v0  ;;  %v1004_v27 = vadd.f32 %v940_v9, %v791_v5  ;;  %v363_v8 = vsel %vm287_vm0, %v1716_v49, 0.0 }
  0xe5   : > { %v1006_v28 = vadd.f32 %v942_v10, %v793_v7  ;;  %v365_v6 = vsel %vm289_vm1, %v1716_v49, 0.0  ;;  %v512_v3 = vsel %vm436_vm2, %v1722_v53, 0.0  ;;  %v514_v40 = vsel %vm438_vm3, %v1722_v53, 0.0 }
  0xe6   : > { %vm650_vm4 = vcmp.eq.s32.totalorder %v1710_v36, %v1763_v23  ;;  %vm652_vm5 = vcmp.eq.s32.totalorder %v1713_v37, %v1763_v23  ;;  %v576_v42 = vadd.f32 %v512_v3, %v363_v8  ;;  %v578_v43 = vadd.f32 %v514_v40, %v365_v6 }
  0xe7   : > { %v1258_v41 = vpack.c.bf16 %v1006_v28, %v1004_v27  ;;  %v726_v44 = vsel %vm650_vm4, %v1749_v14, 0.0  ;;  %v728_v45 = vsel %vm652_vm5, %v1749_v14, 0.0  ;;  %vm863_vm6 = vcmp.eq.s32.totalorder %v1710_v36, %v1769_v25 }
  0xe8   : > { %vm865_vm7 = vcmp.eq.s32.totalorder %v1713_v37, %v1769_v25  ;;  %v208_v46 = vadd.s32 184, %v1644_v1  ;;  %v790_v47 = vadd.f32 %v726_v44, %v576_v42  ;;  %v792_v21 = vadd.f32 %v728_v45, %v578_v43 }
  0xe9   : > { %1259 = vmatprep.subr.bf16.mxu0 %v1258_v41  ;;  %v939_v26 = vsel %vm863_vm6, %v1728_v59, 0.0  ;;  %v941_v48 = vsel %vm865_vm7, %v1728_v59, 0.0  ;;  %vm292_vm8 = vcmp.eq.s32.totalorder %v1734_v61, %v1740_v63  ;;  %vm441_vm10 = vcmp.eq.s32.totalorder %v1734_v61, %v1746_v12 }
  0xea   : > { %vm294_vm9 = vcmp.eq.s32.totalorder %v208_v46, %v1740_v63  ;;  %vm443_vm11 = vcmp.eq.s32.totalorder %v208_v46, %v1746_v12  ;;  %v1003_v36 = vadd.f32 %v939_v26, %v790_v47  ;;  %v1005_v37 = vadd.f32 %v941_v48, %v792_v21 }
  0xeb   : > { %v368_v50 = vsel %vm292_vm8, %v1719_v52, 0.0  ;;  %v370_v51 = vsel %vm294_vm9, %v1719_v52, 0.0  ;;  %v517_v54 = vsel %vm441_vm10, %v1725_v56, 0.0  ;;  %v519_v55 = vsel %vm443_vm11, %v1725_v56, 0.0 }
  0xec   : > { %vm655_vm12 = vcmp.eq.s32.totalorder %v1734_v61, %v1766_v24  ;;  %vm657_vm13 = vcmp.eq.s32.totalorder %v208_v46, %v1766_v24  ;;  %v1260_v57 = vpack.c.bf16 %v1005_v37, %v1003_v36  ;;  %v581_v58 = vadd.f32 %v517_v54, %v368_v50 }
  0xed   : > { %v583_v19 = vadd.f32 %v519_v55, %v370_v51  ;;  %v731_v20 = vsel %vm655_vm12, %v1752_v15, 0.0  ;;  %v733_v13 = vsel %vm657_vm13, %v1752_v15, 0.0  ;;  %vm868_vm14 = vcmp.eq.s32.totalorder %v1734_v61, %v1772_v30 }
  0xee   : > { %vm870_vm15 = vcmp.eq.s32.totalorder %v208_v46, %v1772_v30  ;;  %vm291_vm0 = vcmp.eq.s32.totalorder %v1734_v61, %v1737_v62  ;;  %1261 = vmatpush1.bf16.msra.mxu0 %v1260_v57  ;;  %v795_v22 = vadd.f32 %v731_v20, %v581_v58  ;;  %v944_v32 = vsel %vm868_vm14, %v1731_v60, 0.0 }
  0xef   : > { %v797_v31 = vadd.f32 %v733_v13, %v583_v19  ;;  %v946_v33 = vsel %vm870_vm15, %v1731_v60, 0.0  ;;  %vm293_vm1 = vcmp.eq.s32.totalorder %v208_v46, %v1737_v62  ;;  %v367_v4 = vsel %vm291_vm0, %v1716_v49, 0.0 }
  0xf0   : > { %vm440_vm2 = vcmp.eq.s32.totalorder %v1734_v61, %v1743_v0  ;;  %vm442_vm3 = vcmp.eq.s32.totalorder %v208_v46, %v1743_v0  ;;  %v1008_v34 = vadd.f32 %v944_v32, %v795_v22  ;;  %v369_v35 = vsel %vm293_vm1, %v1716_v49, 0.0 }
  0xf1   : > { %v1010_v29 = vadd.f32 %v946_v33, %v797_v31  ;;  %v516_v17 = vsel %vm440_vm2, %v1722_v53, 0.0  ;;  %v518_v18 = vsel %vm442_vm3, %v1722_v53, 0.0  ;;  %vm654_vm4 = vcmp.eq.s32.totalorder %v1734_v61, %v1763_v23 }
  0xf2   : > { %v580_v38 = vadd.f32 %v516_v17, %v367_v4  ;;  %vm656_vm5 = vcmp.eq.s32.totalorder %v208_v46, %v1763_v23  ;;  %v582_v11 = vadd.f32 %v518_v18, %v369_v35  ;;  %v730_v16 = vsel %vm654_vm4, %v1749_v14, 0.0 }
  0xf3   : > { %v1262_v39 = vpack.c.bf16 %v1010_v29, %v1008_v34  ;;  %v732_v2 = vsel %vm656_vm5, %v1749_v14, 0.0  ;;  %vm867_vm6 = vcmp.eq.s32.totalorder %v1734_v61, %v1769_v25  ;;  %vm869_vm7 = vcmp.eq.s32.totalorder %v208_v46, %v1769_v25 }
  0xf4   : > { %v794_v5 = vadd.f32 %v730_v16, %v580_v38  ;;  %v209_v7 = vadd.s32 192, %v1644_v1  ;;  %v796_v9 = vadd.f32 %v732_v2, %v582_v11  ;;  %v943_v10 = vsel %vm867_vm6, %v1728_v59, 0.0 }
  0xf5   : > { %1263 = vmatprep.subr.bf16.mxu0 %v1262_v39  ;;  %v945_v27 = vsel %vm869_vm7, %v1728_v59, 0.0  ;;  %v210_v28 = vadd.s32 200, %v1644_v1  ;;  %v211_v31 = vadd.s32 208, %v1644_v1  ;;  %v212_v34 = vadd.s32 216, %v1644_v1 }
  0xf6   : > { %v1007_v8 = vadd.f32 %v943_v10, %v794_v5  ;;  %vm296_vm8 = vcmp.eq.s32.totalorder %v209_v7, %v1740_v63  ;;  %vm445_vm9 = vcmp.eq.s32.totalorder %v209_v7, %v1746_v12  ;;  %vm659_vm10 = vcmp.eq.s32.totalorder %v209_v7, %v1766_v24 }
  0xf7   : > { %v1009_v61 = vadd.f32 %v945_v27, %v796_v9  ;;  %vm298_vm11 = vcmp.eq.s32.totalorder %v210_v28, %v1740_v63  ;;  %v372_v6 = vsel %vm296_vm8, %v1719_v52, 0.0  ;;  %vm447_vm12 = vcmp.eq.s32.totalorder %v210_v28, %v1746_v12 }
  0xf8   : > { %v374_v3 = vsel %vm298_vm11, %v1719_v52, 0.0  ;;  %v521_v40 = vsel %vm445_vm9, %v1725_v56, 0.0  ;;  %v523_v41 = vsel %vm447_vm12, %v1725_v56, 0.0  ;;  %vm661_vm13 = vcmp.eq.s32.totalorder %v210_v28, %v1766_v24 }
  0xf9   : > { %v1264_v42 = vpack.c.bf16 %v1009_v61, %v1007_v8  ;;  %v585_v43 = vadd.f32 %v521_v40, %v372_v6  ;;  %v587_v44 = vadd.f32 %v523_v41, %v374_v3  ;;  %v735_v45 = vsel %vm659_vm10, %v1752_v15, 0.0 }
  0xfa   : > { %v737_v46 = vsel %vm661_vm13, %v1752_v15, 0.0  ;;  %vm872_vm14 = vcmp.eq.s32.totalorder %v209_v7, %v1772_v30  ;;  %vm874_vm15 = vcmp.eq.s32.totalorder %v210_v28, %v1772_v30  ;;  %vm295_vm0 = vcmp.eq.s32.totalorder %v209_v7, %v1737_v62 }
  0xfb   : > { %1265 = vmatpush1.bf16.msra.mxu0 %v1264_v42  ;;  %v799_v47 = vadd.f32 %v735_v45, %v585_v43  ;;  %v801_v21 = vadd.f32 %v737_v46, %v587_v44  ;;  %v948_v26 = vsel %vm872_vm14, %v1731_v60, 0.0  ;;  %v950_v48 = vsel %vm874_vm15, %v1731_v60, 0.0 }
  0xfc   : > { %vm297_vm1 = vcmp.eq.s32.totalorder %v210_v28, %v1737_v62  ;;  %v371_v36 = vsel %vm295_vm0, %v1716_v49, 0.0  ;;  %vm444_vm2 = vcmp.eq.s32.totalorder %v209_v7, %v1743_v0  ;;  %vm446_vm3 = vcmp.eq.s32.totalorder %v210_v28, %v1743_v0 }
  0xfd   : > { %v1012_v37 = vadd.f32 %v948_v26, %v799_v47  ;;  %v1014_v50 = vadd.f32 %v950_v48, %v801_v21  ;;  %v373_v51 = vsel %vm297_vm1, %v1716_v49, 0.0  ;;  %v520_v54 = vsel %vm444_vm2, %v1722_v53, 0.0 }
  0xfe   : > { %v522_v55 = vsel %vm446_vm3, %v1722_v53, 0.0  ;;  %v584_v57 = vadd.f32 %v520_v54, %v371_v36  ;;  %vm658_vm4 = vcmp.eq.s32.totalorder %v209_v7, %v1763_v23  ;;  %vm660_vm5 = vcmp.eq.s32.totalorder %v210_v28, %v1763_v23 }
  0xff   : > { %v1266_v58 = vpack.c.bf16 %v1014_v50, %v1012_v37  ;;  %v586_v19 = vadd.f32 %v522_v55, %v373_v51  ;;  %v734_v20 = vsel %vm658_vm4, %v1749_v14, 0.0  ;;  %v736_v13 = vsel %vm660_vm5, %v1749_v14, 0.0 }
 0x100   : > { %v798_v22 = vadd.f32 %v734_v20, %v584_v57  ;;  %vm871_vm6 = vcmp.eq.s32.totalorder %v209_v7, %v1769_v25  ;;  %vm873_vm7 = vcmp.eq.s32.totalorder %v210_v28, %v1769_v25  ;;  %vm300_vm8 = vcmp.eq.s32.totalorder %v211_v31, %v1740_v63 }
 0x101   : > { %1267 = vmatprep.subr.bf16.mxu0 %v1266_v58  ;;  %v800_v32 = vadd.f32 %v736_v13, %v586_v19  ;;  %v947_v33 = vsel %vm871_vm6, %v1728_v59, 0.0  ;;  %v949_v4 = vsel %vm873_vm7, %v1728_v59, 0.0  ;;  %vm449_vm9 = vcmp.eq.s32.totalorder %v211_v31, %v1746_v12 }
 0x102   : > { %v1011_v29 = vadd.f32 %v947_v33, %v798_v22  ;;  %vm663_vm10 = vcmp.eq.s32.totalorder %v211_v31, %v1766_v24  ;;  %vm302_vm11 = vcmp.eq.s32.totalorder %v212_v34, %v1740_v63  ;;  %v376_v17 = vsel %vm300_vm8, %v1719_v52, 0.0 }
 0x103   : > { %v1013_v35 = vadd.f32 %v949_v4, %v800_v32  ;;  %vm451_vm12 = vcmp.eq.s32.totalorder %v212_v34, %v1746_v12  ;;  %v378_v18 = vsel %vm302_vm11, %v1719_v52, 0.0  ;;  %v525_v38 = vsel %vm449_vm9, %v1725_v56, 0.0 }
 0x104   : > { %v527_v39 = vsel %vm451_vm12, %v1725_v56, 0.0  ;;  %vm665_vm13 = vcmp.eq.s32.totalorder %v212_v34, %v1766_v24  ;;  %v589_v16 = vadd.f32 %v525_v38, %v376_v17  ;;  %v739_v5 = vsel %vm663_vm10, %v1752_v15, 0.0 }
 0x105   : > { %v1268_v11 = vpack.c.bf16 %v1013_v35, %v1011_v29  ;;  %v591_v2 = vadd.f32 %v527_v39, %v378_v18  ;;  %v741_v7 = vsel %vm665_vm13, %v1752_v15, 0.0  ;;  %vm876_vm14 = vcmp.eq.s32.totalorder %v211_v31, %v1772_v30 }
 0x106   : > { %vm878_vm15 = vcmp.eq.s32.totalorder %v212_v34, %v1772_v30  ;;  %vm299_vm0 = vcmp.eq.s32.totalorder %v211_v31, %v1737_v62  ;;  %v803_v9 = vadd.f32 %v739_v5, %v589_v16  ;;  %v952_v27 = vsel %vm876_vm14, %v1731_v60, 0.0 }
 0x107   : > { %1269 = vmatpush1.bf16.msra.mxu0 %v1268_v11  ;;  %v805_v10 = vadd.f32 %v741_v7, %v591_v2  ;;  %v954_v28 = vsel %vm878_vm15, %v1731_v60, 0.0  ;;  %vm301_vm1 = vcmp.eq.s32.totalorder %v212_v34, %v1737_v62  ;;  %v375_v8 = vsel %vm299_vm0, %v1716_v49, 0.0 }
 0x108   : > { %vm448_vm2 = vcmp.eq.s32.totalorder %v211_v31, %v1743_v0  ;;  %vm450_vm3 = vcmp.eq.s32.totalorder %v212_v34, %v1743_v0  ;;  %v1016_v61 = vadd.f32 %v952_v27, %v803_v9  ;;  %v377_v3 = vsel %vm301_vm1, %v1716_v49, 0.0 }
 0x109   : > { %v1018_v6 = vadd.f32 %v954_v28, %v805_v10  ;;  %v524_v40 = vsel %vm448_vm2, %v1722_v53, 0.0  ;;  %v526_v41 = vsel %vm450_vm3, %v1722_v53, 0.0  ;;  %vm662_vm4 = vcmp.eq.s32.totalorder %v211_v31, %v1763_v23 }
 0x10a   : > { %v588_v42 = vadd.f32 %v524_v40, %v375_v8  ;;  %vm664_vm5 = vcmp.eq.s32.totalorder %v212_v34, %v1763_v23  ;;  %v590_v44 = vadd.f32 %v526_v41, %v377_v3  ;;  %v738_v45 = vsel %vm662_vm4, %v1749_v14, 0.0 }
 0x10b   : > { %v1270_v43 = vpack.c.bf16 %v1018_v6, %v1016_v61  ;;  %v740_v46 = vsel %vm664_vm5, %v1749_v14, 0.0  ;;  %vm875_vm6 = vcmp.eq.s32.totalorder %v211_v31, %v1769_v25  ;;  %vm877_vm7 = vcmp.eq.s32.totalorder %v212_v34, %v1769_v25 }
 0x10c   : > { %v802_v47 = vadd.f32 %v738_v45, %v588_v42  ;;  %v213_v21 = vadd.s32 224, %v1644_v1  ;;  %v804_v26 = vadd.f32 %v740_v46, %v590_v44  ;;  %v951_v48 = vsel %vm875_vm6, %v1728_v59, 0.0 }
 0x10d   : > { %1271 = vmatprep.subr.bf16.mxu0 %v1270_v43  ;;  %v953_v36 = vsel %vm877_vm7, %v1728_v59, 0.0  ;;  %v214_v37 = vadd.s32 232, %v1644_v1  ;;  %v215_v10 = vadd.s32 240, %v1644_v1  ;;  %v216_v61 = vadd.s32 248, %v1644_v1 }
 0x10e   : > { %v1015_v50 = vadd.f32 %v951_v48, %v802_v47  ;;  %vm304_vm8 = vcmp.eq.s32.totalorder %v213_v21, %v1740_v63  ;;  %vm453_vm9 = vcmp.eq.s32.totalorder %v213_v21, %v1746_v12  ;;  %vm667_vm10 = vcmp.eq.s32.totalorder %v213_v21, %v1766_v24 }
 0x10f   : > { %v1017_v51 = vadd.f32 %v953_v36, %v804_v26  ;;  %vm306_vm11 = vcmp.eq.s32.totalorder %v214_v37, %v1740_v63  ;;  %v380_v54 = vsel %vm304_vm8, %v1719_v52, 0.0  ;;  %vm455_vm12 = vcmp.eq.s32.totalorder %v214_v37, %v1746_v12 }
 0x110   : > { %v382_v55 = vsel %vm306_vm11, %v1719_v52, 0.0  ;;  %v529_v57 = vsel %vm453_vm9, %v1725_v56, 0.0  ;;  %v531_v58 = vsel %vm455_vm12, %v1725_v56, 0.0  ;;  %vm669_vm13 = vcmp.eq.s32.totalorder %v214_v37, %v1766_v24 }
 0x111   : > { %v1272_v19 = vpack.c.bf16 %v1017_v51, %v1015_v50  ;;  %v593_v20 = vadd.f32 %v529_v57, %v380_v54  ;;  %v595_v13 = vadd.f32 %v531_v58, %v382_v55  ;;  %v743_v22 = vsel %vm667_vm10, %v1752_v15, 0.0  ;;  %v1027_v57 = vld [vmem:[#allocation2] sm:$0xff] }
 0x112   : > { %v745_v31 = vsel %vm669_vm13, %v1752_v15, 0.0  ;;  %vm880_vm14 = vcmp.eq.s32.totalorder %v213_v21, %v1772_v30  ;;  %vm882_vm15 = vcmp.eq.s32.totalorder %v214_v37, %v1772_v30  ;;  %vm303_vm0 = vcmp.eq.s32.totalorder %v213_v21, %v1737_v62 }
 0x113   : > { %1273 = vmatpush1.bf16.msra.mxu0 %v1272_v19  ;;  %v807_v32 = vadd.f32 %v743_v22, %v593_v20  ;;  %v809_v33 = vadd.f32 %v745_v31, %v595_v13  ;;  %v956_v4 = vsel %vm880_vm14, %v1731_v60, 0.0  ;;  %v958_v34 = vsel %vm882_vm15, %v1731_v60, 0.0 }
 0x114   : > { %vm305_vm1 = vcmp.eq.s32.totalorder %v214_v37, %v1737_v62  ;;  %v379_v29 = vsel %vm303_vm0, %v1716_v49, 0.0  ;;  %vm452_vm2 = vcmp.eq.s32.totalorder %v213_v21, %v1743_v0  ;;  %vm454_vm3 = vcmp.eq.s32.totalorder %v214_v37, %v1743_v0 }
 0x115   : > { %v1020_v35 = vadd.f32 %v956_v4, %v807_v32  ;;  %v1022_v17 = vadd.f32 %v958_v34, %v809_v33  ;;  %v381_v18 = vsel %vm305_vm1, %v1716_v49, 0.0  ;;  %v528_v38 = vsel %vm452_vm2, %v1722_v53, 0.0 }
 0x116   : > { %v530_v39 = vsel %vm454_vm3, %v1722_v53, 0.0  ;;  %v592_v11 = vadd.f32 %v528_v38, %v379_v29  ;;  %vm666_vm4 = vcmp.eq.s32.totalorder %v213_v21, %v1763_v23  ;;  %vm668_vm5 = vcmp.eq.s32.totalorder %v214_v37, %v1763_v23 }
 0x117   : > { %v1274_v16 = vpack.c.bf16 %v1022_v17, %v1020_v35  ;;  %v594_v2 = vadd.f32 %v530_v39, %v381_v18  ;;  %v742_v5 = vsel %vm666_vm4, %v1749_v14, 0.0  ;;  %v744_v7 = vsel %vm668_vm5, %v1749_v14, 0.0 }
 0x118   : > { %v806_v9 = vadd.f32 %v742_v5, %v592_v11  ;;  %vm879_vm6 = vcmp.eq.s32.totalorder %v213_v21, %v1769_v25  ;;  %vm881_vm7 = vcmp.eq.s32.totalorder %v214_v37, %v1769_v25  ;;  %vm308_vm8 = vcmp.eq.s32.totalorder %v215_v10, %v1740_v63 }
 0x119   : > { %1275 = vmatprep.subr.bf16.mxu0 %v1274_v16  ;;  %v808_v27 = vadd.f32 %v744_v7, %v594_v2  ;;  %v955_v28 = vsel %vm879_vm6, %v1728_v59, 0.0  ;;  %v957_v8 = vsel %vm881_vm7, %v1728_v59, 0.0  ;;  %vm457_vm9 = vcmp.eq.s32.totalorder %v215_v10, %v1746_v12 }
 0x11a   : > { %v1019_v6 = vadd.f32 %v955_v28, %v806_v9  ;;  %vm671_vm10 = vcmp.eq.s32.totalorder %v215_v10, %v1766_v24  ;;  %vm310_vm11 = vcmp.eq.s32.totalorder %v216_v61, %v1740_v63  ;;  %v384_v40 = vsel %vm308_vm8, %v1719_v52, 0.0 }
 0x11b   : > { %v1021_v3 = vadd.f32 %v957_v8, %v808_v27  ;;  %vm459_vm12 = vcmp.eq.s32.totalorder %v216_v61, %v1746_v12  ;;  %v386_v41 = vsel %vm310_vm11, %v1719_v52, 0.0  ;;  %v533_v42 = vsel %vm457_vm9, %v1725_v56, 0.0 }
 0x11c   : > { %v535_v1 = vsel %vm459_vm12, %v1725_v56, 0.0  ;;  %vm673_vm13 = vcmp.eq.s32.totalorder %v216_v61, %v1766_v24  ;;  %v597_v44 = vadd.f32 %v533_v42, %v384_v40  ;;  %v747_v46 = vsel %vm671_vm10, %v1752_v15, 0.0 }
 0x11d   : > { %v1276_v43 = vpack.c.bf16 %v1021_v3, %v1019_v6  ;;  %v599_v45 = vadd.f32 %v535_v1, %v386_v41  ;;  %v749_v47 = vsel %vm673_vm13, %v1752_v15, 0.0  ;;  %vm884_vm14 = vcmp.eq.s32.totalorder %v215_v10, %v1772_v30 }
 0x11e   : > { %vm886_vm15 = vcmp.eq.s32.totalorder %v216_v61, %v1772_v30  ;;  %vm307_vm0 = vcmp.eq.s32.totalorder %v215_v10, %v1737_v62  ;;  %v811_v52 = vadd.f32 %v747_v46, %v597_v44  ;;  %v960_v56 = vsel %vm884_vm14, %v1731_v60, 0.0 }
 0x11f   : > { %1277 = vmatpush1.bf16.msra.mxu0 %v1276_v43  ;;  %v813_v63 = vadd.f32 %v749_v47, %v599_v45  ;;  %v962_v12 = vsel %vm886_vm15, %v1731_v60, 0.0  ;;  %vm309_vm1 = vcmp.eq.s32.totalorder %v216_v61, %v1737_v62  ;;  %v383_v24 = vsel %vm307_vm0, %v1716_v49, 0.0 }
 0x120   : > { %vm456_vm2 = vcmp.eq.s32.totalorder %v215_v10, %v1743_v0  ;;  %vm458_vm3 = vcmp.eq.s32.totalorder %v216_v61, %v1743_v0  ;;  %v1024_v15 = vadd.f32 %v960_v56, %v811_v52  ;;  %v385_v30 = vsel %vm309_vm1, %v1716_v49, 0.0 }
 0x121   : > { %v1026_v21 = vadd.f32 %v962_v12, %v813_v63  ;;  %v532_v26 = vsel %vm456_vm2, %v1722_v53, 0.0  ;;  %v534_v48 = vsel %vm458_vm3, %v1722_v53, 0.0  ;;  %vm670_vm4 = vcmp.eq.s32.totalorder %v215_v10, %v1763_v23 }
 0x122   : > { %v596_v36 = vadd.f32 %v532_v26, %v383_v24  ;;  %vm672_vm5 = vcmp.eq.s32.totalorder %v216_v61, %v1763_v23  ;;  %v598_v62 = vadd.f32 %v534_v48, %v385_v30  ;;  %v746_v37 = vsel %vm670_vm4, %v1749_v14, 0.0 }
 0x123   : > { %v1278_v60 = vpack.c.bf16 %v1026_v21, %v1024_v15  ;;  %v748_v0 = vsel %vm672_vm5, %v1749_v14, 0.0  ;;  %vm883_vm6 = vcmp.eq.s32.totalorder %v215_v10, %v1769_v25  ;;  %vm885_vm7 = vcmp.eq.s32.totalorder %v216_v61, %v1769_v25 }
 0x124   : > { %v810_v50 = vadd.f32 %v746_v37, %v596_v36  ;;  %v812_v49 = vadd.f32 %v748_v0, %v598_v62  ;;  %v959_v53 = vsel %vm883_vm6, %v1728_v59, 0.0  ;;  %v961_v51 = vsel %vm885_vm7, %v1728_v59, 0.0 }
 0x125   : > { %1279 = vmatprep.subr.bf16.mxu0 %v1278_v60 }
 0x126   : > { %v1023_v23 = vadd.f32 %v959_v53, %v810_v50  ;;  %v1025_v54 = vadd.f32 %v961_v51, %v812_v49 }
 0x128   : > { %v1280_v55 = vpack.c.bf16 %v1025_v54, %v1023_v23 }
 0x12a   : > { %1281 = vmatpush1.bf16.msra.mxu0 %v1280_v55 }
 0x12d   : > { %1094 = vmatmul.mubr.f32.vlgmr.msra.gmra.mrb[0].mxu0 %v1027_v57 }
 0x200   : > { %v1095_v14 = vpop.f32.mrb[0].mxu0 }
 0x201   : > { %1100 = vst [vmem:[%s172_s17] sm:$0xff] %v1095_v14  ;;  %v1097_v59 = vpop.f32.mrb[1].mxu0 }
 0x202   : > { %1101 = vst [vmem:[%s172_s17 + $0x8] sm:$0xff] %v1097_v59 }
 0x203   : > { %1414 = shalt.err (!%p1411_p10)
}
 0x204   : > { %s1415_s6 = scalar_lea.hbm %s2478_s29, 256  ;;  %s1419_s21 = scalar_lea.hbm %s2522_s2, 512 }
 0x205   : > { %p1416_p1 = scmp.ne.s32.totalorder %s2478_s29, %s1415_s6  ;;  %p1420_p3 = scmp.lt.u32.totalorder %s2478_s29, %s2522_s2 }
 0x206   : > { %p1421_p4 = scmp.lt.u32.totalorder %s1419_s21, %s1415_s6  ;;  %p1423_p11 = scmp.lt.u32.totalorder %s1415_s6, %s2478_s29 }
 0x207   : > { %p1417_p2 = pnand %p1416_p1, %p1583_p8 }
 0x208   : > { %p1422_p6 = por %p1421_p4, %p1420_p3 }
 0x209   : > { %p1418_p7 = pneg %p1417_p2 }
 0x20a   : > { %p1424_p9 = por %p1423_p11, %p1422_p6 }
 0x20c   : > { %p1425_p12 = pnand %p1424_p9, %p1418_p7 }
 0x20e   : > { %1428 = shalt.err (!%p1425_p12)
}
 0x20f   : > { %1292 = dma.vmem_to_hbm [thread:$0]  (%p1583_p8), %s2473_s19, 256, %s2478_s29, %s1103_s30  }
 0x210 PF: > { %s1129_s23 = sand.u32 1, %s1459_s9   ;;  %p2541_p13 = scmp.ne.s32.totalorder %s2527_s16, 0 }
 0x211   : > { %p2542_p0 = scmp.ge.s32.totalorder %s1471_s12, 2  ;;  %s1130_s26 = scalar_lea.sflag [#allocation4], %s1129_s23 }
 0x213   : > { %p1303_p5 = pnand %p2542_p0, %p2541_p13 }
 0x215   : > { %1454 = dma.done.wait (!%p1303_p5), %s1130_s26, 256  }
 0x216   : > { %1456 = vsyncadd (!%p1303_p5), %s1130_s26, 4294967040  ;;  %p16_p10 = scmp.ge.s32.totalorder %s1539_s20, 4   ;;  %s2543_s9 = smov %s1463_s10 }
 0x217   : > { %s2544_s10 = smov %s1467_s11  ;;  %s2545_s11 = smov %s1575_s7 }
 0x218   : > { %s2546_s12 = smov %s1539_s20  ;;  %18 = sbr.rel (!%p16_p10) target bundleno = 6 (0x6), region = 79 }
 0x21f   :  { %1135 = vsyncpa [#allocation3], 1 }
 0x220   :  { %1137 = vsyncpa [#allocation3 + $0x1], 1 }
 0x221   :  { %1138 = vsyncpa [#allocation6], 1 }
 0x222   :  { %1140 = vsyncpa [#allocation6 + $0x1], 1 }
 0x223   :  { %1141 = vsyncpa [#allocation4], 1 }
 0x224   :  { %1143 = vsyncpa [#allocation4 + $0x1], 1 }

// kernel: tpu_custom_call.1
= control target key start
LH: loop header
LB: loop body
LE: loop exit
PB: predicated region body
PF: predicated region fallthrough
CT: control target
= control target key end

     0   :  { %7 = vsyncpa [#allocation3], 0  ;;  %s2520_s0 = inlined_call_operand.hbm [shape: f32[8,256], index: 0, kind: input, shape index: {}]   ;;  %s2521_s1 = inlined_call_operand.hbm [shape: f32[2,512], index: 1, kind: input, shape index: {}]   ;;  %s2522_s2 = inlined_call_operand.hbm [shape: f32[8,512], index: 2, kind: output, shape index: {}]  }
   0x1   :  { %8 = vsyncpa [#allocation6], 0 }
   0x2   :  { %10 = vsyncpa [#allocation6 + $0x1], 0 }
   0x3   :  { %11 = vsyncpa [#allocation4], 0 }
   0x4   :  { %13 = vsyncpa [#allocation4 + $0x1], 0  ;;  %s1491_s9 = smov 0   ;;  %s1493_s10 = smov 0  }
   0x5   :  { %s1495_s11 = smov 0   ;;  %s1497_s12 = smov 0  }
   0x6 LB: > { %s1512_s13 = sadd.s32 4294967295, %s1471_s12   ;;  %s1199_s14 = sadd.s32 4294967294, %s1471_s12   ;;  %s1471_s12 = sphi %s1497_s12, %s2546_s12   ;;  %s1467_s11 = sphi %s1495_s11, %s2545_s11   ;;  %s1463_s10 = sphi %s1493_s10, %s2544_s10   ;;  %s1459_s9 = sphi %s1491_s9, %s2543_s9  }
   0x7   : > { %p60_p0 = scmp.ne.s32.totalorder %s1463_s10, %s1459_s9  ;;  %p2523_p1 = scmp.eq.s32.totalorder %s1512_s13, 0 }
   0x8   : > { %p90_p3 = scmp.eq.s32.totalorder %s1199_s14, 1  ;;  %p1200_p5 = scmp.ge.s32.totalorder %s1471_s12, 1 }
   0x9   : > { %p1521_p4 = por %p2523_p1, %p60_p0  ;;  %p97_p7 = scmp.lt.s32.totalorder %s1471_s12, 3 }
   0xa   : > { %p1526_p6 = por %p90_p3, %p60_p0  ;;  %s1473_s18 = smov [#allocation2]  }
   0xb   : > { %s2526_s15 = scalar_select %p1521_p4, 1, 0 }
   0xc   : > { %s2527_s16 = scalar_select %p1526_p6, 1, 0 }
   0xd   : > { %p1531_p8 = pnand %p1200_p5, %p97_p7  ;;  %s110_s19 = sshll.u32 %s1473_s18, 4  ;;  %s111_s19 = int_to_ptr.vmem [resolvable:$true] %s110_s19 }
   0xe   : > { %s1539_s20 = sadd.s32 1, %s1471_s12   ;;  %s47_s24 = sadd.s32 1, %s1467_s11 }
   0xf   : > { %s2528_s17 = scalar_select %p1531_p8, 1, 0 }
  0x10   : > { %p1294_p10 = pneg %p1531_p8  ;;  %s44_s22 = ssub.s32 %s1471_s12, %s1539_s20 }
  0x11   : > { %p1549_p12 = scmp.eq.s32.totalorder %s44_s22, 0  ;;  %s1343_s27 = scalar_lea.hbm %s2520_s0, 256 }
  0x12   : > { %p1543_p11 = pnand %p1294_p10, %p2523_p1  ;;  %p1344_p0 = scmp.ne.s32.totalorder %s2520_s0, %s1343_s27 }
  0x13   : > { %s2530_s23 = scalar_select %p1549_p12, 1, 0 }
  0x14   : > { %p1345_p3 = pneg %p1543_p11  ;;  %p1350_p10 = scmp.lt.u32.totalorder %s1343_s27, %s2520_s0 }
  0x16   : > { %p1346_p5 = pnand %p1345_p3, %p1344_p0 }
  0x18   : > { %p1347_p7 = pneg %p1346_p5 }
  0x1a   : > { %p1352_p9 = pnand %p1350_p10, %p1347_p7 }
  0x1c   : > { %1355 = shalt.err (!%p1352_p9)
}
  0x1d   : > { %s1356_s4 = scalar_lea.vmem %s111_s19, 256  ;;  %p1364_p6 = scmp.lt.s32.totalorder %s111_s19, %s111_s19 }
  0x1e   : > { %p1357_p1 = scmp.ne.s32.totalorder %s111_s19, %s1356_s4  ;;  %p1365_p4 = scmp.lt.s32.totalorder %s1356_s4, %s1356_s4 }
  0x20   : > { %p1359_p2 = pnand %p1357_p1, %p1345_p3  ;;  %p1366_p8 = por %p1365_p4, %p1364_p6 }
  0x22   : > { %p1360_p13 = pneg %p1359_p2 }
  0x24   : > { %p1367_p12 = pnand %p1366_p8, %p1360_p13 }
  0x26   : > { %1370 = shalt.err (!%p1367_p12)
}
  0x27   : > { %1297 = dma.hbm_to_vmem [thread:$0]  (!%p1543_p11), %s2520_s0, 256, %s111_s19, [#allocation3]  }
  0x28   : > { %p2531_p1 = scmp.ne.s32.totalorder %s2530_s23, 0  ;;  %p55_p2 = scmp.eq.s32.totalorder %s1471_s12, 0 }
  0x29   : > { %p2532_p4 = scmp.ne.s32.totalorder %s1467_s11, %s1463_s10  ;;  %p2533_p6 = scmp.eq.s32.totalorder %s1512_s13, 1 }
  0x2a   : > { %s1575_s7 = scalar_select %p2531_p1, %s1467_s11, %s47_s24  }
  0x2b   : > { %p1583_p8 = por %p2533_p6, %p2532_p4  ;;  %p1307_p9 = scmp.lt.s32.totalorder %s1471_s12, 2 }
  0x2c   : > { %s121_s14 = sand.u32 1, %s1467_s11   ;;  %p2535_p12 = pmov %p2532_p4 }
  0x2d   : > { %s1203_s18 = sshll.u32 %s121_s14, 2  ;;  %s1216_s21 = sshll.u32 %s1471_s12, 6 }
  0x2e   : > { %p56_p13 = por %p55_p2, %p2535_p12  ;;  %s1596_s19 = scalar_lea.hbm %s2521_s1, %s1216_s21 }
  0x2f   : > { %s125_s23 = scalar_lea.vmem [#allocation5], %s1203_s18  ;;  %s122_s27 = scalar_lea.sflag [#allocation6], %s121_s14 }
  0x30   : > { %s133_s24 = sshll.u32 %s125_s23, 4  ;;  %p1598_p11 = pnand %p1307_p9, %p56_p13  ;;  %s1602_s24 = int_to_ptr.vmem [resolvable:$true] %s133_s24 }
  0x31   : > { %s1371_s28 = scalar_lea.hbm %s1596_s19, 64  ;;  %s1376_s3 = scalar_lea.hbm %s2521_s1, 128 }
  0x32   : > { %p1372_p0 = scmp.ne.s32.totalorder %s1596_s19, %s1371_s28  ;;  %p1373_p3 = pneg %p1598_p11 }
  0x33   : > { %p1377_p10 = scmp.lt.u32.totalorder %s1596_s19, %s2521_s1  ;;  %p1378_p1 = scmp.lt.u32.totalorder %s1376_s3, %s1371_s28 }
  0x34   : > { %p1374_p5 = pnand %p1373_p3, %p1372_p0  ;;  %p1380_p4 = scmp.lt.u32.totalorder %s1371_s28, %s1596_s19 }
  0x35   : > { %p1379_p2 = por %p1378_p1, %p1377_p10 }
  0x36   : > { %p1375_p7 = pneg %p1374_p5 }
  0x37   : > { %p1381_p6 = por %p1380_p4, %p1379_p2 }
  0x39   : > { %p1382_p9 = pnand %p1381_p6, %p1375_p7 }
  0x3b   : > { %1385 = shalt.err (!%p1382_p9)
}
  0x3c   : > { %s1386_s6 = scalar_lea.vmem %s1602_s24, 64  ;;  %s1474_s14 = smov [#allocation5]  }
  0x3d   : > { %p1387_p12 = scmp.ne.s32.totalorder %s1602_s24, %s1386_s6  ;;  %s1391_s18 = sshll.u32 %s1474_s14, 4  ;;  %s1392_s18 = int_to_ptr.vmem [resolvable:$false] %s1391_s18 }
  0x3e   : > { %s1393_s21 = scalar_lea.vmem %s1392_s18, 128  ;;  %p1394_p5 = scmp.lt.s32.totalorder %s1602_s24, %s1392_s18 }
  0x3f   : > { %p1389_p13 = pnand %p1387_p12, %p1373_p3  ;;  %p1395_p10 = scmp.lt.s32.totalorder %s1393_s21, %s1386_s6 }
  0x41   : > { %p1390_p0 = pneg %p1389_p13  ;;  %p1396_p1 = por %p1395_p10, %p1394_p5 }
  0x43   : > { %p1397_p2 = pnand %p1396_p1, %p1390_p0 }
  0x45   : > { %1400 = shalt.err (!%p1397_p2)
}
  0x46   : > { %1301 = dma.hbm_to_vmem [thread:$0]  (!%p1598_p11), %s1596_s19, 64, %s1602_s24, %s122_s27  }
  0x47   : > { %p2537_p7 = scmp.ne.s32.totalorder %s2528_s17, 0 }
  0x48   : > { %p2538_p3 = scmp.eq.s32.totalorder (!%p2537_p7), %s1512_s13, 0 }
  0x49   : > { %142 = sbr.rel (%p2537_p7) target bundleno = 528 (0x210), region = 28 }
  0x50   : > { %1446 = dma.done.wait (%p2538_p3), [#allocation3], 256   ;;  %p2539_p4 = pmov %p2538_p3 }
  0x51   : > { %s1636_s22 = sand.u32 1, %s1463_s10   ;;  %p2540_p6 = scmp.ne.s32.totalorder %s2526_s15, 0 }
  0x52   : > { %1448 = vsyncadd (%p2539_p4), [#allocation3], 4294967040  ;;  %s1208_s25 = sshll.u32 %s1636_s22, 2  ;;  %s149_s23 = scalar_lea.sflag [#allocation6], %s1636_s22 }
  0x53   : > { %s152_s26 = scalar_lea.vmem [#allocation5], %s1208_s25 }
  0x54   : > { %1450 = dma.done.wait (%p2540_p6), %s149_s23, 64  }
  0x55   : > { %1452 = vsyncadd (%p2540_p6), %s149_s23, 4294967232  ;;  %v184_v0 = vlaneseq  ;;  %v175_v12 = vld [vmem:[%s152_s26] ss:$2 sm:$0x3]  ;;  %s1209_s15 = sshll.u32 %s1636_s22, 4  ;;  %s1217_s24 = sshll.u32 %s1512_s13, 8 }
  0x56   : > { %v1210_v13 = vld [vmem:[%s152_s26 + $0x1] ss:$2 sm:$0x3]  ;;  %v176_v14 = vfloor.f32 %v175_v12  ;;  %s172_s17 = scalar_lea.vmem [#allocation7], %s1209_s15  ;;  %s2478_s29 = scalar_lea.hbm %s2522_s2, %s1217_s24 }
  0x57   : > { %v1644_v1 = vshrl.u32 %v184_v0, 7  ;;  %v181_v15 = vfloor.f32 %v1210_v13  ;;  %s1117_s19 = sshll.u32 %s172_s17, 4  ;;  %s1103_s30 = scalar_lea.sflag [#allocation4], %s1636_s22  ;;  %s2473_s19 = int_to_ptr.vmem [resolvable:$true] %s1117_s19 }
  0x58   : > { %v1282_v22 = vtrunc.f32 %v176_v14  ;;  %v178_v23 = vsub.f32 %v175_v12, %v176_v14  ;;  %s1401_s3 = scalar_lea.vmem %s2473_s19, 256  ;;  %s1475_s13 = smov [#allocation7]  }
  0x59   : > { %v1647_v2 = vsub.s32 0, %v1644_v1  ;;  %v1650_v3 = vsub.s32 1, %v1644_v1  ;;  %v1653_v4 = vadd.s32 8, %v1644_v1  ;;  %v1656_v5 = vadd.s32 16, %v1644_v1  ;;  %p1402_p11 = scmp.ne.s32.totalorder %s2473_s19, %s1401_s3  ;;  %s1405_s4 = sshll.u32 %s1475_s13, 4  ;;  %s1406_s4 = int_to_ptr.vmem [resolvable:$false] %s1405_s4 }
  0x5a   : > { %v1659_v6 = vadd.s32 24, %v1644_v1  ;;  %v1662_v7 = vadd.s32 32, %v1644_v1  ;;  %v1665_v8 = vadd.s32 40, %v1644_v1  ;;  %v1668_v9 = vadd.s32 48, %v1644_v1  ;;  %s1407_s5 = scalar_lea.vmem %s1406_s4, 512  ;;  %p1408_p13 = scmp.lt.s32.totalorder %s2473_s19, %s1406_s4 }
  0x5b   : > { %v1671_v10 = vadd.s32 56, %v1644_v1  ;;  %v1674_v11 = vadd.s32 64, %v1644_v1  ;;  %v1677_v16 = vadd.s32 72, %v1644_v1  ;;  %v1680_v17 = vadd.s32 80, %v1644_v1  ;;  %p1403_p9 = pnand %p1402_p11, %p1583_p8  ;;  %p1409_p0 = scmp.lt.s32.totalorder %s1407_s5, %s1401_s3 }
  0x5c   : > { %v1683_v18 = vadd.s32 88, %v1644_v1  ;;  %v1686_v19 = vadd.s32 96, %v1644_v1  ;;  %v1689_v20 = vadd.s32 104, %v1644_v1  ;;  %v1692_v21 = vadd.s32 112, %v1644_v1 }
  0x5d   : > { %v1284_v24 = vtrunc.f32 %v181_v15  ;;  %v183_v25 = vsub.f32 %v1210_v13, %v181_v15  ;;  %v1695_v26 = vadd.s32 120, %v1644_v1  ;;  %v1698_v27 = vadd.s32 128, %v1644_v1  ;;  %p1404_p12 = pneg %p1403_p9  ;;  %p1410_p5 = por %p1409_p0, %p1408_p13 }
  0x5e   : > { %v1701_v28 = vadd.s32 136, %v1644_v1  ;;  %v1704_v29 = vadd.s32 144, %v1644_v1  ;;  %v1283_v30 = vcvt.f32.s32 %v1282_v22  ;;  %v235_v32 = vsub.f32 1.0, %v178_v23 }
  0x5f   : > { %v1285_v31 = vcvt.f32.s32 %v1284_v24  ;;  %v236_v33 = vsub.f32 1.0, %v183_v25  ;;  %v887_v34 = vmul.f32 %v183_v25, %v178_v23  ;;  %v1707_v35 = vadd.s32 152, %v1644_v1  ;;  %p1411_p10 = pnand %p1410_p5, %p1404_p12 }
  0x60   : > { %v1710_v36 = vadd.s32 160, %v1644_v1  ;;  %v1713_v37 = vadd.s32 168, %v1644_v1  ;;  %vm217_vm0 = vcmp.gt.s32.totalorder %v1283_v30, 0  ;;  %v221_v38 = vadd.s32 1, %v1283_v30 }
  0x61   : > { %vm226_vm1 = vcmp.gt.s32.totalorder %v1285_v31, 0  ;;  %v230_v39 = vadd.s32 1, %v1285_v31  ;;  %v218_v40 = vsel %vm217_vm0, %v1283_v30, 0  ;;  %v311_v42 = vmul.f32 %v236_v33, %v235_v32 }
  0x62   : > { %v227_v41 = vsel %vm226_vm1, %v1285_v31, 0  ;;  %v460_v43 = vmul.f32 %v235_v32, %v183_v25  ;;  %vm219_vm2 = vcmp.lt.s32.totalorder %v218_v40, 15  ;;  %vm222_vm3 = vcmp.gt.s32.totalorder %v221_v38, 0 }
  0x63   : > { %vm228_vm4 = vcmp.lt.s32.totalorder %v227_v41, 15  ;;  %vm231_vm5 = vcmp.gt.s32.totalorder %v230_v39, 0  ;;  %v220_v44 = vsel %vm219_vm2, %v218_v40, 15  ;;  %v223_v45 = vsel %vm222_vm3, %v221_v38, 0 }
  0x64   : > { %v229_v46 = vsel %vm228_vm4, %v227_v41, 15  ;;  %v232_v47 = vsel %vm231_vm5, %v230_v39, 0  ;;  %vm224_vm6 = vcmp.lt.s32.totalorder %v223_v45, 15  ;;  %v237_v48 = vmul.u32 16, %v220_v44 }
  0x65   : > { %vm233_vm7 = vcmp.lt.s32.totalorder %v232_v47, 15  ;;  %v1716_v49 = vrot.slane %v311_v42, %v1647_v2  ;;  %v225_v50 = vsel %vm224_vm6, %v223_v45, 15  ;;  %v1719_v52 = vrot.slane %v311_v42, %v1650_v3 }
  0x66   : > { %v234_v51 = vsel %vm233_vm7, %v232_v47, 15  ;;  %v1722_v53 = vrot.slane %v460_v43, %v1647_v2  ;;  %v238_v54 = vadd.s32 %v237_v48, %v229_v46  ;;  %v1725_v56 = vrot.slane %v460_v43, %v1650_v3 }
  0x67   : > { %v387_v55 = vadd.s32 %v237_v48, %v234_v51  ;;  %v600_v57 = vmul.u32 16, %v225_v50  ;;  %v674_v58 = vmul.f32 %v236_v33, %v178_v23  ;;  %v1728_v59 = vrot.slane %v887_v34, %v1647_v2 }
  0x68   : > { %v1731_v60 = vrot.slane %v887_v34, %v1650_v3  ;;  %v1734_v61 = vadd.s32 176, %v1644_v1  ;;  %v1737_v62 = vrot.slane %v238_v54, %v1647_v2  ;;  %v1740_v63 = vrot.slane %v238_v54, %v1650_v3 }
  0x69   : > { %v1743_v0 = vrot.slane %v387_v55, %v1647_v2  ;;  %v1746_v12 = vrot.slane %v387_v55, %v1650_v3  ;;  %v601_v13 = vadd.s32 %v600_v57, %v229_v46  ;;  %v1749_v14 = vrot.slane %v674_v58, %v1647_v2 }
  0x6a   : > { %v1752_v15 = vrot.slane %v674_v58, %v1650_v3  ;;  %v814_v22 = vadd.s32 %v600_v57, %v234_v51  ;;  %vm248_vm8 = vcmp.eq.s32.totalorder %v1644_v1, %v1740_v63  ;;  %vm250_vm9 = vcmp.eq.s32.totalorder %v1653_v4, %v1740_v63 }
  0x6b   : > { %vm397_vm10 = vcmp.eq.s32.totalorder %v1644_v1, %v1746_v12  ;;  %vm399_vm11 = vcmp.eq.s32.totalorder %v1653_v4, %v1746_v12  ;;  %v1763_v23 = vrot.slane %v601_v13, %v1647_v2  ;;  %v1766_v24 = vrot.slane %v601_v13, %v1650_v3 }
  0x6c   : > { %v1769_v25 = vrot.slane %v814_v22, %v1647_v2  ;;  %v1772_v30 = vrot.slane %v814_v22, %v1650_v3  ;;  %v324_v31 = vsel %vm248_vm8, %v1719_v52, 0.0  ;;  %v326_v32 = vsel %vm250_vm9, %v1719_v52, 0.0 }
  0x6d   : > { %v473_v33 = vsel %vm397_vm10, %v1725_v56, 0.0  ;;  %v475_v34 = vsel %vm399_vm11, %v1725_v56, 0.0  ;;  %vm611_vm12 = vcmp.eq.s32.totalorder %v1644_v1, %v1766_v24  ;;  %vm613_vm13 = vcmp.eq.s32.totalorder %v1653_v4, %v1766_v24 }
  0x6e   : > { %v537_v38 = vadd.f32 %v473_v33, %v324_v31  ;;  %v539_v39 = vadd.f32 %v475_v34, %v326_v32  ;;  %v687_v2 = vsel %vm611_vm12, %v1752_v15, 0.0  ;;  %v689_v3 = vsel %vm613_vm13, %v1752_v15, 0.0 }
  0x6f   : > { %vm824_vm14 = vcmp.eq.s32.totalorder %v1644_v1, %v1772_v30  ;;  %vm826_vm15 = vcmp.eq.s32.totalorder %v1653_v4, %v1772_v30  ;;  %vm247_vm0 = vcmp.eq.s32.totalorder %v1644_v1, %v1737_v62  ;;  %vm249_vm1 = vcmp.eq.s32.totalorder %v1653_v4, %v1737_v62 }
  0x70   : > { %v751_v40 = vadd.f32 %v687_v2, %v537_v38  ;;  %v753_v41 = vadd.f32 %v689_v3, %v539_v39  ;;  %v900_v42 = vsel %vm824_vm14, %v1731_v60, 0.0  ;;  %v902_v43 = vsel %vm826_vm15, %v1731_v60, 0.0 }
  0x71   : > { %vm396_vm2 = vcmp.eq.s32.totalorder %v1644_v1, %v1743_v0  ;;  %vm398_vm3 = vcmp.eq.s32.totalorder %v1653_v4, %v1743_v0  ;;  %v323_v46 = vsel %vm247_vm0, %v1716_v49, 0.0  ;;  %v325_v47 = vsel %vm249_vm1, %v1716_v49, 0.0 }
  0x72   : > { %v964_v44 = vadd.f32 %v900_v42, %v751_v40  ;;  %v966_v45 = vadd.f32 %v902_v43, %v753_v41  ;;  %v472_v48 = vsel %vm396_vm2, %v1722_v53, 0.0  ;;  %v474_v50 = vsel %vm398_vm3, %v1722_v53, 0.0 }
  0x73   : > { %vm610_vm4 = vcmp.eq.s32.totalorder %v1644_v1, %v1763_v23  ;;  %vm612_vm5 = vcmp.eq.s32.totalorder %v1653_v4, %v1763_v23  ;;  %v536_v54 = vadd.f32 %v472_v48, %v323_v46  ;;  %v538_v55 = vadd.f32 %v474_v50, %v325_v47 }
  0x74   : > { %v1218_v51 = vpack.c.bf16 %v966_v45, %v964_v44  ;;  %v686_v57 = vsel %vm610_vm4, %v1749_v14, 0.0  ;;  %v688_v58 = vsel %vm612_vm5, %v1749_v14, 0.0  ;;  %vm823_vm6 = vcmp.eq.s32.totalorder %v1644_v1, %v1769_v25 }
  0x75   : > { %vm825_vm7 = vcmp.eq.s32.totalorder %v1653_v4, %v1769_v25  ;;  %vm252_vm8 = vcmp.eq.s32.totalorder %v1656_v5, %v1740_v63  ;;  %v750_v13 = vadd.f32 %v686_v57, %v536_v54  ;;  %v752_v22 = vadd.f32 %v688_v58, %v538_v55 }
  0x76   : > { %1219 = vmatprep.subr.bf16.mxu0 %v1218_v51  ;;  %v899_v31 = vsel %vm823_vm6, %v1728_v59, 0.0  ;;  %v901_v32 = vsel %vm825_vm7, %v1728_v59, 0.0  ;;  %vm254_vm9 = vcmp.eq.s32.totalorder %v1659_v6, %v1740_v63  ;;  %v328_v33 = vsel %vm252_vm8, %v1719_v52, 0.0 }
  0x77   : > { %vm401_vm10 = vcmp.eq.s32.totalorder %v1656_v5, %v1746_v12  ;;  %vm403_vm11 = vcmp.eq.s32.totalorder %v1659_v6, %v1746_v12  ;;  %v963_v4 = vadd.f32 %v899_v31, %v750_v13  ;;  %v965_v34 = vadd.f32 %v901_v32, %v752_v22 }
  0x78   : > { %v330_v38 = vsel %vm254_vm9, %v1719_v52, 0.0  ;;  %v477_v39 = vsel %vm401_vm10, %v1725_v56, 0.0  ;;  %v479_v2 = vsel %vm403_vm11, %v1725_v56, 0.0  ;;  %vm615_vm12 = vcmp.eq.s32.totalorder %v1656_v5, %v1766_v24 }
  0x79   : > { %v541_v3 = vadd.f32 %v477_v39, %v328_v33  ;;  %vm617_vm13 = vcmp.eq.s32.totalorder %v1659_v6, %v1766_v24  ;;  %v1220_v40 = vpack.c.bf16 %v965_v34, %v963_v4  ;;  %v543_v41 = vadd.f32 %v479_v2, %v330_v38 }
  0x7a   : > { %v691_v42 = vsel %vm615_vm12, %v1752_v15, 0.0  ;;  %v693_v43 = vsel %vm617_vm13, %v1752_v15, 0.0  ;;  %vm828_vm14 = vcmp.eq.s32.totalorder %v1656_v5, %v1772_v30  ;;  %vm830_vm15 = vcmp.eq.s32.totalorder %v1659_v6, %v1772_v30 }
  0x7b   : > { %v755_v44 = vadd.f32 %v691_v42, %v541_v3  ;;  %vm251_vm0 = vcmp.eq.s32.totalorder %v1656_v5, %v1737_v62  ;;  %1221 = vmatpush1.bf16.msra.mxu0 %v1220_v40  ;;  %v757_v45 = vadd.f32 %v693_v43, %v543_v41  ;;  %v904_v46 = vsel %vm828_vm14, %v1731_v60, 0.0 }
  0x7c   : > { %v906_v47 = vsel %vm830_vm15, %v1731_v60, 0.0  ;;  %vm253_vm1 = vcmp.eq.s32.totalorder %v1659_v6, %v1737_v62  ;;  %v327_v50 = vsel %vm251_vm0, %v1716_v49, 0.0  ;;  %vm400_vm2 = vcmp.eq.s32.totalorder %v1656_v5, %v1743_v0 }
  0x7d   : > { %v968_v48 = vadd.f32 %v904_v46, %v755_v44  ;;  %v329_v51 = vsel %vm253_vm1, %v1716_v49, 0.0  ;;  %v970_v54 = vadd.f32 %v906_v47, %v757_v45  ;;  %vm402_vm3 = vcmp.eq.s32.totalorder %v1659_v6, %v1743_v0 }
  0x7e   : > { %v476_v55 = vsel %vm400_vm2, %v1722_v53, 0.0  ;;  %vm614_vm4 = vcmp.eq.s32.totalorder %v1656_v5, %v1763_v23  ;;  %v478_v57 = vsel %vm402_vm3, %v1722_v53, 0.0  ;;  %vm616_vm5 = vcmp.eq.s32.totalorder %v1659_v6, %v1763_v23 }
  0x7f   : > { %v540_v58 = vadd.f32 %v476_v55, %v327_v50  ;;  %v690_v13 = vsel %vm614_vm4, %v1749_v14, 0.0  ;;  %v1222_v22 = vpack.c.bf16 %v970_v54, %v968_v48  ;;  %v542_v31 = vadd.f32 %v478_v57, %v329_v51 }
  0x80   : > { %v692_v32 = vsel %vm616_vm5, %v1749_v14, 0.0  ;;  %vm827_vm6 = vcmp.eq.s32.totalorder %v1656_v5, %v1769_v25  ;;  %vm829_vm7 = vcmp.eq.s32.totalorder %v1659_v6, %v1769_v25  ;;  %vm256_vm8 = vcmp.eq.s32.totalorder %v1662_v7, %v1740_v63 }
  0x81   : > { %v754_v33 = vadd.f32 %v690_v13, %v540_v58  ;;  %v903_v4 = vsel %vm827_vm6, %v1728_v59, 0.0  ;;  %1223 = vmatprep.subr.bf16.mxu0 %v1222_v22  ;;  %v756_v34 = vadd.f32 %v692_v32, %v542_v31  ;;  %v905_v38 = vsel %vm829_vm7, %v1728_v59, 0.0 }
  0x82   : > { %vm258_vm9 = vcmp.eq.s32.totalorder %v1665_v8, %v1740_v63  ;;  %v332_v39 = vsel %vm256_vm8, %v1719_v52, 0.0  ;;  %vm405_vm10 = vcmp.eq.s32.totalorder %v1662_v7, %v1746_v12  ;;  %vm407_vm11 = vcmp.eq.s32.totalorder %v1665_v8, %v1746_v12 }
  0x83   : > { %v967_v2 = vadd.f32 %v903_v4, %v754_v33  ;;  %v334_v5 = vsel %vm258_vm9, %v1719_v52, 0.0  ;;  %v969_v6 = vadd.f32 %v905_v38, %v756_v34  ;;  %v481_v3 = vsel %vm405_vm10, %v1725_v56, 0.0 }
  0x84   : > { %v483_v40 = vsel %vm407_vm11, %v1725_v56, 0.0  ;;  %vm619_vm12 = vcmp.eq.s32.totalorder %v1662_v7, %v1766_v24  ;;  %v545_v41 = vadd.f32 %v481_v3, %v332_v39  ;;  %vm621_vm13 = vcmp.eq.s32.totalorder %v1665_v8, %v1766_v24 }
  0x85   : > { %v547_v42 = vadd.f32 %v483_v40, %v334_v5  ;;  %v695_v43 = vsel %vm619_vm12, %v1752_v15, 0.0  ;;  %v1224_v44 = vpack.c.bf16 %v969_v6, %v967_v2  ;;  %v697_v45 = vsel %vm621_vm13, %v1752_v15, 0.0 }
  0x86   : > { %vm832_vm14 = vcmp.eq.s32.totalorder %v1662_v7, %v1772_v30  ;;  %vm834_vm15 = vcmp.eq.s32.totalorder %v1665_v8, %v1772_v30  ;;  %v759_v46 = vadd.f32 %v695_v43, %v545_v41  ;;  %vm255_vm0 = vcmp.eq.s32.totalorder %v1662_v7, %v1737_v62 }
  0x87   : > { %v761_v47 = vadd.f32 %v697_v45, %v547_v42  ;;  %v908_v48 = vsel %vm832_vm14, %v1731_v60, 0.0  ;;  %v910_v50 = vsel %vm834_vm15, %v1731_v60, 0.0  ;;  %1225 = vmatpush1.bf16.msra.mxu0 %v1224_v44  ;;  %vm257_vm1 = vcmp.eq.s32.totalorder %v1665_v8, %v1737_v62 }
  0x88   : > { %vm404_vm2 = vcmp.eq.s32.totalorder %v1662_v7, %v1743_v0  ;;  %vm406_vm3 = vcmp.eq.s32.totalorder %v1665_v8, %v1743_v0  ;;  %v972_v51 = vadd.f32 %v908_v48, %v759_v46  ;;  %v331_v55 = vsel %vm255_vm0, %v1716_v49, 0.0 }
  0x89   : > { %v974_v54 = vadd.f32 %v910_v50, %v761_v47  ;;  %v333_v57 = vsel %vm257_vm1, %v1716_v49, 0.0  ;;  %v480_v58 = vsel %vm404_vm2, %v1722_v53, 0.0  ;;  %v482_v13 = vsel %vm406_vm3, %v1722_v53, 0.0 }
  0x8a   : > { %vm618_vm4 = vcmp.eq.s32.totalorder %v1662_v7, %v1763_v23  ;;  %vm620_vm5 = vcmp.eq.s32.totalorder %v1665_v8, %v1763_v23  ;;  %v544_v31 = vadd.f32 %v480_v58, %v331_v55  ;;  %v546_v32 = vadd.f32 %v482_v13, %v333_v57 }
  0x8b   : > { %v1226_v22 = vpack.c.bf16 %v974_v54, %v972_v51  ;;  %v694_v33 = vsel %vm618_vm4, %v1749_v14, 0.0  ;;  %v696_v4 = vsel %vm620_vm5, %v1749_v14, 0.0  ;;  %vm831_vm6 = vcmp.eq.s32.totalorder %v1662_v7, %v1769_v25 }
  0x8c   : > { %vm833_vm7 = vcmp.eq.s32.totalorder %v1665_v8, %v1769_v25  ;;  %vm260_vm8 = vcmp.eq.s32.totalorder %v1668_v9, %v1740_v63  ;;  %v758_v34 = vadd.f32 %v694_v33, %v544_v31  ;;  %v760_v38 = vadd.f32 %v696_v4, %v546_v32 }
  0x8d   : > { %1227 = vmatprep.subr.bf16.mxu0 %v1226_v22  ;;  %v907_v39 = vsel %vm831_vm6, %v1728_v59, 0.0  ;;  %v909_v2 = vsel %vm833_vm7, %v1728_v59, 0.0  ;;  %vm262_vm9 = vcmp.eq.s32.totalorder %v1671_v10, %v1740_v63  ;;  %v336_v5 = vsel %vm260_vm8, %v1719_v52, 0.0 }
  0x8e   : > { %vm409_vm10 = vcmp.eq.s32.totalorder %v1668_v9, %v1746_v12  ;;  %vm411_vm11 = vcmp.eq.s32.totalorder %v1671_v10, %v1746_v12  ;;  %v971_v7 = vadd.f32 %v907_v39, %v758_v34  ;;  %v973_v8 = vadd.f32 %v909_v2, %v760_v38 }
  0x8f   : > { %v338_v6 = vsel %vm262_vm9, %v1719_v52, 0.0  ;;  %v485_v3 = vsel %vm409_vm10, %v1725_v56, 0.0  ;;  %v487_v40 = vsel %vm411_vm11, %v1725_v56, 0.0  ;;  %vm623_vm12 = vcmp.eq.s32.totalorder %v1668_v9, %v1766_v24 }
  0x90   : > { %v549_v41 = vadd.f32 %v485_v3, %v336_v5  ;;  %vm625_vm13 = vcmp.eq.s32.totalorder %v1671_v10, %v1766_v24  ;;  %v1228_v42 = vpack.c.bf16 %v973_v8, %v971_v7  ;;  %v551_v43 = vadd.f32 %v487_v40, %v338_v6 }
  0x91   : > { %v699_v44 = vsel %vm623_vm12, %v1752_v15, 0.0  ;;  %v701_v45 = vsel %vm625_vm13, %v1752_v15, 0.0  ;;  %vm836_vm14 = vcmp.eq.s32.totalorder %v1668_v9, %v1772_v30  ;;  %vm838_vm15 = vcmp.eq.s32.totalorder %v1671_v10, %v1772_v30 }
  0x92   : > { %v763_v46 = vadd.f32 %v699_v44, %v549_v41  ;;  %vm259_vm0 = vcmp.eq.s32.totalorder %v1668_v9, %v1737_v62  ;;  %1229 = vmatpush1.bf16.msra.mxu0 %v1228_v42  ;;  %v765_v47 = vadd.f32 %v701_v45, %v551_v43  ;;  %v912_v48 = vsel %vm836_vm14, %v1731_v60, 0.0 }
  0x93   : > { %v914_v50 = vsel %vm838_vm15, %v1731_v60, 0.0  ;;  %vm261_vm1 = vcmp.eq.s32.totalorder %v1671_v10, %v1737_v62  ;;  %v335_v54 = vsel %vm259_vm0, %v1716_v49, 0.0  ;;  %vm408_vm2 = vcmp.eq.s32.totalorder %v1668_v9, %v1743_v0 }
  0x94   : > { %v976_v51 = vadd.f32 %v912_v48, %v763_v46  ;;  %v337_v55 = vsel %vm261_vm1, %v1716_v49, 0.0  ;;  %v978_v57 = vadd.f32 %v914_v50, %v765_v47  ;;  %vm410_vm3 = vcmp.eq.s32.totalorder %v1671_v10, %v1743_v0 }
  0x95   : > { %v484_v58 = vsel %vm408_vm2, %v1722_v53, 0.0  ;;  %vm622_vm4 = vcmp.eq.s32.totalorder %v1668_v9, %v1763_v23  ;;  %v486_v13 = vsel %vm410_vm3, %v1722_v53, 0.0  ;;  %vm624_vm5 = vcmp.eq.s32.totalorder %v1671_v10, %v1763_v23 }
  0x96   : > { %v548_v22 = vadd.f32 %v484_v58, %v335_v54  ;;  %v698_v31 = vsel %vm622_vm4, %v1749_v14, 0.0  ;;  %v1230_v32 = vpack.c.bf16 %v978_v57, %v976_v51  ;;  %v550_v33 = vadd.f32 %v486_v13, %v337_v55 }
  0x97   : > { %v700_v4 = vsel %vm624_vm5, %v1749_v14, 0.0  ;;  %vm835_vm6 = vcmp.eq.s32.totalorder %v1668_v9, %v1769_v25  ;;  %vm837_vm7 = vcmp.eq.s32.totalorder %v1671_v10, %v1769_v25  ;;  %vm264_vm8 = vcmp.eq.s32.totalorder %v1674_v11, %v1740_v63 }
  0x98   : > { %v762_v34 = vadd.f32 %v698_v31, %v548_v22  ;;  %v911_v38 = vsel %vm835_vm6, %v1728_v59, 0.0  ;;  %1231 = vmatprep.subr.bf16.mxu0 %v1230_v32  ;;  %v764_v39 = vadd.f32 %v700_v4, %v550_v33  ;;  %v913_v2 = vsel %vm837_vm7, %v1728_v59, 0.0 }
  0x99   : > { %vm266_vm9 = vcmp.eq.s32.totalorder %v1677_v16, %v1740_v63  ;;  %v340_v5 = vsel %vm264_vm8, %v1719_v52, 0.0  ;;  %vm413_vm10 = vcmp.eq.s32.totalorder %v1674_v11, %v1746_v12  ;;  %vm415_vm11 = vcmp.eq.s32.totalorder %v1677_v16, %v1746_v12 }
  0x9a   : > { %v975_v7 = vadd.f32 %v911_v38, %v762_v34  ;;  %v342_v9 = vsel %vm266_vm9, %v1719_v52, 0.0  ;;  %v977_v10 = vadd.f32 %v913_v2, %v764_v39  ;;  %v489_v8 = vsel %vm413_vm10, %v1725_v56, 0.0 }
  0x9b   : > { %v491_v6 = vsel %vm415_vm11, %v1725_v56, 0.0  ;;  %vm627_vm12 = vcmp.eq.s32.totalorder %v1674_v11, %v1766_v24  ;;  %v553_v3 = vadd.f32 %v489_v8, %v340_v5  ;;  %vm629_vm13 = vcmp.eq.s32.totalorder %v1677_v16, %v1766_v24 }
  0x9c   : > { %v555_v40 = vadd.f32 %v491_v6, %v342_v9  ;;  %v703_v41 = vsel %vm627_vm12, %v1752_v15, 0.0  ;;  %v1232_v42 = vpack.c.bf16 %v977_v10, %v975_v7  ;;  %v705_v43 = vsel %vm629_vm13, %v1752_v15, 0.0 }
  0x9d   : > { %vm840_vm14 = vcmp.eq.s32.totalorder %v1674_v11, %v1772_v30  ;;  %vm842_vm15 = vcmp.eq.s32.totalorder %v1677_v16, %v1772_v30  ;;  %v767_v44 = vadd.f32 %v703_v41, %v553_v3  ;;  %vm263_vm0 = vcmp.eq.s32.totalorder %v1674_v11, %v1737_v62 }
  0x9e   : > { %v769_v45 = vadd.f32 %v705_v43, %v555_v40  ;;  %v916_v46 = vsel %vm840_vm14, %v1731_v60, 0.0  ;;  %v918_v47 = vsel %vm842_vm15, %v1731_v60, 0.0  ;;  %1233 = vmatpush1.bf16.msra.mxu0 %v1232_v42  ;;  %vm265_vm1 = vcmp.eq.s32.totalorder %v1677_v16, %v1737_v62 }
  0x9f   : > { %vm412_vm2 = vcmp.eq.s32.totalorder %v1674_v11, %v1743_v0  ;;  %vm414_vm3 = vcmp.eq.s32.totalorder %v1677_v16, %v1743_v0  ;;  %v980_v48 = vadd.f32 %v916_v46, %v767_v44  ;;  %v339_v51 = vsel %vm263_vm0, %v1716_v49, 0.0 }
  0xa0   : > { %v982_v50 = vadd.f32 %v918_v47, %v769_v45  ;;  %v341_v54 = vsel %vm265_vm1, %v1716_v49, 0.0  ;;  %v488_v55 = vsel %vm412_vm2, %v1722_v53, 0.0  ;;  %v490_v57 = vsel %vm414_vm3, %v1722_v53, 0.0  ;;  %v1028_v47 = vld [vmem:[#allocation2 + $0x8] sm:$0xff] }
  0xa1   : > { %vm626_vm4 = vcmp.eq.s32.totalorder %v1674_v11, %v1763_v23  ;;  %vm628_vm5 = vcmp.eq.s32.totalorder %v1677_v16, %v1763_v23  ;;  %v552_v13 = vadd.f32 %v488_v55, %v339_v51  ;;  %v554_v22 = vadd.f32 %v490_v57, %v341_v54  ;;  %1093 = vmatprep.mubr.f32.mxu0 %v1028_v47 }
  0xa2   : > { %v1234_v58 = vpack.c.bf16 %v982_v50, %v980_v48  ;;  %v702_v31 = vsel %vm626_vm4, %v1749_v14, 0.0  ;;  %v704_v32 = vsel %vm628_vm5, %v1749_v14, 0.0  ;;  %vm839_vm6 = vcmp.eq.s32.totalorder %v1674_v11, %v1769_v25 }
  0xa3   : > { %vm841_vm7 = vcmp.eq.s32.totalorder %v1677_v16, %v1769_v25  ;;  %vm268_vm8 = vcmp.eq.s32.totalorder %v1680_v17, %v1740_v63  ;;  %v766_v33 = vadd.f32 %v702_v31, %v552_v13  ;;  %v768_v4 = vadd.f32 %v704_v32, %v554_v22 }
  0xa4   : > { %1235 = vmatprep.subr.bf16.mxu0 %v1234_v58  ;;  %v915_v34 = vsel %vm839_vm6, %v1728_v59, 0.0  ;;  %v917_v38 = vsel %vm841_vm7, %v1728_v59, 0.0  ;;  %vm270_vm9 = vcmp.eq.s32.totalorder %v1683_v18, %v1740_v63  ;;  %v344_v39 = vsel %vm268_vm8, %v1719_v52, 0.0 }
  0xa5   : > { %vm417_vm10 = vcmp.eq.s32.totalorder %v1680_v17, %v1746_v12  ;;  %vm419_vm11 = vcmp.eq.s32.totalorder %v1683_v18, %v1746_v12  ;;  %v979_v11 = vadd.f32 %v915_v34, %v766_v33  ;;  %v981_v16 = vadd.f32 %v917_v38, %v768_v4 }
  0xa6   : > { %v346_v2 = vsel %vm270_vm9, %v1719_v52, 0.0  ;;  %v493_v5 = vsel %vm417_vm10, %v1725_v56, 0.0  ;;  %v495_v7 = vsel %vm419_vm11, %v1725_v56, 0.0  ;;  %vm631_vm12 = vcmp.eq.s32.totalorder %v1680_v17, %v1766_v24 }
  0xa7   : > { %v557_v9 = vadd.f32 %v493_v5, %v344_v39  ;;  %vm633_vm13 = vcmp.eq.s32.totalorder %v1683_v18, %v1766_v24  ;;  %v1236_v10 = vpack.c.bf16 %v981_v16, %v979_v11  ;;  %v559_v8 = vadd.f32 %v495_v7, %v346_v2 }
  0xa8   : > { %v707_v6 = vsel %vm631_vm12, %v1752_v15, 0.0  ;;  %v709_v3 = vsel %vm633_vm13, %v1752_v15, 0.0  ;;  %vm844_vm14 = vcmp.eq.s32.totalorder %v1680_v17, %v1772_v30  ;;  %vm846_vm15 = vcmp.eq.s32.totalorder %v1683_v18, %v1772_v30 }
  0xa9   : > { %v771_v40 = vadd.f32 %v707_v6, %v557_v9  ;;  %vm267_vm0 = vcmp.eq.s32.totalorder %v1680_v17, %v1737_v62  ;;  %1237 = vmatpush1.bf16.msra.mxu0 %v1236_v10  ;;  %v773_v41 = vadd.f32 %v709_v3, %v559_v8  ;;  %v920_v42 = vsel %vm844_vm14, %v1731_v60, 0.0 }
  0xaa   : > { %v922_v43 = vsel %vm846_vm15, %v1731_v60, 0.0  ;;  %vm269_vm1 = vcmp.eq.s32.totalorder %v1683_v18, %v1737_v62  ;;  %v343_v45 = vsel %vm267_vm0, %v1716_v49, 0.0  ;;  %vm416_vm2 = vcmp.eq.s32.totalorder %v1680_v17, %v1743_v0 }
  0xab   : > { %v984_v44 = vadd.f32 %v920_v42, %v771_v40  ;;  %v345_v46 = vsel %vm269_vm1, %v1716_v49, 0.0  ;;  %v986_v48 = vadd.f32 %v922_v43, %v773_v41  ;;  %vm418_vm3 = vcmp.eq.s32.totalorder %v1683_v18, %v1743_v0 }
  0xac   : > { %v492_v50 = vsel %vm416_vm2, %v1722_v53, 0.0  ;;  %vm630_vm4 = vcmp.eq.s32.totalorder %v1680_v17, %v1763_v23  ;;  %v494_v51 = vsel %vm418_vm3, %v1722_v53, 0.0  ;;  %vm632_vm5 = vcmp.eq.s32.totalorder %v1683_v18, %v1763_v23 }
  0xad   : > { %v556_v54 = vadd.f32 %v492_v50, %v343_v45  ;;  %v706_v55 = vsel %vm630_vm4, %v1749_v14, 0.0  ;;  %v1238_v57 = vpack.c.bf16 %v986_v48, %v984_v44  ;;  %v558_v58 = vadd.f32 %v494_v51, %v345_v46 }
  0xae   : > { %v708_v13 = vsel %vm632_vm5, %v1749_v14, 0.0  ;;  %vm843_vm6 = vcmp.eq.s32.totalorder %v1680_v17, %v1769_v25  ;;  %vm845_vm7 = vcmp.eq.s32.totalorder %v1683_v18, %v1769_v25  ;;  %vm272_vm8 = vcmp.eq.s32.totalorder %v1686_v19, %v1740_v63 }
  0xaf   : > { %v770_v22 = vadd.f32 %v706_v55, %v556_v54  ;;  %v919_v31 = vsel %vm843_vm6, %v1728_v59, 0.0  ;;  %1239 = vmatprep.subr.bf16.mxu0 %v1238_v57  ;;  %v772_v32 = vadd.f32 %v708_v13, %v558_v58  ;;  %v921_v33 = vsel %vm845_vm7, %v1728_v59, 0.0 }
  0xb0   : > { %vm274_vm9 = vcmp.eq.s32.totalorder %v1689_v20, %v1740_v63  ;;  %v348_v4 = vsel %vm272_vm8, %v1719_v52, 0.0  ;;  %vm421_vm10 = vcmp.eq.s32.totalorder %v1686_v19, %v1746_v12  ;;  %vm423_vm11 = vcmp.eq.s32.totalorder %v1689_v20, %v1746_v12 }
  0xb1   : > { %v983_v34 = vadd.f32 %v919_v31, %v770_v22  ;;  %v350_v17 = vsel %vm274_vm9, %v1719_v52, 0.0  ;;  %v985_v18 = vadd.f32 %v921_v33, %v772_v32  ;;  %v497_v38 = vsel %vm421_vm10, %v1725_v56, 0.0 }
  0xb2   : > { %v499_v39 = vsel %vm423_vm11, %v1725_v56, 0.0  ;;  %vm635_vm12 = vcmp.eq.s32.totalorder %v1686_v19, %v1766_v24  ;;  %v561_v11 = vadd.f32 %v497_v38, %v348_v4  ;;  %vm637_vm13 = vcmp.eq.s32.totalorder %v1689_v20, %v1766_v24 }
  0xb3   : > { %v563_v16 = vadd.f32 %v499_v39, %v350_v17  ;;  %v711_v2 = vsel %vm635_vm12, %v1752_v15, 0.0  ;;  %v1240_v5 = vpack.c.bf16 %v985_v18, %v983_v34  ;;  %v713_v7 = vsel %vm637_vm13, %v1752_v15, 0.0 }
  0xb4   : > { %vm848_vm14 = vcmp.eq.s32.totalorder %v1686_v19, %v1772_v30  ;;  %vm850_vm15 = vcmp.eq.s32.totalorder %v1689_v20, %v1772_v30  ;;  %v775_v9 = vadd.f32 %v711_v2, %v561_v11  ;;  %vm271_vm0 = vcmp.eq.s32.totalorder %v1686_v19, %v1737_v62 }
  0xb5   : > { %v777_v10 = vadd.f32 %v713_v7, %v563_v16  ;;  %v924_v8 = vsel %vm848_vm14, %v1731_v60, 0.0  ;;  %v926_v6 = vsel %vm850_vm15, %v1731_v60, 0.0  ;;  %1241 = vmatpush1.bf16.msra.mxu0 %v1240_v5  ;;  %vm273_vm1 = vcmp.eq.s32.totalorder %v1689_v20, %v1737_v62 }
  0xb6   : > { %vm420_vm2 = vcmp.eq.s32.totalorder %v1686_v19, %v1743_v0  ;;  %vm422_vm3 = vcmp.eq.s32.totalorder %v1689_v20, %v1743_v0  ;;  %v988_v3 = vadd.f32 %v924_v8, %v775_v9  ;;  %v347_v41 = vsel %vm271_vm0, %v1716_v49, 0.0 }
  0xb7   : > { %v990_v40 = vadd.f32 %v926_v6, %v777_v10  ;;  %v349_v42 = vsel %vm273_vm1, %v1716_v49, 0.0  ;;  %v496_v43 = vsel %vm420_vm2, %v1722_v53, 0.0  ;;  %v498_v44 = vsel %vm422_vm3, %v1722_v53, 0.0 }
  0xb8   : > { %vm634_vm4 = vcmp.eq.s32.totalorder %v1686_v19, %v1763_v23  ;;  %vm636_vm5 = vcmp.eq.s32.totalorder %v1689_v20, %v1763_v23  ;;  %v560_v46 = vadd.f32 %v496_v43, %v347_v41  ;;  %v562_v47 = vadd.f32 %v498_v44, %v349_v42 }
  0xb9   : > { %v1242_v45 = vpack.c.bf16 %v990_v40, %v988_v3  ;;  %v710_v48 = vsel %vm634_vm4, %v1749_v14, 0.0  ;;  %v712_v50 = vsel %vm636_vm5, %v1749_v14, 0.0  ;;  %vm847_vm6 = vcmp.eq.s32.totalorder %v1686_v19, %v1769_v25 }
  0xba   : > { %vm849_vm7 = vcmp.eq.s32.totalorder %v1689_v20, %v1769_v25  ;;  %vm276_vm8 = vcmp.eq.s32.totalorder %v1692_v21, %v1740_v63  ;;  %v774_v51 = vadd.f32 %v710_v48, %v560_v46  ;;  %v776_v54 = vadd.f32 %v712_v50, %v562_v47 }
  0xbb   : > { %1243 = vmatprep.subr.bf16.mxu0 %v1242_v45  ;;  %v923_v55 = vsel %vm847_vm6, %v1728_v59, 0.0  ;;  %v925_v57 = vsel %vm849_vm7, %v1728_v59, 0.0  ;;  %vm278_vm9 = vcmp.eq.s32.totalorder %v1695_v26, %v1740_v63  ;;  %v352_v58 = vsel %vm276_vm8, %v1719_v52, 0.0 }
  0xbc   : > { %vm425_vm10 = vcmp.eq.s32.totalorder %v1692_v21, %v1746_v12  ;;  %vm427_vm11 = vcmp.eq.s32.totalorder %v1695_v26, %v1746_v12  ;;  %v987_v19 = vadd.f32 %v923_v55, %v774_v51  ;;  %v989_v20 = vadd.f32 %v925_v57, %v776_v54 }
  0xbd   : > { %v354_v13 = vsel %vm278_vm9, %v1719_v52, 0.0  ;;  %v501_v22 = vsel %vm425_vm10, %v1725_v56, 0.0  ;;  %v503_v31 = vsel %vm427_vm11, %v1725_v56, 0.0  ;;  %vm639_vm12 = vcmp.eq.s32.totalorder %v1692_v21, %v1766_v24 }
  0xbe   : > { %v565_v32 = vadd.f32 %v501_v22, %v352_v58  ;;  %vm641_vm13 = vcmp.eq.s32.totalorder %v1695_v26, %v1766_v24  ;;  %v1244_v33 = vpack.c.bf16 %v989_v20, %v987_v19  ;;  %v567_v4 = vadd.f32 %v503_v31, %v354_v13 }
  0xbf   : > { %v715_v34 = vsel %vm639_vm12, %v1752_v15, 0.0  ;;  %v717_v17 = vsel %vm641_vm13, %v1752_v15, 0.0  ;;  %vm852_vm14 = vcmp.eq.s32.totalorder %v1692_v21, %v1772_v30  ;;  %vm854_vm15 = vcmp.eq.s32.totalorder %v1695_v26, %v1772_v30 }
  0xc0   : > { %v779_v18 = vadd.f32 %v715_v34, %v565_v32  ;;  %vm275_vm0 = vcmp.eq.s32.totalorder %v1692_v21, %v1737_v62  ;;  %1245 = vmatpush1.bf16.msra.mxu0 %v1244_v33  ;;  %v781_v38 = vadd.f32 %v717_v17, %v567_v4  ;;  %v928_v39 = vsel %vm852_vm14, %v1731_v60, 0.0 }
  0xc1   : > { %v930_v11 = vsel %vm854_vm15, %v1731_v60, 0.0  ;;  %vm277_vm1 = vcmp.eq.s32.totalorder %v1695_v26, %v1737_v62  ;;  %v351_v2 = vsel %vm275_vm0, %v1716_v49, 0.0  ;;  %vm424_vm2 = vcmp.eq.s32.totalorder %v1692_v21, %v1743_v0 }
  0xc2   : > { %v992_v16 = vadd.f32 %v928_v39, %v779_v18  ;;  %v353_v5 = vsel %vm277_vm1, %v1716_v49, 0.0  ;;  %v994_v7 = vadd.f32 %v930_v11, %v781_v38  ;;  %vm426_vm3 = vcmp.eq.s32.totalorder %v1695_v26, %v1743_v0 }
  0xc3   : > { %v500_v9 = vsel %vm424_vm2, %v1722_v53, 0.0  ;;  %vm638_vm4 = vcmp.eq.s32.totalorder %v1692_v21, %v1763_v23  ;;  %v502_v10 = vsel %vm426_vm3, %v1722_v53, 0.0  ;;  %vm640_vm5 = vcmp.eq.s32.totalorder %v1695_v26, %v1763_v23 }
  0xc4   : > { %v564_v8 = vadd.f32 %v500_v9, %v351_v2  ;;  %v714_v6 = vsel %vm638_vm4, %v1749_v14, 0.0  ;;  %v1246_v3 = vpack.c.bf16 %v994_v7, %v992_v16  ;;  %v566_v40 = vadd.f32 %v502_v10, %v353_v5 }
  0xc5   : > { %v716_v41 = vsel %vm640_vm5, %v1749_v14, 0.0  ;;  %vm851_vm6 = vcmp.eq.s32.totalorder %v1692_v21, %v1769_v25  ;;  %vm853_vm7 = vcmp.eq.s32.totalorder %v1695_v26, %v1769_v25  ;;  %vm280_vm8 = vcmp.eq.s32.totalorder %v1698_v27, %v1740_v63 }
  0xc6   : > { %v778_v42 = vadd.f32 %v714_v6, %v564_v8  ;;  %v927_v43 = vsel %vm851_vm6, %v1728_v59, 0.0  ;;  %1247 = vmatprep.subr.bf16.mxu0 %v1246_v3  ;;  %v780_v44 = vadd.f32 %v716_v41, %v566_v40  ;;  %v929_v45 = vsel %vm853_vm7, %v1728_v59, 0.0 }
  0xc7   : > { %vm282_vm9 = vcmp.eq.s32.totalorder %v1701_v28, %v1740_v63  ;;  %v356_v46 = vsel %vm280_vm8, %v1719_v52, 0.0  ;;  %vm429_vm10 = vcmp.eq.s32.totalorder %v1698_v27, %v1746_v12  ;;  %vm431_vm11 = vcmp.eq.s32.totalorder %v1701_v28, %v1746_v12 }
  0xc8   : > { %v991_v47 = vadd.f32 %v927_v43, %v778_v42  ;;  %v358_v21 = vsel %vm282_vm9, %v1719_v52, 0.0  ;;  %v993_v26 = vadd.f32 %v929_v45, %v780_v44  ;;  %v505_v48 = vsel %vm429_vm10, %v1725_v56, 0.0 }
  0xc9   : > { %v507_v50 = vsel %vm431_vm11, %v1725_v56, 0.0  ;;  %vm643_vm12 = vcmp.eq.s32.totalorder %v1698_v27, %v1766_v24  ;;  %v569_v51 = vadd.f32 %v505_v48, %v356_v46  ;;  %vm645_vm13 = vcmp.eq.s32.totalorder %v1701_v28, %v1766_v24 }
  0xca   : > { %v571_v54 = vadd.f32 %v507_v50, %v358_v21  ;;  %v719_v55 = vsel %vm643_vm12, %v1752_v15, 0.0  ;;  %v1248_v57 = vpack.c.bf16 %v993_v26, %v991_v47  ;;  %v721_v58 = vsel %vm645_vm13, %v1752_v15, 0.0 }
  0xcb   : > { %vm856_vm14 = vcmp.eq.s32.totalorder %v1698_v27, %v1772_v30  ;;  %vm858_vm15 = vcmp.eq.s32.totalorder %v1701_v28, %v1772_v30  ;;  %v783_v19 = vadd.f32 %v719_v55, %v569_v51  ;;  %vm279_vm0 = vcmp.eq.s32.totalorder %v1698_v27, %v1737_v62 }
  0xcc   : > { %v785_v20 = vadd.f32 %v721_v58, %v571_v54  ;;  %v932_v13 = vsel %vm856_vm14, %v1731_v60, 0.0  ;;  %v934_v22 = vsel %vm858_vm15, %v1731_v60, 0.0  ;;  %1249 = vmatpush1.bf16.msra.mxu0 %v1248_v57  ;;  %vm281_vm1 = vcmp.eq.s32.totalorder %v1701_v28, %v1737_v62 }
  0xcd   : > { %vm428_vm2 = vcmp.eq.s32.totalorder %v1698_v27, %v1743_v0  ;;  %vm430_vm3 = vcmp.eq.s32.totalorder %v1701_v28, %v1743_v0  ;;  %v996_v31 = vadd.f32 %v932_v13, %v783_v19  ;;  %v355_v33 = vsel %vm279_vm0, %v1716_v49, 0.0 }
  0xce   : > { %v998_v32 = vadd.f32 %v934_v22, %v785_v20  ;;  %v357_v4 = vsel %vm281_vm1, %v1716_v49, 0.0  ;;  %v504_v34 = vsel %vm428_vm2, %v1722_v53, 0.0  ;;  %v506_v17 = vsel %vm430_vm3, %v1722_v53, 0.0 }
  0xcf   : > { %vm642_vm4 = vcmp.eq.s32.totalorder %v1698_v27, %v1763_v23  ;;  %vm644_vm5 = vcmp.eq.s32.totalorder %v1701_v28, %v1763_v23  ;;  %v568_v38 = vadd.f32 %v504_v34, %v355_v33  ;;  %v570_v39 = vadd.f32 %v506_v17, %v357_v4 }
  0xd0   : > { %v1250_v18 = vpack.c.bf16 %v998_v32, %v996_v31  ;;  %v718_v11 = vsel %vm642_vm4, %v1749_v14, 0.0  ;;  %v720_v16 = vsel %vm644_vm5, %v1749_v14, 0.0  ;;  %vm855_vm6 = vcmp.eq.s32.totalorder %v1698_v27, %v1769_v25 }
  0xd1   : > { %vm857_vm7 = vcmp.eq.s32.totalorder %v1701_v28, %v1769_v25  ;;  %vm284_vm8 = vcmp.eq.s32.totalorder %v1704_v29, %v1740_v63  ;;  %v782_v2 = vadd.f32 %v718_v11, %v568_v38  ;;  %v784_v5 = vadd.f32 %v720_v16, %v570_v39 }
  0xd2   : > { %1251 = vmatprep.subr.bf16.mxu0 %v1250_v18  ;;  %v931_v7 = vsel %vm855_vm6, %v1728_v59, 0.0  ;;  %v933_v9 = vsel %vm857_vm7, %v1728_v59, 0.0  ;;  %vm286_vm9 = vcmp.eq.s32.totalorder %v1707_v35, %v1740_v63  ;;  %v360_v10 = vsel %vm284_vm8, %v1719_v52, 0.0 }
  0xd3   : > { %vm433_vm10 = vcmp.eq.s32.totalorder %v1704_v29, %v1746_v12  ;;  %vm435_vm11 = vcmp.eq.s32.totalorder %v1707_v35, %v1746_v12  ;;  %v995_v27 = vadd.f32 %v931_v7, %v782_v2  ;;  %v997_v28 = vadd.f32 %v933_v9, %v784_v5 }
  0xd4   : > { %v362_v8 = vsel %vm286_vm9, %v1719_v52, 0.0  ;;  %v509_v6 = vsel %vm433_vm10, %v1725_v56, 0.0  ;;  %v511_v3 = vsel %vm435_vm11, %v1725_v56, 0.0  ;;  %vm647_vm12 = vcmp.eq.s32.totalorder %v1704_v29, %v1766_v24 }
  0xd5   : > { %v573_v40 = vadd.f32 %v509_v6, %v360_v10  ;;  %vm649_vm13 = vcmp.eq.s32.totalorder %v1707_v35, %v1766_v24  ;;  %v1252_v41 = vpack.c.bf16 %v997_v28, %v995_v27  ;;  %v575_v42 = vadd.f32 %v511_v3, %v362_v8 }
  0xd6   : > { %v723_v43 = vsel %vm647_vm12, %v1752_v15, 0.0  ;;  %v725_v44 = vsel %vm649_vm13, %v1752_v15, 0.0  ;;  %vm860_vm14 = vcmp.eq.s32.totalorder %v1704_v29, %v1772_v30  ;;  %vm862_vm15 = vcmp.eq.s32.totalorder %v1707_v35, %v1772_v30 }
  0xd7   : > { %v787_v45 = vadd.f32 %v723_v43, %v573_v40  ;;  %vm283_vm0 = vcmp.eq.s32.totalorder %v1704_v29, %v1737_v62  ;;  %1253 = vmatpush1.bf16.msra.mxu0 %v1252_v41  ;;  %v789_v46 = vadd.f32 %v725_v44, %v575_v42  ;;  %v936_v47 = vsel %vm860_vm14, %v1731_v60, 0.0 }
  0xd8   : > { %v938_v21 = vsel %vm862_vm15, %v1731_v60, 0.0  ;;  %vm285_vm1 = vcmp.eq.s32.totalorder %v1707_v35, %v1737_v62  ;;  %v359_v48 = vsel %vm283_vm0, %v1716_v49, 0.0  ;;  %vm432_vm2 = vcmp.eq.s32.totalorder %v1704_v29, %v1743_v0 }
  0xd9   : > { %v1000_v26 = vadd.f32 %v936_v47, %v787_v45  ;;  %v361_v50 = vsel %vm285_vm1, %v1716_v49, 0.0  ;;  %v1002_v51 = vadd.f32 %v938_v21, %v789_v46  ;;  %vm434_vm3 = vcmp.eq.s32.totalorder %v1707_v35, %v1743_v0 }
  0xda   : > { %v508_v54 = vsel %vm432_vm2, %v1722_v53, 0.0  ;;  %vm646_vm4 = vcmp.eq.s32.totalorder %v1704_v29, %v1763_v23  ;;  %v510_v55 = vsel %vm434_vm3, %v1722_v53, 0.0  ;;  %vm648_vm5 = vcmp.eq.s32.totalorder %v1707_v35, %v1763_v23 }
  0xdb   : > { %v572_v57 = vadd.f32 %v508_v54, %v359_v48  ;;  %v722_v58 = vsel %vm646_vm4, %v1749_v14, 0.0  ;;  %v1254_v19 = vpack.c.bf16 %v1002_v51, %v1000_v26  ;;  %v574_v20 = vadd.f32 %v510_v55, %v361_v50 }
  0xdc   : > { %v724_v13 = vsel %vm648_vm5, %v1749_v14, 0.0  ;;  %vm859_vm6 = vcmp.eq.s32.totalorder %v1704_v29, %v1769_v25  ;;  %vm861_vm7 = vcmp.eq.s32.totalorder %v1707_v35, %v1769_v25  ;;  %vm288_vm8 = vcmp.eq.s32.totalorder %v1710_v36, %v1740_v63 }
  0xdd   : > { %v786_v22 = vadd.f32 %v722_v58, %v572_v57  ;;  %v935_v31 = vsel %vm859_vm6, %v1728_v59, 0.0  ;;  %1255 = vmatprep.subr.bf16.mxu0 %v1254_v19  ;;  %v788_v32 = vadd.f32 %v724_v13, %v574_v20  ;;  %v937_v33 = vsel %vm861_vm7, %v1728_v59, 0.0 }
  0xde   : > { %vm290_vm9 = vcmp.eq.s32.totalorder %v1713_v37, %v1740_v63  ;;  %v364_v4 = vsel %vm288_vm8, %v1719_v52, 0.0  ;;  %vm437_vm10 = vcmp.eq.s32.totalorder %v1710_v36, %v1746_v12  ;;  %vm439_vm11 = vcmp.eq.s32.totalorder %v1713_v37, %v1746_v12 }
  0xdf   : > { %v999_v34 = vadd.f32 %v935_v31, %v786_v22  ;;  %v366_v29 = vsel %vm290_vm9, %v1719_v52, 0.0  ;;  %v1001_v35 = vadd.f32 %v937_v33, %v788_v32  ;;  %v513_v17 = vsel %vm437_vm10, %v1725_v56, 0.0 }
  0xe0   : > { %v515_v18 = vsel %vm439_vm11, %v1725_v56, 0.0  ;;  %vm651_vm12 = vcmp.eq.s32.totalorder %v1710_v36, %v1766_v24  ;;  %v577_v38 = vadd.f32 %v513_v17, %v364_v4  ;;  %vm653_vm13 = vcmp.eq.s32.totalorder %v1713_v37, %v1766_v24 }
  0xe1   : > { %v579_v39 = vadd.f32 %v515_v18, %v366_v29  ;;  %v727_v11 = vsel %vm651_vm12, %v1752_v15, 0.0  ;;  %v1256_v16 = vpack.c.bf16 %v1001_v35, %v999_v34  ;;  %v729_v2 = vsel %vm653_vm13, %v1752_v15, 0.0 }
  0xe2   : > { %vm864_vm14 = vcmp.eq.s32.totalorder %v1710_v36, %v1772_v30  ;;  %vm866_vm15 = vcmp.eq.s32.totalorder %v1713_v37, %v1772_v30  ;;  %v791_v5 = vadd.f32 %v727_v11, %v577_v38  ;;  %vm287_vm0 = vcmp.eq.s32.totalorder %v1710_v36, %v1737_v62 }
  0xe3   : > { %v793_v7 = vadd.f32 %v729_v2, %v579_v39  ;;  %v940_v9 = vsel %vm864_vm14, %v1731_v60, 0.0  ;;  %v942_v10 = vsel %vm866_vm15, %v1731_v60, 0.0  ;;  %1257 = vmatpush1.bf16.msra.mxu0 %v1256_v16  ;;  %vm289_vm1 = vcmp.eq.s32.totalorder %v1713_v37, %v1737_v62 }
  0xe4   : > { %vm436_vm2 = vcmp.eq.s32.totalorder %v1710_v36, %v1743_v0  ;;  %vm438_vm3 = vcmp.eq.s32.totalorder %v1713_v37, %v1743_v0  ;;  %v1004_v27 = vadd.f32 %v940_v9, %v791_v5  ;;  %v363_v8 = vsel %vm287_vm0, %v1716_v49, 0.0 }
  0xe5   : > { %v1006_v28 = vadd.f32 %v942_v10, %v793_v7  ;;  %v365_v6 = vsel %vm289_vm1, %v1716_v49, 0.0  ;;  %v512_v3 = vsel %vm436_vm2, %v1722_v53, 0.0  ;;  %v514_v40 = vsel %vm438_vm3, %v1722_v53, 0.0 }
  0xe6   : > { %vm650_vm4 = vcmp.eq.s32.totalorder %v1710_v36, %v1763_v23  ;;  %vm652_vm5 = vcmp.eq.s32.totalorder %v1713_v37, %v1763_v23  ;;  %v576_v42 = vadd.f32 %v512_v3, %v363_v8  ;;  %v578_v43 = vadd.f32 %v514_v40, %v365_v6 }
  0xe7   : > { %v1258_v41 = vpack.c.bf16 %v1006_v28, %v1004_v27  ;;  %v726_v44 = vsel %vm650_vm4, %v1749_v14, 0.0  ;;  %v728_v45 = vsel %vm652_vm5, %v1749_v14, 0.0  ;;  %vm863_vm6 = vcmp.eq.s32.totalorder %v1710_v36, %v1769_v25 }
  0xe8   : > { %vm865_vm7 = vcmp.eq.s32.totalorder %v1713_v37, %v1769_v25  ;;  %v208_v46 = vadd.s32 184, %v1644_v1  ;;  %v790_v47 = vadd.f32 %v726_v44, %v576_v42  ;;  %v792_v21 = vadd.f32 %v728_v45, %v578_v43 }
  0xe9   : > { %1259 = vmatprep.subr.bf16.mxu0 %v1258_v41  ;;  %v939_v26 = vsel %vm863_vm6, %v1728_v59, 0.0  ;;  %v941_v48 = vsel %vm865_vm7, %v1728_v59, 0.0  ;;  %vm292_vm8 = vcmp.eq.s32.totalorder %v1734_v61, %v1740_v63  ;;  %vm441_vm10 = vcmp.eq.s32.totalorder %v1734_v61, %v1746_v12 }
  0xea   : > { %vm294_vm9 = vcmp.eq.s32.totalorder %v208_v46, %v1740_v63  ;;  %vm443_vm11 = vcmp.eq.s32.totalorder %v208_v46, %v1746_v12  ;;  %v1003_v36 = vadd.f32 %v939_v26, %v790_v47  ;;  %v1005_v37 = vadd.f32 %v941_v48, %v792_v21 }
  0xeb   : > { %v368_v50 = vsel %vm292_vm8, %v1719_v52, 0.0  ;;  %v370_v51 = vsel %vm294_vm9, %v1719_v52, 0.0  ;;  %v517_v54 = vsel %vm441_vm10, %v1725_v56, 0.0  ;;  %v519_v55 = vsel %vm443_vm11, %v1725_v56, 0.0 }
  0xec   : > { %vm655_vm12 = vcmp.eq.s32.totalorder %v1734_v61, %v1766_v24  ;;  %vm657_vm13 = vcmp.eq.s32.totalorder %v208_v46, %v1766_v24  ;;  %v1260_v57 = vpack.c.bf16 %v1005_v37, %v1003_v36  ;;  %v581_v58 = vadd.f32 %v517_v54, %v368_v50 }
  0xed   : > { %v583_v19 = vadd.f32 %v519_v55, %v370_v51  ;;  %v731_v20 = vsel %vm655_vm12, %v1752_v15, 0.0  ;;  %v733_v13 = vsel %vm657_vm13, %v1752_v15, 0.0  ;;  %vm868_vm14 = vcmp.eq.s32.totalorder %v1734_v61, %v1772_v30 }
  0xee   : > { %vm870_vm15 = vcmp.eq.s32.totalorder %v208_v46, %v1772_v30  ;;  %vm291_vm0 = vcmp.eq.s32.totalorder %v1734_v61, %v1737_v62  ;;  %1261 = vmatpush1.bf16.msra.mxu0 %v1260_v57  ;;  %v795_v22 = vadd.f32 %v731_v20, %v581_v58  ;;  %v944_v32 = vsel %vm868_vm14, %v1731_v60, 0.0 }
  0xef   : > { %v797_v31 = vadd.f32 %v733_v13, %v583_v19  ;;  %v946_v33 = vsel %vm870_vm15, %v1731_v60, 0.0  ;;  %vm293_vm1 = vcmp.eq.s32.totalorder %v208_v46, %v1737_v62  ;;  %v367_v4 = vsel %vm291_vm0, %v1716_v49, 0.0 }
  0xf0   : > { %vm440_vm2 = vcmp.eq.s32.totalorder %v1734_v61, %v1743_v0  ;;  %vm442_vm3 = vcmp.eq.s32.totalorder %v208_v46, %v1743_v0  ;;  %v1008_v34 = vadd.f32 %v944_v32, %v795_v22  ;;  %v369_v35 = vsel %vm293_vm1, %v1716_v49, 0.0 }
  0xf1   : > { %v1010_v29 = vadd.f32 %v946_v33, %v797_v31  ;;  %v516_v17 = vsel %vm440_vm2, %v1722_v53, 0.0  ;;  %v518_v18 = vsel %vm442_vm3, %v1722_v53, 0.0  ;;  %vm654_vm4 = vcmp.eq.s32.totalorder %v1734_v61, %v1763_v23 }
  0xf2   : > { %v580_v38 = vadd.f32 %v516_v17, %v367_v4  ;;  %vm656_vm5 = vcmp.eq.s32.totalorder %v208_v46, %v1763_v23  ;;  %v582_v11 = vadd.f32 %v518_v18, %v369_v35  ;;  %v730_v16 = vsel %vm654_vm4, %v1749_v14, 0.0 }
  0xf3   : > { %v1262_v39 = vpack.c.bf16 %v1010_v29, %v1008_v34  ;;  %v732_v2 = vsel %vm656_vm5, %v1749_v14, 0.0  ;;  %vm867_vm6 = vcmp.eq.s32.totalorder %v1734_v61, %v1769_v25  ;;  %vm869_vm7 = vcmp.eq.s32.totalorder %v208_v46, %v1769_v25 }
  0xf4   : > { %v794_v5 = vadd.f32 %v730_v16, %v580_v38  ;;  %v209_v7 = vadd.s32 192, %v1644_v1  ;;  %v796_v9 = vadd.f32 %v732_v2, %v582_v11  ;;  %v943_v10 = vsel %vm867_vm6, %v1728_v59, 0.0 }
  0xf5   : > { %1263 = vmatprep.subr.bf16.mxu0 %v1262_v39  ;;  %v945_v27 = vsel %vm869_vm7, %v1728_v59, 0.0  ;;  %v210_v28 = vadd.s32 200, %v1644_v1  ;;  %v211_v31 = vadd.s32 208, %v1644_v1  ;;  %v212_v34 = vadd.s32 216, %v1644_v1 }
  0xf6   : > { %v1007_v8 = vadd.f32 %v943_v10, %v794_v5  ;;  %vm296_vm8 = vcmp.eq.s32.totalorder %v209_v7, %v1740_v63  ;;  %vm445_vm9 = vcmp.eq.s32.totalorder %v209_v7, %v1746_v12  ;;  %vm659_vm10 = vcmp.eq.s32.totalorder %v209_v7, %v1766_v24 }
  0xf7   : > { %v1009_v61 = vadd.f32 %v945_v27, %v796_v9  ;;  %vm298_vm11 = vcmp.eq.s32.totalorder %v210_v28, %v1740_v63  ;;  %v372_v6 = vsel %vm296_vm8, %v1719_v52, 0.0  ;;  %vm447_vm12 = vcmp.eq.s32.totalorder %v210_v28, %v1746_v12 }
  0xf8   : > { %v374_v3 = vsel %vm298_vm11, %v1719_v52, 0.0  ;;  %v521_v40 = vsel %vm445_vm9, %v1725_v56, 0.0  ;;  %v523_v41 = vsel %vm447_vm12, %v1725_v56, 0.0  ;;  %vm661_vm13 = vcmp.eq.s32.totalorder %v210_v28, %v1766_v24 }
  0xf9   : > { %v1264_v42 = vpack.c.bf16 %v1009_v61, %v1007_v8  ;;  %v585_v43 = vadd.f32 %v521_v40, %v372_v6  ;;  %v587_v44 = vadd.f32 %v523_v41, %v374_v3  ;;  %v735_v45 = vsel %vm659_vm10, %v1752_v15, 0.0 }
  0xfa   : > { %v737_v46 = vsel %vm661_vm13, %v1752_v15, 0.0  ;;  %vm872_vm14 = vcmp.eq.s32.totalorder %v209_v7, %v1772_v30  ;;  %vm874_vm15 = vcmp.eq.s32.totalorder %v210_v28, %v1772_v30  ;;  %vm295_vm0 = vcmp.eq.s32.totalorder %v209_v7, %v1737_v62 }
  0xfb   : > { %1265 = vmatpush1.bf16.msra.mxu0 %v1264_v42  ;;  %v799_v47 = vadd.f32 %v735_v45, %v585_v43  ;;  %v801_v21 = vadd.f32 %v737_v46, %v587_v44  ;;  %v948_v26 = vsel %vm872_vm14, %v1731_v60, 0.0  ;;  %v950_v48 = vsel %vm874_vm15, %v1731_v60, 0.0 }
  0xfc   : > { %vm297_vm1 = vcmp.eq.s32.totalorder %v210_v28, %v1737_v62  ;;  %v371_v36 = vsel %vm295_vm0, %v1716_v49, 0.0  ;;  %vm444_vm2 = vcmp.eq.s32.totalorder %v209_v7, %v1743_v0  ;;  %vm446_vm3 = vcmp.eq.s32.totalorder %v210_v28, %v1743_v0 }
  0xfd   : > { %v1012_v37 = vadd.f32 %v948_v26, %v799_v47  ;;  %v1014_v50 = vadd.f32 %v950_v48, %v801_v21  ;;  %v373_v51 = vsel %vm297_vm1, %v1716_v49, 0.0  ;;  %v520_v54 = vsel %vm444_vm2, %v1722_v53, 0.0 }
  0xfe   : > { %v522_v55 = vsel %vm446_vm3, %v1722_v53, 0.0  ;;  %v584_v57 = vadd.f32 %v520_v54, %v371_v36  ;;  %vm658_vm4 = vcmp.eq.s32.totalorder %v209_v7, %v1763_v23  ;;  %vm660_vm5 = vcmp.eq.s32.totalorder %v210_v28, %v1763_v23 }
  0xff   : > { %v1266_v58 = vpack.c.bf16 %v1014_v50, %v1012_v37  ;;  %v586_v19 = vadd.f32 %v522_v55, %v373_v51  ;;  %v734_v20 = vsel %vm658_vm4, %v1749_v14, 0.0  ;;  %v736_v13 = vsel %vm660_vm5, %v1749_v14, 0.0 }
 0x100   : > { %v798_v22 = vadd.f32 %v734_v20, %v584_v57  ;;  %vm871_vm6 = vcmp.eq.s32.totalorder %v209_v7, %v1769_v25  ;;  %vm873_vm7 = vcmp.eq.s32.totalorder %v210_v28, %v1769_v25  ;;  %vm300_vm8 = vcmp.eq.s32.totalorder %v211_v31, %v1740_v63 }
 0x101   : > { %1267 = vmatprep.subr.bf16.mxu0 %v1266_v58  ;;  %v800_v32 = vadd.f32 %v736_v13, %v586_v19  ;;  %v947_v33 = vsel %vm871_vm6, %v1728_v59, 0.0  ;;  %v949_v4 = vsel %vm873_vm7, %v1728_v59, 0.0  ;;  %vm449_vm9 = vcmp.eq.s32.totalorder %v211_v31, %v1746_v12 }
 0x102   : > { %v1011_v29 = vadd.f32 %v947_v33, %v798_v22  ;;  %vm663_vm10 = vcmp.eq.s32.totalorder %v211_v31, %v1766_v24  ;;  %vm302_vm11 = vcmp.eq.s32.totalorder %v212_v34, %v1740_v63  ;;  %v376_v17 = vsel %vm300_vm8, %v1719_v52, 0.0 }
 0x103   : > { %v1013_v35 = vadd.f32 %v949_v4, %v800_v32  ;;  %vm451_vm12 = vcmp.eq.s32.totalorder %v212_v34, %v1746_v12  ;;  %v378_v18 = vsel %vm302_vm11, %v1719_v52, 0.0  ;;  %v525_v38 = vsel %vm449_vm9, %v1725_v56, 0.0 }
 0x104   : > { %v527_v39 = vsel %vm451_vm12, %v1725_v56, 0.0  ;;  %vm665_vm13 = vcmp.eq.s32.totalorder %v212_v34, %v1766_v24  ;;  %v589_v16 = vadd.f32 %v525_v38, %v376_v17  ;;  %v739_v5 = vsel %vm663_vm10, %v1752_v15, 0.0 }
 0x105   : > { %v1268_v11 = vpack.c.bf16 %v1013_v35, %v1011_v29  ;;  %v591_v2 = vadd.f32 %v527_v39, %v378_v18  ;;  %v741_v7 = vsel %vm665_vm13, %v1752_v15, 0.0  ;;  %vm876_vm14 = vcmp.eq.s32.totalorder %v211_v31, %v1772_v30 }
 0x106   : > { %vm878_vm15 = vcmp.eq.s32.totalorder %v212_v34, %v1772_v30  ;;  %vm299_vm0 = vcmp.eq.s32.totalorder %v211_v31, %v1737_v62  ;;  %v803_v9 = vadd.f32 %v739_v5, %v589_v16  ;;  %v952_v27 = vsel %vm876_vm14, %v1731_v60, 0.0 }
 0x107   : > { %1269 = vmatpush1.bf16.msra.mxu0 %v1268_v11  ;;  %v805_v10 = vadd.f32 %v741_v7, %v591_v2  ;;  %v954_v28 = vsel %vm878_vm15, %v1731_v60, 0.0  ;;  %vm301_vm1 = vcmp.eq.s32.totalorder %v212_v34, %v1737_v62  ;;  %v375_v8 = vsel %vm299_vm0, %v1716_v49, 0.0 }
 0x108   : > { %vm448_vm2 = vcmp.eq.s32.totalorder %v211_v31, %v1743_v0  ;;  %vm450_vm3 = vcmp.eq.s32.totalorder %v212_v34, %v1743_v0  ;;  %v1016_v61 = vadd.f32 %v952_v27, %v803_v9  ;;  %v377_v3 = vsel %vm301_vm1, %v1716_v49, 0.0 }
 0x109   : > { %v1018_v6 = vadd.f32 %v954_v28, %v805_v10  ;;  %v524_v40 = vsel %vm448_vm2, %v1722_v53, 0.0  ;;  %v526_v41 = vsel %vm450_vm3, %v1722_v53, 0.0  ;;  %vm662_vm4 = vcmp.eq.s32.totalorder %v211_v31, %v1763_v23 }
 0x10a   : > { %v588_v42 = vadd.f32 %v524_v40, %v375_v8  ;;  %vm664_vm5 = vcmp.eq.s32.totalorder %v212_v34, %v1763_v23  ;;  %v590_v44 = vadd.f32 %v526_v41, %v377_v3  ;;  %v738_v45 = vsel %vm662_vm4, %v1749_v14, 0.0 }
 0x10b   : > { %v1270_v43 = vpack.c.bf16 %v1018_v6, %v1016_v61  ;;  %v740_v46 = vsel %vm664_vm5, %v1749_v14, 0.0  ;;  %vm875_vm6 = vcmp.eq.s32.totalorder %v211_v31, %v1769_v25  ;;  %vm877_vm7 = vcmp.eq.s32.totalorder %v212_v34, %v1769_v25 }
 0x10c   : > { %v802_v47 = vadd.f32 %v738_v45, %v588_v42  ;;  %v213_v21 = vadd.s32 224, %v1644_v1  ;;  %v804_v26 = vadd.f32 %v740_v46, %v590_v44  ;;  %v951_v48 = vsel %vm875_vm6, %v1728_v59, 0.0 }
 0x10d   : > { %1271 = vmatprep.subr.bf16.mxu0 %v1270_v43  ;;  %v953_v36 = vsel %vm877_vm7, %v1728_v59, 0.0  ;;  %v214_v37 = vadd.s32 232, %v1644_v1  ;;  %v215_v10 = vadd.s32 240, %v1644_v1  ;;  %v216_v61 = vadd.s32 248, %v1644_v1 }
 0x10e   : > { %v1015_v50 = vadd.f32 %v951_v48, %v802_v47  ;;  %vm304_vm8 = vcmp.eq.s32.totalorder %v213_v21, %v1740_v63  ;;  %vm453_vm9 = vcmp.eq.s32.totalorder %v213_v21, %v1746_v12  ;;  %vm667_vm10 = vcmp.eq.s32.totalorder %v213_v21, %v1766_v24 }
 0x10f   : > { %v1017_v51 = vadd.f32 %v953_v36, %v804_v26  ;;  %vm306_vm11 = vcmp.eq.s32.totalorder %v214_v37, %v1740_v63  ;;  %v380_v54 = vsel %vm304_vm8, %v1719_v52, 0.0  ;;  %vm455_vm12 = vcmp.eq.s32.totalorder %v214_v37, %v1746_v12 }
 0x110   : > { %v382_v55 = vsel %vm306_vm11, %v1719_v52, 0.0  ;;  %v529_v57 = vsel %vm453_vm9, %v1725_v56, 0.0  ;;  %v531_v58 = vsel %vm455_vm12, %v1725_v56, 0.0  ;;  %vm669_vm13 = vcmp.eq.s32.totalorder %v214_v37, %v1766_v24 }
 0x111   : > { %v1272_v19 = vpack.c.bf16 %v1017_v51, %v1015_v50  ;;  %v593_v20 = vadd.f32 %v529_v57, %v380_v54  ;;  %v595_v13 = vadd.f32 %v531_v58, %v382_v55  ;;  %v743_v22 = vsel %vm667_vm10, %v1752_v15, 0.0  ;;  %v1027_v57 = vld [vmem:[#allocation2] sm:$0xff] }
 0x112   : > { %v745_v31 = vsel %vm669_vm13, %v1752_v15, 0.0  ;;  %vm880_vm14 = vcmp.eq.s32.totalorder %v213_v21, %v1772_v30  ;;  %vm882_vm15 = vcmp.eq.s32.totalorder %v214_v37, %v1772_v30  ;;  %vm303_vm0 = vcmp.eq.s32.totalorder %v213_v21, %v1737_v62 }
 0x113   : > { %1273 = vmatpush1.bf16.msra.mxu0 %v1272_v19  ;;  %v807_v32 = vadd.f32 %v743_v22, %v593_v20  ;;  %v809_v33 = vadd.f32 %v745_v31, %v595_v13  ;;  %v956_v4 = vsel %vm880_vm14, %v1731_v60, 0.0  ;;  %v958_v34 = vsel %vm882_vm15, %v1731_v60, 0.0 }
 0x114   : > { %vm305_vm1 = vcmp.eq.s32.totalorder %v214_v37, %v1737_v62  ;;  %v379_v29 = vsel %vm303_vm0, %v1716_v49, 0.0  ;;  %vm452_vm2 = vcmp.eq.s32.totalorder %v213_v21, %v1743_v0  ;;  %vm454_vm3 = vcmp.eq.s32.totalorder %v214_v37, %v1743_v0 }
 0x115   : > { %v1020_v35 = vadd.f32 %v956_v4, %v807_v32  ;;  %v1022_v17 = vadd.f32 %v958_v34, %v809_v33  ;;  %v381_v18 = vsel %vm305_vm1, %v1716_v49, 0.0  ;;  %v528_v38 = vsel %vm452_vm2, %v1722_v53, 0.0 }
 0x116   : > { %v530_v39 = vsel %vm454_vm3, %v1722_v53, 0.0  ;;  %v592_v11 = vadd.f32 %v528_v38, %v379_v29  ;;  %vm666_vm4 = vcmp.eq.s32.totalorder %v213_v21, %v1763_v23  ;;  %vm668_vm5 = vcmp.eq.s32.totalorder %v214_v37, %v1763_v23 }
 0x117   : > { %v1274_v16 = vpack.c.bf16 %v1022_v17, %v1020_v35  ;;  %v594_v2 = vadd.f32 %v530_v39, %v381_v18  ;;  %v742_v5 = vsel %vm666_vm4, %v1749_v14, 0.0  ;;  %v744_v7 = vsel %vm668_vm5, %v1749_v14, 0.0 }
 0x118   : > { %v806_v9 = vadd.f32 %v742_v5, %v592_v11  ;;  %vm879_vm6 = vcmp.eq.s32.totalorder %v213_v21, %v1769_v25  ;;  %vm881_vm7 = vcmp.eq.s32.totalorder %v214_v37, %v1769_v25  ;;  %vm308_vm8 = vcmp.eq.s32.totalorder %v215_v10, %v1740_v63 }
 0x119   : > { %1275 = vmatprep.subr.bf16.mxu0 %v1274_v16  ;;  %v808_v27 = vadd.f32 %v744_v7, %v594_v2  ;;  %v955_v28 = vsel %vm879_vm6, %v1728_v59, 0.0  ;;  %v957_v8 = vsel %vm881_vm7, %v1728_v59, 0.0  ;;  %vm457_vm9 = vcmp.eq.s32.totalorder %v215_v10, %v1746_v12 }
 0x11a   : > { %v1019_v6 = vadd.f32 %v955_v28, %v806_v9  ;;  %vm671_vm10 = vcmp.eq.s32.totalorder %v215_v10, %v1766_v24  ;;  %vm310_vm11 = vcmp.eq.s32.totalorder %v216_v61, %v1740_v63  ;;  %v384_v40 = vsel %vm308_vm8, %v1719_v52, 0.0 }
 0x11b   : > { %v1021_v3 = vadd.f32 %v957_v8, %v808_v27  ;;  %vm459_vm12 = vcmp.eq.s32.totalorder %v216_v61, %v1746_v12  ;;  %v386_v41 = vsel %vm310_vm11, %v1719_v52, 0.0  ;;  %v533_v42 = vsel %vm457_vm9, %v1725_v56, 0.0 }
 0x11c   : > { %v535_v1 = vsel %vm459_vm12, %v1725_v56, 0.0  ;;  %vm673_vm13 = vcmp.eq.s32.totalorder %v216_v61, %v1766_v24  ;;  %v597_v44 = vadd.f32 %v533_v42, %v384_v40  ;;  %v747_v46 = vsel %vm671_vm10, %v1752_v15, 0.0 }
 0x11d   : > { %v1276_v43 = vpack.c.bf16 %v1021_v3, %v1019_v6  ;;  %v599_v45 = vadd.f32 %v535_v1, %v386_v41  ;;  %v749_v47 = vsel %vm673_vm13, %v1752_v15, 0.0  ;;  %vm884_vm14 = vcmp.eq.s32.totalorder %v215_v10, %v1772_v30 }
 0x11e   : > { %vm886_vm15 = vcmp.eq.s32.totalorder %v216_v61, %v1772_v30  ;;  %vm307_vm0 = vcmp.eq.s32.totalorder %v215_v10, %v1737_v62  ;;  %v811_v52 = vadd.f32 %v747_v46, %v597_v44  ;;  %v960_v56 = vsel %vm884_vm14, %v1731_v60, 0.0 }
 0x11f   : > { %1277 = vmatpush1.bf16.msra.mxu0 %v1276_v43  ;;  %v813_v63 = vadd.f32 %v749_v47, %v599_v45  ;;  %v962_v12 = vsel %vm886_vm15, %v1731_v60, 0.0  ;;  %vm309_vm1 = vcmp.eq.s32.totalorder %v216_v61, %v1737_v62  ;;  %v383_v24 = vsel %vm307_vm0, %v1716_v49, 0.0 }
 0x120   : > { %vm456_vm2 = vcmp.eq.s32.totalorder %v215_v10, %v1743_v0  ;;  %vm458_vm3 = vcmp.eq.s32.totalorder %v216_v61, %v1743_v0  ;;  %v1024_v15 = vadd.f32 %v960_v56, %v811_v52  ;;  %v385_v30 = vsel %vm309_vm1, %v1716_v49, 0.0 }
 0x121   : > { %v1026_v21 = vadd.f32 %v962_v12, %v813_v63  ;;  %v532_v26 = vsel %vm456_vm2, %v1722_v53, 0.0  ;;  %v534_v48 = vsel %vm458_vm3, %v1722_v53, 0.0  ;;  %vm670_vm4 = vcmp.eq.s32.totalorder %v215_v10, %v1763_v23 }
 0x122   : > { %v596_v36 = vadd.f32 %v532_v26, %v383_v24  ;;  %vm672_vm5 = vcmp.eq.s32.totalorder %v216_v61, %v1763_v23  ;;  %v598_v62 = vadd.f32 %v534_v48, %v385_v30  ;;  %v746_v37 = vsel %vm670_vm4, %v1749_v14, 0.0 }
 0x123   : > { %v1278_v60 = vpack.c.bf16 %v1026_v21, %v1024_v15  ;;  %v748_v0 = vsel %vm672_vm5, %v1749_v14, 0.0  ;;  %vm883_vm6 = vcmp.eq.s32.totalorder %v215_v10, %v1769_v25  ;;  %vm885_vm7 = vcmp.eq.s32.totalorder %v216_v61, %v1769_v25 }
 0x124   : > { %v810_v50 = vadd.f32 %v746_v37, %v596_v36  ;;  %v812_v49 = vadd.f32 %v748_v0, %v598_v62  ;;  %v959_v53 = vsel %vm883_vm6, %v1728_v59, 0.0  ;;  %v961_v51 = vsel %vm885_vm7, %v1728_v59, 0.0 }
 0x125   : > { %1279 = vmatprep.subr.bf16.mxu0 %v1278_v60 }
 0x126   : > { %v1023_v23 = vadd.f32 %v959_v53, %v810_v50  ;;  %v1025_v54 = vadd.f32 %v961_v51, %v812_v49 }
 0x128   : > { %v1280_v55 = vpack.c.bf16 %v1025_v54, %v1023_v23 }
 0x12a   : > { %1281 = vmatpush1.bf16.msra.mxu0 %v1280_v55 }
 0x12d   : > { %1094 = vmatmul.mubr.f32.vlgmr.msra.gmra.mrb[0].mxu0 %v1027_v57 }
 0x200   : > { %v1095_v14 = vpop.f32.mrb[0].mxu0 }
 0x201   : > { %1100 = vst [vmem:[%s172_s17] sm:$0xff] %v1095_v14  ;;  %v1097_v59 = vpop.f32.mrb[1].mxu0 }
 0x202   : > { %1101 = vst [vmem:[%s172_s17 + $0x8] sm:$0xff] %v1097_v59 }
 0x203   : > { %1414 = shalt.err (!%p1411_p10)
}
 0x204   : > { %s1415_s6 = scalar_lea.hbm %s2478_s29, 256  ;;  %s1419_s21 = scalar_lea.hbm %s2522_s2, 512 }
 0x205   : > { %p1416_p1 = scmp.ne.s32.totalorder %s2478_s29, %s1415_s6  ;;  %p1420_p3 = scmp.lt.u32.totalorder %s2478_s29, %s2522_s2 }
 0x206   : > { %p1421_p4 = scmp.lt.u32.totalorder %s1419_s21, %s1415_s6  ;;  %p1423_p11 = scmp.lt.u32.totalorder %s1415_s6, %s2478_s29 }
 0x207   : > { %p1417_p2 = pnand %p1416_p1, %p1583_p8 }
 0x208   : > { %p1422_p6 = por %p1421_p4, %p1420_p3 }
 0x209   : > { %p1418_p7 = pneg %p1417_p2 }
 0x20a   : > { %p1424_p9 = por %p1423_p11, %p1422_p6 }
 0x20c   : > { %p1425_p12 = pnand %p1424_p9, %p1418_p7 }
 0x20e   : > { %1428 = shalt.err (!%p1425_p12)
}
 0x20f   : > { %1292 = dma.vmem_to_hbm [thread:$0]  (%p1583_p8), %s2473_s19, 256, %s2478_s29, %s1103_s30  }
 0x210 PF: > { %s1129_s23 = sand.u32 1, %s1459_s9   ;;  %p2541_p13 = scmp.ne.s32.totalorder %s2527_s16, 0 }
 0x211   : > { %p2542_p0 = scmp.ge.s32.totalorder %s1471_s12, 2  ;;  %s1130_s26 = scalar_lea.sflag [#allocation4], %s1129_s23 }
 0x213   : > { %p1303_p5 = pnand %p2542_p0, %p2541_p13 }
 0x215   : > { %1454 = dma.done.wait (!%p1303_p5), %s1130_s26, 256  }
 0x216   : > { %1456 = vsyncadd (!%p1303_p5), %s1130_s26, 4294967040  ;;  %p16_p10 = scmp.ge.s32.totalorder %s1539_s20, 4   ;;  %s2543_s9 = smov %s1463_s10 }
 0x217   : > { %s2544_s10 = smov %s1467_s11  ;;  %s2545_s11 = smov %s1575_s7 }
 0x218   : > { %s2546_s12 = smov %s1539_s20  ;;  %18 = sbr.rel (!%p16_p10) target bundleno = 6 (0x6), region = 79 }
 0x21f   :  { %1135 = vsyncpa [#allocation3], 1 }
 0x220   :  { %1137 = vsyncpa [#allocation3 + $0x1], 1 }
 0x221   :  { %1138 = vsyncpa [#allocation6], 1 }
 0x222   :  { %1140 = vsyncpa [#allocation6 + $0x1], 1 }
 0x223   :  { %1141 = vsyncpa [#allocation4], 1 }
 0x224   :  { %1143 = vsyncpa [#allocation4 + $0x1], 1 }

</bundles_post_ra>
